<compile_context>
chip_gen: v5e
topology: v5e:2x2
jax: 0.10.0
libtpu: 0.0.40
codegen_flags: <defaults>
</compile_context>

<pallas_src>
import functools

import jax
import jax.numpy as jnp
from jax import lax
from jax.experimental import pallas as pl
from jax.experimental.pallas import tpu as pltpu


def tinynet_kernel(x_ref, w1_ref, b1_ref, w2_ref, b2_ref,
                   fc1w_ref, fc1b_ref, fc2w_ref, fc2b_ref,
                   out_ref, *, nonlin=True):
    # Frame bookkeeping (all static):
    #   x_ref holds the raw 28x28 image flattened row-major on sublanes
    #   (frame row of pixel (r, c) is 28*r + c) with the batch on lanes.
    #   After the 4x4 pool, valid entries sit at rows 112*i + 4*j; conv1 /
    #   pool2 / conv2 stay in that frame with static contiguous slices, and
    #   rows that would "wrap" are garbage that is provably never read.
    def act(v):
        return jnp.maximum(v, 0.0) if nonlin else v

    # Hoist all SMEM scalar reads once (JAX does not CSE repeated scalar loads).
    w1 = [w1_ref[i] for i in range(8)]        # co*4 + di*2 + dj
    b1 = [b1_ref[i] for i in range(2)]
    w2 = [w2_ref[i] for i in range(16)]       # co*8 + ci*4 + di*2 + dj
    b2 = [b2_ref[i] for i in range(2)]
    fc1w = [fc1w_ref[i] for i in range(4)]    # j*2 + i
    fc1b = [fc1b_ref[i] for i in range(2)]
    fc2w = [fc2w_ref[i] for i in range(20)]   # r*2 + j
    fc2b = [fc2b_ref[i] for i in range(10)]

    # ---- max_pool2d(4, 4): separable max in the 28-wide frame ---------------
    # column direction (dj = 0..3), balanced tree
    a = jnp.maximum(x_ref[pl.ds(0, 781), :], x_ref[pl.ds(1, 781), :])
    b = jnp.maximum(x_ref[pl.ds(2, 781), :], x_ref[pl.ds(3, 781), :])
    tdj = jnp.maximum(a, b)                                  # (781, nb)
    # row direction (di = 0..3), offsets +28*di
    a = jnp.maximum(tdj[0:697], tdj[28:725])
    b = jnp.maximum(tdj[56:753], tdj[84:781])
    p1 = jnp.maximum(a, b)                                   # (697, nb)
    # pooled 7x7 value (i, j) lives at frame row 112*i + 4*j

    # ---- conv1: Conv2d(1, 2, 2, 1); tap (di,dj) -> offset 112*di + 4*dj -----
    y = []
    for co in range(2):
        t0 = w1[co * 4 + 0] * p1[0:581] + w1[co * 4 + 1] * p1[4:585]
        t1 = w1[co * 4 + 2] * p1[112:693] + w1[co * 4 + 3] * p1[116:697]
        y.append(act((t0 + t1) + b1[co]))                    # (581, nb)
    # conv1 output (i, j), i,j in 0..5, at frame row 112*i + 4*j

    # ---- max_pool2d(2, 2): 6x6 -> 3x3, separable, same frame ----------------
    u = []
    for co in range(2):
        t = jnp.maximum(y[co][0:577], y[co][4:581])          # dj direction
        u.append(jnp.maximum(t[0:465], t[112:577]))          # di direction (465, nb)
    # pooled 3x3 value (I, J) at frame row 224*I + 8*J

    # ---- conv2: Conv2d(2, 2, 2, 1); tap (di,dj) -> offset 224*di + 8*dj -----
    z = []
    for co in range(2):
        terms = []
        for ci in range(2):
            base = co * 8 + ci * 4
            terms.append(w2[base + 0] * u[ci][0:233]
                         + w2[base + 1] * u[ci][8:241])
            terms.append(w2[base + 2] * u[ci][224:457]
                         + w2[base + 3] * u[ci][232:465])
        z.append(act((terms[0] + terms[1]) + (terms[2] + terms[3]) + b2[co]))
    # conv2 output (I, J), I,J in 0..1, at frame rows {0, 8, 224, 232}  (233, nb)

    # ---- max_pool2d(2, 2): 2x2 -> 1x1 per channel ---------------------------
    f = []
    for co in range(2):
        zc = z[co]
        f.append(jnp.maximum(jnp.maximum(zc[0:1], zc[8:9]),
                             jnp.maximum(zc[224:225], zc[232:233])))   # (1, nb)

    # ---- fc1: Linear(2, 2) (+ relu), scalar-broadcast MACs ------------------
    h = []
    for j in range(2):
        h.append(act(fc1w[j * 2 + 0] * f[0]
                     + fc1w[j * 2 + 1] * f[1]
                     + fc1b[j]))                             # (1, nb)

    # ---- fc2: Linear(2, 10) -> lane-dense (10, nb) output, row by row -------
    for r in range(10):
        out_ref[pl.ds(r, 1), :] = (fc2w[2 * r + 0] * h[0]
                                   + fc2w[2 * r + 1] * h[1]
                                   + fc2b[r])


def _round_up(a, b):
    return (a + b - 1) // b * b


def _tpu_vmem_bytes():
    """Best-effort VMEM capacity query (falls back to a conservative value)."""
    try:
        info = pltpu.get_tpu_info()
        cap = getattr(info, "vmem_capacity_bytes", None)
        if cap:
            return int(cap), True
    except Exception:
        pass
    return 64 * 1024 * 1024, False      # conservative (v7x per-TC)


def tinynet_forward(x, params, nonlin=True):
    # x: (N, 1, 28, 28) NCHW float32
    n = x.shape[0]
    assert x.shape[1:] == (1, 28, 28), x.shape

    vmem_cap, detected = _tpu_vmem_bytes()
    big_vmem = vmem_cap >= 100 * 1024 * 1024        # v5e/v6e: 128 MiB VMEM
    nb_cap = 2048 if big_vmem else 1024             # batch lanes per grid step
    vmem_limit = (96 if big_vmem else 48) * 1024 * 1024

    nb = min(nb_cap, _round_up(max(n, 1), 128))
    if detected and not big_vmem:
        # v7x-like part (2 TensorCores / 64 MiB per TC): prefer >= 2 grid
        # steps so the "parallel" batch axis shards across both cores.
        if nb > 128 and _round_up(max(n, 1), nb) // nb < 2:
            nb = max(128, min(nb, _round_up((n + 1) // 2, 128)))
    n_pad = _round_up(max(n, 1), nb)

    # Layout plumbing only: (N, 784) -> (784, N_pad) 2-D transpose (XLA's fast
    # tiled-transpose path).  All pooling-window tap selection happens inside
    # the kernel, so there is no extra re-layout pass over HBM.
    x2 = x[:, 0, :, :].reshape(n, 28 * 28).astype(jnp.float32)
    if n_pad != n:
        x2 = jnp.pad(x2, ((0, n_pad - n), (0, 0)))
    xt = x2.T                                        # (784, N_pad), batch on lanes

    w1f = params["w1"].reshape(-1).astype(jnp.float32)       # (8,)
    b1 = params["b1"].reshape(-1).astype(jnp.float32)        # (2,)
    w2f = params["w2"].reshape(-1).astype(jnp.float32)       # (16,)
    b2 = params["b2"].reshape(-1).astype(jnp.float32)        # (2,)
    fc1wf = params["fc1_w"].reshape(-1).astype(jnp.float32)  # (4,)
    fc1b = params["fc1_b"].reshape(-1).astype(jnp.float32)   # (2,)
    fc2wf = params["fc2_w"].reshape(-1).astype(jnp.float32)  # (20,)
    fc2b = params["fc2_b"].reshape(-1).astype(jnp.float32)   # (10,)

    smem = pl.BlockSpec(memory_space=pltpu.MemorySpace.SMEM)

    out = pl.pallas_call(
        functools.partial(tinynet_kernel, nonlin=nonlin),
        out_shape=jax.ShapeDtypeStruct((10, n_pad), jnp.float32),
        grid=(n_pad // nb,),
        in_specs=[
            pl.BlockSpec((784, nb), lambda i: (0, i)),   # x: (frame rows, batch)
            smem, smem, smem, smem,                      # w1, b1, w2, b2
            smem, smem, smem, smem,                      # fc1_w, fc1_b, fc2_w, fc2_b
        ],
        out_specs=pl.BlockSpec((10, nb), lambda i: (0, i)),
        compiler_params=pltpu.CompilerParams(
            dimension_semantics=("parallel",),
            vmem_limit_bytes=vmem_limit),
    )(xt, w1f, b1, w2f, b2, fc1wf, fc1b, fc2wf, fc2b)

    return out.T[:n]                                # (N, 10)


def tinynet_reference(x, params, nonlin=True):
    """Plain-JAX reference used only for correctness checking."""
    def maxpool(v, k):
        return lax.reduce_window(v, jnp.array(-jnp.inf, v.dtype), lax.max,
                                 (1, 1, k, k), (1, 1, k, k), "VALID")

    def conv(v, w, b):
        y = lax.conv_general_dilated(
            v, w, (1, 1), "VALID",
            dimension_numbers=("NCHW", "OIHW", "NCHW"))
        return y + b.reshape(1, -1, 1, 1)

    act = (lambda v: jnp.maximum(v, 0.0)) if nonlin else (lambda v: v)
    h = maxpool(x, 4)
    h = act(conv(h, params["w1"], params["b1"]))
    h = maxpool(h, 2)
    h = act(conv(h, params["w2"], params["b2"]))
    h = maxpool(h, 2)
    h = h.reshape(h.shape[0], -1)
    h = act(h @ params["fc1_w"].T + params["fc1_b"])
    return h @ params["fc2_w"].T + params["fc2_b"]


if __name__ == "__main__":
    key = jax.random.PRNGKey(0)
    keys = jax.random.split(key, 9)
    params = {
        "w1": jax.random.normal(keys[0], (2, 1, 2, 2), jnp.float32) * 0.5,
        "b1": jax.random.normal(keys[1], (2,), jnp.float32) * 0.1,
        "w2": jax.random.normal(keys[2], (2, 2, 2, 2), jnp.float32) * 0.5,
        "b2": jax.random.normal(keys[3], (2,), jnp.float32) * 0.1,
        "fc1_w": jax.random.normal(keys[4], (2, 2), jnp.float32) * 0.5,
        "fc1_b": jax.random.normal(keys[5], (2,), jnp.float32) * 0.1,
        "fc2_w": jax.random.normal(keys[6], (10, 2), jnp.float32) * 0.5,
        "fc2_b": jax.random.normal(keys[7], (10,), jnp.float32) * 0.1,
    }
    # batch=2, channels=1, spatial=28 (smallest size consistent with the
    # forward's view(-1, 2*1*1) after the pool/conv chain).
    x = jax.random.normal(keys[8], (2, 1, 28, 28), jnp.float32)

    out = tinynet_forward(x, params, nonlin=True)
    out = jax.block_until_ready(out)

    ref = tinynet_reference(x, params, nonlin=True)
    assert out.shape == (2, 10), out.shape
    assert jnp.allclose(out, ref, atol=1e-4, rtol=1e-4), (out, ref)
    print("KERNEL_OK")
</pallas_src>

<mosaic_0001>
module attributes {stable_mosaic.version = 11 : i64} {
  func.func @tinynet_kernel(%arg0: i32, %arg1: memref<784x128xf32, #tpu.memory_space<vmem>>, %arg2: memref<8xf32, #tpu.memory_space<smem>>, %arg3: memref<2xf32, #tpu.memory_space<smem>>, %arg4: memref<16xf32, #tpu.memory_space<smem>>, %arg5: memref<2xf32, #tpu.memory_space<smem>>, %arg6: memref<4xf32, #tpu.memory_space<smem>>, %arg7: memref<2xf32, #tpu.memory_space<smem>>, %arg8: memref<20xf32, #tpu.memory_space<smem>>, %arg9: memref<10xf32, #tpu.memory_space<smem>>, %arg10: memref<10x128xf32, #tpu.memory_space<vmem>>) attributes {dimension_semantics = [#tpu.dimension_semantics<parallel>], iteration_bounds = array<i64: 1>, scalar_prefetch = 0 : i64, scratch_operands = 0 : i64, tpu.core_type = #tpu.core_type<tc>, window_params = [{transform_indices = @transform_0, window_bounds = array<i64: 784, 128>}, {transform_indices = @transform_1, window_bounds = array<i64: 8>}, {transform_indices = @transform_2, window_bounds = array<i64: 2>}, {transform_indices = @transform_3, window_bounds = array<i64: 16>}, {transform_indices = @transform_4, window_bounds = array<i64: 2>}, {transform_indices = @transform_5, window_bounds = array<i64: 4>}, {transform_indices = @transform_6, window_bounds = array<i64: 2>}, {transform_indices = @transform_7, window_bounds = array<i64: 20>}, {transform_indices = @transform_8, window_bounds = array<i64: 10>}, {transform_indices = @transform_9, window_bounds = array<i64: 10, 128>}]} {
    %c0 = arith.constant 0 : index
    %0 = memref.load %arg2[%c0] : memref<8xf32, #tpu.memory_space<smem>>
    %c1 = arith.constant 1 : index
    %1 = memref.load %arg2[%c1] : memref<8xf32, #tpu.memory_space<smem>>
    %c2 = arith.constant 2 : index
    %2 = memref.load %arg2[%c2] : memref<8xf32, #tpu.memory_space<smem>>
    %c3 = arith.constant 3 : index
    %3 = memref.load %arg2[%c3] : memref<8xf32, #tpu.memory_space<smem>>
    %c4 = arith.constant 4 : index
    %4 = memref.load %arg2[%c4] : memref<8xf32, #tpu.memory_space<smem>>
    %c5 = arith.constant 5 : index
    %5 = memref.load %arg2[%c5] : memref<8xf32, #tpu.memory_space<smem>>
    %c6 = arith.constant 6 : index
    %6 = memref.load %arg2[%c6] : memref<8xf32, #tpu.memory_space<smem>>
    %c7 = arith.constant 7 : index
    %7 = memref.load %arg2[%c7] : memref<8xf32, #tpu.memory_space<smem>>
    %c0_0 = arith.constant 0 : index
    %8 = memref.load %arg3[%c0_0] : memref<2xf32, #tpu.memory_space<smem>>
    %c1_1 = arith.constant 1 : index
    %9 = memref.load %arg3[%c1_1] : memref<2xf32, #tpu.memory_space<smem>>
    %c0_2 = arith.constant 0 : index
    %10 = memref.load %arg4[%c0_2] : memref<16xf32, #tpu.memory_space<smem>>
    %c1_3 = arith.constant 1 : index
    %11 = memref.load %arg4[%c1_3] : memref<16xf32, #tpu.memory_space<smem>>
    %c2_4 = arith.constant 2 : index
    %12 = memref.load %arg4[%c2_4] : memref<16xf32, #tpu.memory_space<smem>>
    %c3_5 = arith.constant 3 : index
    %13 = memref.load %arg4[%c3_5] : memref<16xf32, #tpu.memory_space<smem>>
    %c4_6 = arith.constant 4 : index
    %14 = memref.load %arg4[%c4_6] : memref<16xf32, #tpu.memory_space<smem>>
    %c5_7 = arith.constant 5 : index
    %15 = memref.load %arg4[%c5_7] : memref<16xf32, #tpu.memory_space<smem>>
    %c6_8 = arith.constant 6 : index
    %16 = memref.load %arg4[%c6_8] : memref<16xf32, #tpu.memory_space<smem>>
    %c7_9 = arith.constant 7 : index
    %17 = memref.load %arg4[%c7_9] : memref<16xf32, #tpu.memory_space<smem>>
    %c8 = arith.constant 8 : index
    %18 = memref.load %arg4[%c8] : memref<16xf32, #tpu.memory_space<smem>>
    %c9 = arith.constant 9 : index
    %19 = memref.load %arg4[%c9] : memref<16xf32, #tpu.memory_space<smem>>
    %c10 = arith.constant 10 : index
    %20 = memref.load %arg4[%c10] : memref<16xf32, #tpu.memory_space<smem>>
    %c11 = arith.constant 11 : index
    %21 = memref.load %arg4[%c11] : memref<16xf32, #tpu.memory_space<smem>>
    %c12 = arith.constant 12 : index
    %22 = memref.load %arg4[%c12] : memref<16xf32, #tpu.memory_space<smem>>
    %c13 = arith.constant 13 : index
    %23 = memref.load %arg4[%c13] : memref<16xf32, #tpu.memory_space<smem>>
    %c14 = arith.constant 14 : index
    %24 = memref.load %arg4[%c14] : memref<16xf32, #tpu.memory_space<smem>>
    %c15 = arith.constant 15 : index
    %25 = memref.load %arg4[%c15] : memref<16xf32, #tpu.memory_space<smem>>
    %c0_10 = arith.constant 0 : index
    %26 = memref.load %arg5[%c0_10] : memref<2xf32, #tpu.memory_space<smem>>
    %c1_11 = arith.constant 1 : index
    %27 = memref.load %arg5[%c1_11] : memref<2xf32, #tpu.memory_space<smem>>
    %c0_12 = arith.constant 0 : index
    %28 = memref.load %arg6[%c0_12] : memref<4xf32, #tpu.memory_space<smem>>
    %c1_13 = arith.constant 1 : index
    %29 = memref.load %arg6[%c1_13] : memref<4xf32, #tpu.memory_space<smem>>
    %c2_14 = arith.constant 2 : index
    %30 = memref.load %arg6[%c2_14] : memref<4xf32, #tpu.memory_space<smem>>
    %c3_15 = arith.constant 3 : index
    %31 = memref.load %arg6[%c3_15] : memref<4xf32, #tpu.memory_space<smem>>
    %c0_16 = arith.constant 0 : index
    %32 = memref.load %arg7[%c0_16] : memref<2xf32, #tpu.memory_space<smem>>
    %c1_17 = arith.constant 1 : index
    %33 = memref.load %arg7[%c1_17] : memref<2xf32, #tpu.memory_space<smem>>
    %c0_18 = arith.constant 0 : index
    %34 = memref.load %arg8[%c0_18] : memref<20xf32, #tpu.memory_space<smem>>
    %c1_19 = arith.constant 1 : index
    %35 = memref.load %arg8[%c1_19] : memref<20xf32, #tpu.memory_space<smem>>
    %c2_20 = arith.constant 2 : index
    %36 = memref.load %arg8[%c2_20] : memref<20xf32, #tpu.memory_space<smem>>
    %c3_21 = arith.constant 3 : index
    %37 = memref.load %arg8[%c3_21] : memref<20xf32, #tpu.memory_space<smem>>
    %c4_22 = arith.constant 4 : index
    %38 = memref.load %arg8[%c4_22] : memref<20xf32, #tpu.memory_space<smem>>
    %c5_23 = arith.constant 5 : index
    %39 = memref.load %arg8[%c5_23] : memref<20xf32, #tpu.memory_space<smem>>
    %c6_24 = arith.constant 6 : index
    %40 = memref.load %arg8[%c6_24] : memref<20xf32, #tpu.memory_space<smem>>
    %c7_25 = arith.constant 7 : index
    %41 = memref.load %arg8[%c7_25] : memref<20xf32, #tpu.memory_space<smem>>
    %c8_26 = arith.constant 8 : index
    %42 = memref.load %arg8[%c8_26] : memref<20xf32, #tpu.memory_space<smem>>
    %c9_27 = arith.constant 9 : index
    %43 = memref.load %arg8[%c9_27] : memref<20xf32, #tpu.memory_space<smem>>
    %c10_28 = arith.constant 10 : index
    %44 = memref.load %arg8[%c10_28] : memref<20xf32, #tpu.memory_space<smem>>
    %c11_29 = arith.constant 11 : index
    %45 = memref.load %arg8[%c11_29] : memref<20xf32, #tpu.memory_space<smem>>
    %c12_30 = arith.constant 12 : index
    %46 = memref.load %arg8[%c12_30] : memref<20xf32, #tpu.memory_space<smem>>
    %c13_31 = arith.constant 13 : index
    %47 = memref.load %arg8[%c13_31] : memref<20xf32, #tpu.memory_space<smem>>
    %c14_32 = arith.constant 14 : index
    %48 = memref.load %arg8[%c14_32] : memref<20xf32, #tpu.memory_space<smem>>
    %c15_33 = arith.constant 15 : index
    %49 = memref.load %arg8[%c15_33] : memref<20xf32, #tpu.memory_space<smem>>
    %c16 = arith.constant 16 : index
    %50 = memref.load %arg8[%c16] : memref<20xf32, #tpu.memory_space<smem>>
    %c17 = arith.constant 17 : index
    %51 = memref.load %arg8[%c17] : memref<20xf32, #tpu.memory_space<smem>>
    %c18 = arith.constant 18 : index
    %52 = memref.load %arg8[%c18] : memref<20xf32, #tpu.memory_space<smem>>
    %c19 = arith.constant 19 : index
    %53 = memref.load %arg8[%c19] : memref<20xf32, #tpu.memory_space<smem>>
    %c0_34 = arith.constant 0 : index
    %54 = memref.load %arg9[%c0_34] : memref<10xf32, #tpu.memory_space<smem>>
    %c1_35 = arith.constant 1 : index
    %55 = memref.load %arg9[%c1_35] : memref<10xf32, #tpu.memory_space<smem>>
    %c2_36 = arith.constant 2 : index
    %56 = memref.load %arg9[%c2_36] : memref<10xf32, #tpu.memory_space<smem>>
    %c3_37 = arith.constant 3 : index
    %57 = memref.load %arg9[%c3_37] : memref<10xf32, #tpu.memory_space<smem>>
    %c4_38 = arith.constant 4 : index
    %58 = memref.load %arg9[%c4_38] : memref<10xf32, #tpu.memory_space<smem>>
    %c5_39 = arith.constant 5 : index
    %59 = memref.load %arg9[%c5_39] : memref<10xf32, #tpu.memory_space<smem>>
    %c6_40 = arith.constant 6 : index
    %60 = memref.load %arg9[%c6_40] : memref<10xf32, #tpu.memory_space<smem>>
    %c7_41 = arith.constant 7 : index
    %61 = memref.load %arg9[%c7_41] : memref<10xf32, #tpu.memory_space<smem>>
    %c8_42 = arith.constant 8 : index
    %62 = memref.load %arg9[%c8_42] : memref<10xf32, #tpu.memory_space<smem>>
    %c9_43 = arith.constant 9 : index
    %63 = memref.load %arg9[%c9_43] : memref<10xf32, #tpu.memory_space<smem>>
    %c0_44 = arith.constant 0 : index
    %c0_45 = arith.constant 0 : index
    %64 = vector.load %arg1[%c0_44, %c0_45] : memref<784x128xf32, #tpu.memory_space<vmem>>, vector<781x128xf32>
    %c1_46 = arith.constant 1 : index
    %c0_47 = arith.constant 0 : index
    %65 = vector.load %arg1[%c1_46, %c0_47] : memref<784x128xf32, #tpu.memory_space<vmem>>, vector<781x128xf32>
    %66 = arith.maximumf %64, %65 : vector<781x128xf32>
    %c2_48 = arith.constant 2 : index
    %c0_49 = arith.constant 0 : index
    %67 = vector.load %arg1[%c2_48, %c0_49] : memref<784x128xf32, #tpu.memory_space<vmem>>, vector<781x128xf32>
    %c3_50 = arith.constant 3 : index
    %c0_51 = arith.constant 0 : index
    %68 = vector.load %arg1[%c3_50, %c0_51] : memref<784x128xf32, #tpu.memory_space<vmem>>, vector<781x128xf32>
    %69 = arith.maximumf %67, %68 : vector<781x128xf32>
    %70 = arith.maximumf %66, %69 : vector<781x128xf32>
    %71 = vector.extract_strided_slice %70 {offsets = [0, 0], sizes = [697, 128], strides = [1, 1]} : vector<781x128xf32> to vector<697x128xf32>
    %72 = vector.extract_strided_slice %70 {offsets = [28, 0], sizes = [697, 128], strides = [1, 1]} : vector<781x128xf32> to vector<697x128xf32>
    %73 = arith.maximumf %71, %72 : vector<697x128xf32>
    %74 = vector.extract_strided_slice %70 {offsets = [56, 0], sizes = [697, 128], strides = [1, 1]} : vector<781x128xf32> to vector<697x128xf32>
    %75 = vector.extract_strided_slice %70 {offsets = [84, 0], sizes = [697, 128], strides = [1, 1]} : vector<781x128xf32> to vector<697x128xf32>
    %76 = arith.maximumf %74, %75 : vector<697x128xf32>
    %77 = arith.maximumf %73, %76 : vector<697x128xf32>
    %78 = vector.extract_strided_slice %77 {offsets = [0, 0], sizes = [581, 128], strides = [1, 1]} : vector<697x128xf32> to vector<581x128xf32>
    %79 = vector.broadcast %0 : f32 to vector<581x128xf32>
    %80 = arith.mulf %79, %78 : vector<581x128xf32>
    %81 = vector.extract_strided_slice %77 {offsets = [4, 0], sizes = [581, 128], strides = [1, 1]} : vector<697x128xf32> to vector<581x128xf32>
    %82 = vector.broadcast %1 : f32 to vector<581x128xf32>
    %83 = arith.mulf %82, %81 : vector<581x128xf32>
    %84 = arith.addf %80, %83 : vector<581x128xf32>
    %85 = vector.extract_strided_slice %77 {offsets = [112, 0], sizes = [581, 128], strides = [1, 1]} : vector<697x128xf32> to vector<581x128xf32>
    %86 = vector.broadcast %2 : f32 to vector<581x128xf32>
    %87 = arith.mulf %86, %85 : vector<581x128xf32>
    %88 = vector.extract_strided_slice %77 {offsets = [116, 0], sizes = [581, 128], strides = [1, 1]} : vector<697x128xf32> to vector<581x128xf32>
    %89 = vector.broadcast %3 : f32 to vector<581x128xf32>
    %90 = arith.mulf %89, %88 : vector<581x128xf32>
    %91 = arith.addf %87, %90 : vector<581x128xf32>
    %92 = arith.addf %84, %91 : vector<581x128xf32>
    %93 = vector.broadcast %8 : f32 to vector<581x128xf32>
    %94 = arith.addf %92, %93 : vector<581x128xf32>
    %cst = arith.constant 0.000000e+00 : f32
    %95 = vector.broadcast %cst : f32 to vector<581x128xf32>
    %96 = arith.maximumf %94, %95 : vector<581x128xf32>
    %97 = vector.extract_strided_slice %77 {offsets = [0, 0], sizes = [581, 128], strides = [1, 1]} : vector<697x128xf32> to vector<581x128xf32>
    %98 = vector.broadcast %4 : f32 to vector<581x128xf32>
    %99 = arith.mulf %98, %97 : vector<581x128xf32>
    %100 = vector.extract_strided_slice %77 {offsets = [4, 0], sizes = [581, 128], strides = [1, 1]} : vector<697x128xf32> to vector<581x128xf32>
    %101 = vector.broadcast %5 : f32 to vector<581x128xf32>
    %102 = arith.mulf %101, %100 : vector<581x128xf32>
    %103 = arith.addf %99, %102 : vector<581x128xf32>
    %104 = vector.extract_strided_slice %77 {offsets = [112, 0], sizes = [581, 128], strides = [1, 1]} : vector<697x128xf32> to vector<581x128xf32>
    %105 = vector.broadcast %6 : f32 to vector<581x128xf32>
    %106 = arith.mulf %105, %104 : vector<581x128xf32>
    %107 = vector.extract_strided_slice %77 {offsets = [116, 0], sizes = [581, 128], strides = [1, 1]} : vector<697x128xf32> to vector<581x128xf32>
    %108 = vector.broadcast %7 : f32 to vector<581x128xf32>
    %109 = arith.mulf %108, %107 : vector<581x128xf32>
    %110 = arith.addf %106, %109 : vector<581x128xf32>
    %111 = arith.addf %103, %110 : vector<581x128xf32>
    %112 = vector.broadcast %9 : f32 to vector<581x128xf32>
    %113 = arith.addf %111, %112 : vector<581x128xf32>
    %cst_52 = arith.constant 0.000000e+00 : f32
    %114 = vector.broadcast %cst_52 : f32 to vector<581x128xf32>
    %115 = arith.maximumf %113, %114 : vector<581x128xf32>
    %116 = vector.extract_strided_slice %96 {offsets = [0, 0], sizes = [577, 128], strides = [1, 1]} : vector<581x128xf32> to vector<577x128xf32>
    %117 = vector.extract_strided_slice %96 {offsets = [4, 0], sizes = [577, 128], strides = [1, 1]} : vector<581x128xf32> to vector<577x128xf32>
    %118 = arith.maximumf %116, %117 : vector<577x128xf32>
    %119 = vector.extract_strided_slice %118 {offsets = [0, 0], sizes = [465, 128], strides = [1, 1]} : vector<577x128xf32> to vector<465x128xf32>
    %120 = vector.extract_strided_slice %118 {offsets = [112, 0], sizes = [465, 128], strides = [1, 1]} : vector<577x128xf32> to vector<465x128xf32>
    %121 = arith.maximumf %119, %120 : vector<465x128xf32>
    %122 = vector.extract_strided_slice %115 {offsets = [0, 0], sizes = [577, 128], strides = [1, 1]} : vector<581x128xf32> to vector<577x128xf32>
    %123 = vector.extract_strided_slice %115 {offsets = [4, 0], sizes = [577, 128], strides = [1, 1]} : vector<581x128xf32> to vector<577x128xf32>
    %124 = arith.maximumf %122, %123 : vector<577x128xf32>
    %125 = vector.extract_strided_slice %124 {offsets = [0, 0], sizes = [465, 128], strides = [1, 1]} : vector<577x128xf32> to vector<465x128xf32>
    %126 = vector.extract_strided_slice %124 {offsets = [112, 0], sizes = [465, 128], strides = [1, 1]} : vector<577x128xf32> to vector<465x128xf32>
    %127 = arith.maximumf %125, %126 : vector<465x128xf32>
    %128 = vector.extract_strided_slice %121 {offsets = [0, 0], sizes = [233, 128], strides = [1, 1]} : vector<465x128xf32> to vector<233x128xf32>
    %129 = vector.broadcast %10 : f32 to vector<233x128xf32>
    %130 = arith.mulf %129, %128 : vector<233x128xf32>
    %131 = vector.extract_strided_slice %121 {offsets = [8, 0], sizes = [233, 128], strides = [1, 1]} : vector<465x128xf32> to vector<233x128xf32>
    %132 = vector.broadcast %11 : f32 to vector<233x128xf32>
    %133 = arith.mulf %132, %131 : vector<233x128xf32>
    %134 = arith.addf %130, %133 : vector<233x128xf32>
    %135 = vector.extract_strided_slice %121 {offsets = [224, 0], sizes = [233, 128], strides = [1, 1]} : vector<465x128xf32> to vector<233x128xf32>
    %136 = vector.broadcast %12 : f32 to vector<233x128xf32>
    %137 = arith.mulf %136, %135 : vector<233x128xf32>
    %138 = vector.extract_strided_slice %121 {offsets = [232, 0], sizes = [233, 128], strides = [1, 1]} : vector<465x128xf32> to vector<233x128xf32>
    %139 = vector.broadcast %13 : f32 to vector<233x128xf32>
    %140 = arith.mulf %139, %138 : vector<233x128xf32>
    %141 = arith.addf %137, %140 : vector<233x128xf32>
    %142 = vector.extract_strided_slice %127 {offsets = [0, 0], sizes = [233, 128], strides = [1, 1]} : vector<465x128xf32> to vector<233x128xf32>
    %143 = vector.broadcast %14 : f32 to vector<233x128xf32>
    %144 = arith.mulf %143, %142 : vector<233x128xf32>
    %145 = vector.extract_strided_slice %127 {offsets = [8, 0], sizes = [233, 128], strides = [1, 1]} : vector<465x128xf32> to vector<233x128xf32>
    %146 = vector.broadcast %15 : f32 to vector<233x128xf32>
    %147 = arith.mulf %146, %145 : vector<233x128xf32>
    %148 = arith.addf %144, %147 : vector<233x128xf32>
    %149 = vector.extract_strided_slice %127 {offsets = [224, 0], sizes = [233, 128], strides = [1, 1]} : vector<465x128xf32> to vector<233x128xf32>
    %150 = vector.broadcast %16 : f32 to vector<233x128xf32>
    %151 = arith.mulf %150, %149 : vector<233x128xf32>
    %152 = vector.extract_strided_slice %127 {offsets = [232, 0], sizes = [233, 128], strides = [1, 1]} : vector<465x128xf32> to vector<233x128xf32>
    %153 = vector.broadcast %17 : f32 to vector<233x128xf32>
    %154 = arith.mulf %153, %152 : vector<233x128xf32>
    %155 = arith.addf %151, %154 : vector<233x128xf32>
    %156 = arith.addf %134, %141 : vector<233x128xf32>
    %157 = arith.addf %148, %155 : vector<233x128xf32>
    %158 = arith.addf %156, %157 : vector<233x128xf32>
    %159 = vector.broadcast %26 : f32 to vector<233x128xf32>
    %160 = arith.addf %158, %159 : vector<233x128xf32>
    %cst_53 = arith.constant 0.000000e+00 : f32
    %161 = vector.broadcast %cst_53 : f32 to vector<233x128xf32>
    %162 = arith.maximumf %160, %161 : vector<233x128xf32>
    %163 = vector.extract_strided_slice %121 {offsets = [0, 0], sizes = [233, 128], strides = [1, 1]} : vector<465x128xf32> to vector<233x128xf32>
    %164 = vector.broadcast %18 : f32 to vector<233x128xf32>
    %165 = arith.mulf %164, %163 : vector<233x128xf32>
    %166 = vector.extract_strided_slice %121 {offsets = [8, 0], sizes = [233, 128], strides = [1, 1]} : vector<465x128xf32> to vector<233x128xf32>
    %167 = vector.broadcast %19 : f32 to vector<233x128xf32>
    %168 = arith.mulf %167, %166 : vector<233x128xf32>
    %169 = arith.addf %165, %168 : vector<233x128xf32>
    %170 = vector.extract_strided_slice %121 {offsets = [224, 0], sizes = [233, 128], strides = [1, 1]} : vector<465x128xf32> to vector<233x128xf32>
    %171 = vector.broadcast %20 : f32 to vector<233x128xf32>
    %172 = arith.mulf %171, %170 : vector<233x128xf32>
    %173 = vector.extract_strided_slice %121 {offsets = [232, 0], sizes = [233, 128], strides = [1, 1]} : vector<465x128xf32> to vector<233x128xf32>
    %174 = vector.broadcast %21 : f32 to vector<233x128xf32>
    %175 = arith.mulf %174, %173 : vector<233x128xf32>
    %176 = arith.addf %172, %175 : vector<233x128xf32>
    %177 = vector.extract_strided_slice %127 {offsets = [0, 0], sizes = [233, 128], strides = [1, 1]} : vector<465x128xf32> to vector<233x128xf32>
    %178 = vector.broadcast %22 : f32 to vector<233x128xf32>
    %179 = arith.mulf %178, %177 : vector<233x128xf32>
    %180 = vector.extract_strided_slice %127 {offsets = [8, 0], sizes = [233, 128], strides = [1, 1]} : vector<465x128xf32> to vector<233x128xf32>
    %181 = vector.broadcast %23 : f32 to vector<233x128xf32>
    %182 = arith.mulf %181, %180 : vector<233x128xf32>
    %183 = arith.addf %179, %182 : vector<233x128xf32>
    %184 = vector.extract_strided_slice %127 {offsets = [224, 0], sizes = [233, 128], strides = [1, 1]} : vector<465x128xf32> to vector<233x128xf32>
    %185 = vector.broadcast %24 : f32 to vector<233x128xf32>
    %186 = arith.mulf %185, %184 : vector<233x128xf32>
    %187 = vector.extract_strided_slice %127 {offsets = [232, 0], sizes = [233, 128], strides = [1, 1]} : vector<465x128xf32> to vector<233x128xf32>
    %188 = vector.broadcast %25 : f32 to vector<233x128xf32>
    %189 = arith.mulf %188, %187 : vector<233x128xf32>
    %190 = arith.addf %186, %189 : vector<233x128xf32>
    %191 = arith.addf %169, %176 : vector<233x128xf32>
    %192 = arith.addf %183, %190 : vector<233x128xf32>
    %193 = arith.addf %191, %192 : vector<233x128xf32>
    %194 = vector.broadcast %27 : f32 to vector<233x128xf32>
    %195 = arith.addf %193, %194 : vector<233x128xf32>
    %cst_54 = arith.constant 0.000000e+00 : f32
    %196 = vector.broadcast %cst_54 : f32 to vector<233x128xf32>
    %197 = arith.maximumf %195, %196 : vector<233x128xf32>
    %198 = vector.extract_strided_slice %162 {offsets = [0, 0], sizes = [1, 128], strides = [1, 1]} : vector<233x128xf32> to vector<1x128xf32>
    %199 = vector.extract_strided_slice %162 {offsets = [8, 0], sizes = [1, 128], strides = [1, 1]} : vector<233x128xf32> to vector<1x128xf32>
    %200 = arith.maximumf %198, %199 : vector<1x128xf32>
    %201 = vector.extract_strided_slice %162 {offsets = [224, 0], sizes = [1, 128], strides = [1, 1]} : vector<233x128xf32> to vector<1x128xf32>
    %202 = vector.extract_strided_slice %162 {offsets = [232, 0], sizes = [1, 128], strides = [1, 1]} : vector<233x128xf32> to vector<1x128xf32>
    %203 = arith.maximumf %201, %202 : vector<1x128xf32>
    %204 = arith.maximumf %200, %203 : vector<1x128xf32>
    %205 = vector.extract_strided_slice %197 {offsets = [0, 0], sizes = [1, 128], strides = [1, 1]} : vector<233x128xf32> to vector<1x128xf32>
    %206 = vector.extract_strided_slice %197 {offsets = [8, 0], sizes = [1, 128], strides = [1, 1]} : vector<233x128xf32> to vector<1x128xf32>
    %207 = arith.maximumf %205, %206 : vector<1x128xf32>
    %208 = vector.extract_strided_slice %197 {offsets = [224, 0], sizes = [1, 128], strides = [1, 1]} : vector<233x128xf32> to vector<1x128xf32>
    %209 = vector.extract_strided_slice %197 {offsets = [232, 0], sizes = [1, 128], strides = [1, 1]} : vector<233x128xf32> to vector<1x128xf32>
    %210 = arith.maximumf %208, %209 : vector<1x128xf32>
    %211 = arith.maximumf %207, %210 : vector<1x128xf32>
    %212 = vector.broadcast %28 : f32 to vector<1x128xf32>
    %213 = arith.mulf %212, %204 : vector<1x128xf32>
    %214 = vector.broadcast %29 : f32 to vector<1x128xf32>
    %215 = arith.mulf %214, %211 : vector<1x128xf32>
    %216 = arith.addf %213, %215 : vector<1x128xf32>
    %217 = vector.broadcast %32 : f32 to vector<1x128xf32>
    %218 = arith.addf %216, %217 : vector<1x128xf32>
    %cst_55 = arith.constant 0.000000e+00 : f32
    %219 = vector.broadcast %cst_55 : f32 to vector<1x128xf32>
    %220 = arith.maximumf %218, %219 : vector<1x128xf32>
    %221 = vector.broadcast %30 : f32 to vector<1x128xf32>
    %222 = arith.mulf %221, %204 : vector<1x128xf32>
    %223 = vector.broadcast %31 : f32 to vector<1x128xf32>
    %224 = arith.mulf %223, %211 : vector<1x128xf32>
    %225 = arith.addf %222, %224 : vector<1x128xf32>
    %226 = vector.broadcast %33 : f32 to vector<1x128xf32>
    %227 = arith.addf %225, %226 : vector<1x128xf32>
    %cst_56 = arith.constant 0.000000e+00 : f32
    %228 = vector.broadcast %cst_56 : f32 to vector<1x128xf32>
    %229 = arith.maximumf %227, %228 : vector<1x128xf32>
    %230 = vector.broadcast %34 : f32 to vector<1x128xf32>
    %231 = arith.mulf %230, %220 : vector<1x128xf32>
    %232 = vector.broadcast %35 : f32 to vector<1x128xf32>
    %233 = arith.mulf %232, %229 : vector<1x128xf32>
    %234 = arith.addf %231, %233 : vector<1x128xf32>
    %235 = vector.broadcast %54 : f32 to vector<1x128xf32>
    %236 = arith.addf %234, %235 : vector<1x128xf32>
    %c0_57 = arith.constant 0 : index
    %c0_58 = arith.constant 0 : index
    %237 = vector.load %arg10[%c0_57, %c0_58] : memref<10x128xf32, #tpu.memory_space<vmem>>, vector<1x128xf32>
    tpu.vector_store %arg10[%c0_57, %c0_58], %236 {strides = array<i32>} : memref<10x128xf32, #tpu.memory_space<vmem>>, vector<1x128xf32>,
    %238 = vector.broadcast %36 : f32 to vector<1x128xf32>
    %239 = arith.mulf %238, %220 : vector<1x128xf32>
    %240 = vector.broadcast %37 : f32 to vector<1x128xf32>
    %241 = arith.mulf %240, %229 : vector<1x128xf32>
    %242 = arith.addf %239, %241 : vector<1x128xf32>
    %243 = vector.broadcast %55 : f32 to vector<1x128xf32>
    %244 = arith.addf %242, %243 : vector<1x128xf32>
    %c1_59 = arith.constant 1 : index
    %c0_60 = arith.constant 0 : index
    %245 = vector.load %arg10[%c1_59, %c0_60] : memref<10x128xf32, #tpu.memory_space<vmem>>, vector<1x128xf32>
    tpu.vector_store %arg10[%c1_59, %c0_60], %244 {strides = array<i32>} : memref<10x128xf32, #tpu.memory_space<vmem>>, vector<1x128xf32>,
    %246 = vector.broadcast %38 : f32 to vector<1x128xf32>
    %247 = arith.mulf %246, %220 : vector<1x128xf32>
    %248 = vector.broadcast %39 : f32 to vector<1x128xf32>
    %249 = arith.mulf %248, %229 : vector<1x128xf32>
    %250 = arith.addf %247, %249 : vector<1x128xf32>
    %251 = vector.broadcast %56 : f32 to vector<1x128xf32>
    %252 = arith.addf %250, %251 : vector<1x128xf32>
    %c2_61 = arith.constant 2 : index
    %c0_62 = arith.constant 0 : index
    %253 = vector.load %arg10[%c2_61, %c0_62] : memref<10x128xf32, #tpu.memory_space<vmem>>, vector<1x128xf32>
    tpu.vector_store %arg10[%c2_61, %c0_62], %252 {strides = array<i32>} : memref<10x128xf32, #tpu.memory_space<vmem>>, vector<1x128xf32>,
    %254 = vector.broadcast %40 : f32 to vector<1x128xf32>
    %255 = arith.mulf %254, %220 : vector<1x128xf32>
    %256 = vector.broadcast %41 : f32 to vector<1x128xf32>
    %257 = arith.mulf %256, %229 : vector<1x128xf32>
    %258 = arith.addf %255, %257 : vector<1x128xf32>
    %259 = vector.broadcast %57 : f32 to vector<1x128xf32>
    %260 = arith.addf %258, %259 : vector<1x128xf32>
    %c3_63 = arith.constant 3 : index
    %c0_64 = arith.constant 0 : index
    %261 = vector.load %arg10[%c3_63, %c0_64] : memref<10x128xf32, #tpu.memory_space<vmem>>, vector<1x128xf32>
    tpu.vector_store %arg10[%c3_63, %c0_64], %260 {strides = array<i32>} : memref<10x128xf32, #tpu.memory_space<vmem>>, vector<1x128xf32>,
    %262 = vector.broadcast %42 : f32 to vector<1x128xf32>
    %263 = arith.mulf %262, %220 : vector<1x128xf32>
    %264 = vector.broadcast %43 : f32 to vector<1x128xf32>
    %265 = arith.mulf %264, %229 : vector<1x128xf32>
    %266 = arith.addf %263, %265 : vector<1x128xf32>
    %267 = vector.broadcast %58 : f32 to vector<1x128xf32>
    %268 = arith.addf %266, %267 : vector<1x128xf32>
    %c4_65 = arith.constant 4 : index
    %c0_66 = arith.constant 0 : index
    %269 = vector.load %arg10[%c4_65, %c0_66] : memref<10x128xf32, #tpu.memory_space<vmem>>, vector<1x128xf32>
    tpu.vector_store %arg10[%c4_65, %c0_66], %268 {strides = array<i32>} : memref<10x128xf32, #tpu.memory_space<vmem>>, vector<1x128xf32>,
    %270 = vector.broadcast %44 : f32 to vector<1x128xf32>
    %271 = arith.mulf %270, %220 : vector<1x128xf32>
    %272 = vector.broadcast %45 : f32 to vector<1x128xf32>
    %273 = arith.mulf %272, %229 : vector<1x128xf32>
    %274 = arith.addf %271, %273 : vector<1x128xf32>
    %275 = vector.broadcast %59 : f32 to vector<1x128xf32>
    %276 = arith.addf %274, %275 : vector<1x128xf32>
    %c5_67 = arith.constant 5 : index
    %c0_68 = arith.constant 0 : index
    %277 = vector.load %arg10[%c5_67, %c0_68] : memref<10x128xf32, #tpu.memory_space<vmem>>, vector<1x128xf32>
    tpu.vector_store %arg10[%c5_67, %c0_68], %276 {strides = array<i32>} : memref<10x128xf32, #tpu.memory_space<vmem>>, vector<1x128xf32>,
    %278 = vector.broadcast %46 : f32 to vector<1x128xf32>
    %279 = arith.mulf %278, %220 : vector<1x128xf32>
    %280 = vector.broadcast %47 : f32 to vector<1x128xf32>
    %281 = arith.mulf %280, %229 : vector<1x128xf32>
    %282 = arith.addf %279, %281 : vector<1x128xf32>
    %283 = vector.broadcast %60 : f32 to vector<1x128xf32>
    %284 = arith.addf %282, %283 : vector<1x128xf32>
    %c6_69 = arith.constant 6 : index
    %c0_70 = arith.constant 0 : index
    %285 = vector.load %arg10[%c6_69, %c0_70] : memref<10x128xf32, #tpu.memory_space<vmem>>, vector<1x128xf32>
    tpu.vector_store %arg10[%c6_69, %c0_70], %284 {strides = array<i32>} : memref<10x128xf32, #tpu.memory_space<vmem>>, vector<1x128xf32>,
    %286 = vector.broadcast %48 : f32 to vector<1x128xf32>
    %287 = arith.mulf %286, %220 : vector<1x128xf32>
    %288 = vector.broadcast %49 : f32 to vector<1x128xf32>
    %289 = arith.mulf %288, %229 : vector<1x128xf32>
    %290 = arith.addf %287, %289 : vector<1x128xf32>
    %291 = vector.broadcast %61 : f32 to vector<1x128xf32>
    %292 = arith.addf %290, %291 : vector<1x128xf32>
    %c7_71 = arith.constant 7 : index
    %c0_72 = arith.constant 0 : index
    %293 = vector.load %arg10[%c7_71, %c0_72] : memref<10x128xf32, #tpu.memory_space<vmem>>, vector<1x128xf32>
    tpu.vector_store %arg10[%c7_71, %c0_72], %292 {strides = array<i32>} : memref<10x128xf32, #tpu.memory_space<vmem>>, vector<1x128xf32>,
    %294 = vector.broadcast %50 : f32 to vector<1x128xf32>
    %295 = arith.mulf %294, %220 : vector<1x128xf32>
    %296 = vector.broadcast %51 : f32 to vector<1x128xf32>
    %297 = arith.mulf %296, %229 : vector<1x128xf32>
    %298 = arith.addf %295, %297 : vector<1x128xf32>
    %299 = vector.broadcast %62 : f32 to vector<1x128xf32>
    %300 = arith.addf %298, %299 : vector<1x128xf32>
    %c8_73 = arith.constant 8 : index
    %c0_74 = arith.constant 0 : index
    %301 = vector.load %arg10[%c8_73, %c0_74] : memref<10x128xf32, #tpu.memory_space<vmem>>, vector<1x128xf32>
    tpu.vector_store %arg10[%c8_73, %c0_74], %300 {strides = array<i32>} : memref<10x128xf32, #tpu.memory_space<vmem>>, vector<1x128xf32>,
    %302 = vector.broadcast %52 : f32 to vector<1x128xf32>
    %303 = arith.mulf %302, %220 : vector<1x128xf32>
    %304 = vector.broadcast %53 : f32 to vector<1x128xf32>
    %305 = arith.mulf %304, %229 : vector<1x128xf32>
    %306 = arith.addf %303, %305 : vector<1x128xf32>
    %307 = vector.broadcast %63 : f32 to vector<1x128xf32>
    %308 = arith.addf %306, %307 : vector<1x128xf32>
    %c9_75 = arith.constant 9 : index
    %c0_76 = arith.constant 0 : index
    %309 = vector.load %arg10[%c9_75, %c0_76] : memref<10x128xf32, #tpu.memory_space<vmem>>, vector<1x128xf32>
    tpu.vector_store %arg10[%c9_75, %c0_76], %308 {strides = array<i32>} : memref<10x128xf32, #tpu.memory_space<vmem>>, vector<1x128xf32>,
    return
  }
  func.func @transform_0(%arg0: i32) -> (i32, i32) {
    %c0_i32 = arith.constant 0 : i32
    %c0_i32_0 = arith.constant 0 : i32
    return %c0_i32, %arg0 : i32, i32
  }
  func.func @transform_1(%arg0: i32) -> i32 {
    %c0_i32 = arith.constant 0 : i32
    %c0_i32_0 = arith.constant 0 : i32
    return %c0_i32 : i32
  }
  func.func @transform_2(%arg0: i32) -> i32 {
    %c0_i32 = arith.constant 0 : i32
    %c0_i32_0 = arith.constant 0 : i32
    return %c0_i32 : i32
  }
  func.func @transform_3(%arg0: i32) -> i32 {
    %c0_i32 = arith.constant 0 : i32
    %c0_i32_0 = arith.constant 0 : i32
    return %c0_i32 : i32
  }
  func.func @transform_4(%arg0: i32) -> i32 {
    %c0_i32 = arith.constant 0 : i32
    %c0_i32_0 = arith.constant 0 : i32
    return %c0_i32 : i32
  }
  func.func @transform_5(%arg0: i32) -> i32 {
    %c0_i32 = arith.constant 0 : i32
    %c0_i32_0 = arith.constant 0 : i32
    return %c0_i32 : i32
  }
  func.func @transform_6(%arg0: i32) -> i32 {
    %c0_i32 = arith.constant 0 : i32
    %c0_i32_0 = arith.constant 0 : i32
    return %c0_i32 : i32
  }
  func.func @transform_7(%arg0: i32) -> i32 {
    %c0_i32 = arith.constant 0 : i32
    %c0_i32_0 = arith.constant 0 : i32
    return %c0_i32 : i32
  }
  func.func @transform_8(%arg0: i32) -> i32 {
    %c0_i32 = arith.constant 0 : i32
    %c0_i32_0 = arith.constant 0 : i32
    return %c0_i32 : i32
  }
  func.func @transform_9(%arg0: i32) -> (i32, i32) {
    %c0_i32 = arith.constant 0 : i32
    %c0_i32_0 = arith.constant 0 : i32
    return %c0_i32, %arg0 : i32, i32
  }
}

</mosaic_0001>

<bundles_post_ra>
// kernel: tpu_custom_call.1
= control target key start
LH: loop header
LB: loop body
LE: loop exit
PB: predicated region body
PF: predicated region fallthrough
CT: control target
= control target key end

     0   :  { %s6691_s0 = inlined_call_operand.hbm [shape: f32[784,128], index: 0, kind: input, shape index: {}]   ;;  %s6692_s1 = inlined_call_operand.hbm [shape: f32[8], index: 1, kind: input, shape index: {}]   ;;  %s6693_s2 = inlined_call_operand.vmem [shape: f32[2], index: 2, kind: input, shape index: {}]   ;;  %s6694_s3 = inlined_call_operand.vmem [shape: f32[16], index: 3, kind: input, shape index: {}]   ;;  %s6695_s4 = inlined_call_operand.vmem [shape: f32[2], index: 4, kind: input, shape index: {}]   ;;  %s6696_s5 = inlined_call_operand.vmem [shape: f32[4], index: 5, kind: input, shape index: {}]   ;;  %s6697_s6 = inlined_call_operand.vmem [shape: f32[2], index: 6, kind: input, shape index: {}]   ;;  %s6698_s7 = inlined_call_operand.vmem [shape: f32[20], index: 7, kind: input, shape index: {}]   ;;  %s6699_s8 = inlined_call_operand.vmem [shape: f32[10], index: 8, kind: input, shape index: {}]   ;;  %s6700_s9 = inlined_call_operand.hbm [shape: f32[10,128], index: 9, kind: output, shape index: {}]  }
   0x1   :  { %7201 = sst [smem:[#allocation249_spill]] %s6700_s9 }
   0x2   :  { %14 = vsyncpa [#allocation3], 0 }
   0x3   :  { %15 = vsyncpa [#allocation5], 0 }
   0x4   :  { %16 = vsyncpa [#allocation6], 0 }
   0x5   :  { %17 = vsyncpa [#allocation10], 0 }
   0x6   :  { %18 = vsyncpa [#allocation13], 0 }
   0x7   :  { %19 = vsyncpa [#allocation16], 0  ;;  %s57_s11 = sshll.u32 %s6694_s3, 4  ;;  %s58_s11 = int_to_ptr.vmem [resolvable:$true] %s57_s11 }
   0x8   :  { %20 = vsyncpa [#allocation4], 0  ;;  %s75_s14 = sshll.u32 %s6696_s5, 4  ;;  %s2876_s15 = smov [#allocation9]   ;;  %s76_s14 = int_to_ptr.vmem [resolvable:$true] %s75_s14 }
   0x9   :  { %60 = dma.vmem_to_smem %s58_s11, 16, %s2876_s15, [#allocation10]  }
   0xa   :  { %s2877_s16 = smov [#allocation12]   ;;  %s93_s19 = sshll.u32 %s6698_s7, 4  ;;  %s94_s19 = int_to_ptr.vmem [resolvable:$true] %s93_s19 }
   0xb   :  { %78 = dma.vmem_to_smem %s76_s14, 16, %s2877_s16, [#allocation13]  }
   0xc   :  { %s25_s3 = sshll.u32 %s6691_s0, 4  ;;  %s2878_s22 = smov [#allocation15]   ;;  %s26_s3 = int_to_ptr.hbm [resolvable:$true] %s25_s3 }
   0xd   :  { %96 = dma.vmem_to_smem %s94_s19, 16, %s2878_s22, [#allocation16]  }
   0xe   :  { %s2879_s23 = smov [#allocation2]   ;;  %s7199_s5 = smov 128  }
   0xf   :  { %s27_s24 = sshll.u32 %s2879_s23, 4  ;;  %s7200_s25 = smov 8   ;;  %s28_s24 = int_to_ptr.vmem [resolvable:$true] %s27_s24 }
  0x10   :  { %33 = dma.hbm_to_vmem [thread:$0]  %s26_s3, 12544, %s28_s24, [#allocation3], %s7199_s5, %s7199_s5, %s7200_s25  }
  0x11   :  { %s39_s7 = sshll.u32 %s6692_s1, 4  ;;  %s48_s0 = sshll.u32 %s6693_s2, 4  ;;  %s40_s7 = int_to_ptr.hbm [resolvable:$true] %s39_s7  ;;  %s49_s0 = int_to_ptr.vmem [resolvable:$true] %s48_s0 }
  0x12   :  { %s2882_s30 = smov [#allocation7]   ;;  %s2883_s10 = smov [#allocation8]  }
  0x13   :  { %42 = dma.hbm_to_smem %s40_s7, 16, %s2882_s30, [#allocation5]  }
  0x14   :  { %51 = dma.vmem_to_smem %s49_s0, 16, %s2883_s10, [#allocation6]  }
  0x15   :  { %s66_s13 = sshll.u32 %s6695_s4, 4  ;;  %s84_s16 = sshll.u32 %s6697_s6, 4  ;;  %s67_s13 = int_to_ptr.vmem [resolvable:$true] %s66_s13  ;;  %s85_s16 = int_to_ptr.vmem [resolvable:$true] %s84_s16 }
  0x16   :  { %s2884_s1 = smov [#allocation11]   ;;  %s2885_s17 = smov [#allocation14]  }
  0x17   :  { %69 = dma.vmem_to_smem %s67_s13, 16, %s2884_s1, [#allocation10]  }
  0x18   :  { %87 = dma.vmem_to_smem %s85_s16, 16, %s2885_s17, [#allocation13]  }
  0x19   :  { %s102_s19 = sshll.u32 %s6699_s8, 4  ;;  %s2886_s20 = smov [#allocation17]   ;;  %s103_s19 = int_to_ptr.vmem [resolvable:$true] %s102_s19 }
  0x1a   :  { %105 = dma.vmem_to_smem %s103_s19, 16, %s2886_s20, [#allocation16]  }
  0x1b   :  { %2862 = dma.done.wait [#allocation3], 12544  }
  0x1c   :  { %2863 = vsyncadd [#allocation3], 4294954752 }
  0x1d   :  { %2864 = dma.done.wait [#allocation5], 16  }
  0x1e   :  { %2865 = vsyncadd [#allocation5], 4294967280 }
  0x1f   :  { %2866 = dma.done.wait [#allocation6], 16  }
  0x20   :  { %2867 = vsyncadd [#allocation6], 4294967280 }
  0x21   :  { %2868 = dma.done.wait [#allocation10], 32  }
  0x22   :  { %2869 = vsyncadd [#allocation10], 4294967264 }
  0x23   :  { %2870 = dma.done.wait [#allocation13], 32  }
  0x24   :  { %2871 = vsyncadd [#allocation13], 4294967264 }
  0x25   :  { %2872 = dma.done.wait [#allocation16], 32  }
  0x26   :  { %2873 = vsyncadd [#allocation16], 4294967264 }
  0x27   :  { %142 = sfence }
  0x28   :  { %v209_v0 = vld [vmem:[#allocation2 + $0x10] sm:$0xff]  ;;  %v216_v1 = vld [vmem:[#allocation2 + $0x48] sm:$0xff]  ;;  %v2968_v2 = vld [vmem:[#allocation2 + $0x80] sm:$0xff]  ;;  %vm933_vm0 = vcmask 1043456   ;;  %s5176_s4 = sld [smem:[#allocation7]] }
  0x29   :  { %v2970_v3 = vld [vmem:[#allocation2 + $0xb8] sm:$0xff]  ;;  %v405_v4 = vmax.f32 %v209_v0, %v216_v1  ;;  %v2972_v5 = vld [vmem:[#allocation2 + $0xf0] sm:$0xff]  ;;  %v2974_v6 = vld [vmem:[#allocation2 + $0x128] sm:$0xff]  ;;  %s5186_s6 = sld [smem:[#allocation7 + $0x1]] }
  0x2a   :  { %v2976_v7 = vld [vmem:[#allocation2 + $0x160] sm:$0xff]  ;;  %v2978_v8 = vld [vmem:[#allocation2 + $0x198] sm:$0xff]  ;;  %v2982_v10 = vld [vmem:[#allocation2 + $0x1d0] sm:$0xff]  ;;  %v419_v35 = vmax.f32 %v2968_v2, %v2970_v3  ;;  %s5447_s8 = sld [smem:[#allocation7 + $0x2]] }
  0x2b   :  { %v2980_v9 = vld [vmem:[#allocation2] sm:$0xff]  ;;  %v2984_v11 = vld [vmem:[#allocation2 + $0x208] sm:$0xff]  ;;  %v2988_v13 = vld [vmem:[#allocation2 + $0x278] sm:$0xff]  ;;  %s5492_s21 = sld [smem:[#allocation7 + $0x3]] }
  0x2c   :  { %7202 = vst [vmem:[#allocation26_spill] sm:$0xff] %v2980_v9  ;;  %v2986_v12 = vld [vmem:[#allocation2 + $0x240] sm:$0xff]  ;;  %v2990_v14 = vld [vmem:[#allocation2 + $0x2b0] sm:$0xff]  ;;  %v2992_v15 = vld [vmem:[#allocation2 + $0x2e8] sm:$0xff]  ;;  %s5661_s3 = sld [smem:[#allocation8]] }
  0x2d   :  { %7203 = vst [vmem:[#allocation27_spill] sm:$0xff] %v2990_v14  ;;  %v2994_v16 = vld [vmem:[#allocation2 + $0x1] sm:$0xff]  ;;  %v307_v17 = vld [vmem:[#allocation2 + $0x11] sm:$0xff]  ;;  %v3004_v22 = vld [vmem:[#allocation2 + $0x9] sm:$0xff]  ;;  %s5715_s22 = sld [smem:[#allocation7 + $0x4]] }
  0x2e   :  { %7204 = vst [vmem:[#allocation28_spill] sm:$0xff] %v2992_v15  ;;  %v2996_v18 = vld [vmem:[#allocation2 + $0x8] sm:$0xff]  ;;  %v2998_v19 = vld [vmem:[#allocation2 + $0x18] sm:$0xff]  ;;  %v3000_v20 = vld [vmem:[#allocation2 + $0x20] sm:$0xff]  ;;  %v3032_v36 = vmax.f32 %v307_v17, %v405_v4  ;;  %s5725_s23 = sld [smem:[#allocation7 + $0x5]] }
  0x2f   :  { %7205 = vst [vmem:[#allocation29_spill] sm:$0xff] %v2994_v16  ;;  %v3002_v21 = vld [vmem:[#allocation2 + $0x28] sm:$0xff]  ;;  %v3006_v23 = vld [vmem:[#allocation2 + $0x19] sm:$0xff]  ;;  %v3012_v26 = vld [vmem:[#allocation2 + $0x30] sm:$0xff]  ;;  %s5888_s24 = sld [smem:[#allocation7 + $0x6]] }
  0x30   :  { %7206 = vst [vmem:[#allocation30_spill] sm:$0xff] %v2996_v18  ;;  %v3008_v24 = vld [vmem:[#allocation2 + $0x21] sm:$0xff]  ;;  %v3010_v25 = vld [vmem:[#allocation2 + $0x29] sm:$0xff]  ;;  %v3014_v27 = vld [vmem:[#allocation2 + $0x38] sm:$0xff]  ;;  %s5933_s26 = sld [smem:[#allocation7 + $0x7]] }
  0x31   :  { %7207 = vst [vmem:[#allocation31_spill] sm:$0xff] %v2998_v19  ;;  %v3016_v28 = vld [vmem:[#allocation2 + $0x31] sm:$0xff]  ;;  %v3018_v29 = vld [vmem:[#allocation2 + $0x39] sm:$0xff]  ;;  %v3020_v30 = vld [vmem:[#allocation2 + $0x49] sm:$0xff]  ;;  %s6102_s27 = sld [smem:[#allocation8 + $0x1]] }
  0x32   :  { %7208 = vst [vmem:[#allocation32_spill] sm:$0xff] %v3000_v20  ;;  %v3022_v31 = vld [vmem:[#allocation2 + $0x40] sm:$0xff]  ;;  %v3024_v32 = vld [vmem:[#allocation2 + $0x50] sm:$0xff]  ;;  %v3026_v33 = vld [vmem:[#allocation2 + $0x58] sm:$0xff]  ;;  %s6365_s7 = sld [smem:[#allocation9]] }
  0x33   :  { %7209 = vst [vmem:[#allocation33_spill] sm:$0xff] %v3002_v21  ;;  %v3028_v34 = vld [vmem:[#allocation2 + $0x60] sm:$0xff]  ;;  %v3036_v38 = vld [vmem:[#allocation2 + $0x51] sm:$0xff]  ;;  %v3042_v41 = vld [vmem:[#allocation2 + $0x68] sm:$0xff]  ;;  %s6373_s28 = sld [smem:[#allocation9 + $0x1]] }
  0x34   :  { %7210 = vst [vmem:[#allocation34_spill] sm:$0xff] %v3004_v22  ;;  %v3034_v37 = vld [vmem:[#allocation2 + $0x41] sm:$0xff]  ;;  %v3038_v39 = vld [vmem:[#allocation2 + $0x59] sm:$0xff]  ;;  %v3044_v42 = vld [vmem:[#allocation2 + $0x70] sm:$0xff]  ;;  %s6380_s29 = sld [smem:[#allocation9 + $0x2]] }
  0x35   :  { %7211 = vst [vmem:[#allocation35_spill] sm:$0xff] %v3006_v23  ;;  %v3040_v40 = vld [vmem:[#allocation2 + $0x61] sm:$0xff]  ;;  %v3046_v43 = vld [vmem:[#allocation2 + $0x78] sm:$0xff]  ;;  %v3054_v47 = vld [vmem:[#allocation2 + $0x69] sm:$0xff]  ;;  %s6389_s0 = sld [smem:[#allocation9 + $0x3]] }
  0x36   :  { %7212 = vst [vmem:[#allocation36_spill] sm:$0xff] %v3008_v24  ;;  %v3048_v44 = vld [vmem:[#allocation2 + $0x88] sm:$0xff]  ;;  %v3056_v48 = vld [vmem:[#allocation2 + $0x71] sm:$0xff]  ;;  %v3058_v49 = vld [vmem:[#allocation2 + $0x79] sm:$0xff]  ;;  %s6411_s30 = sld [smem:[#allocation9 + $0x4]] }
  0x37   :  { %7213 = vst [vmem:[#allocation37_spill] sm:$0xff] %v3010_v25  ;;  %v321_v50 = vld [vmem:[#allocation2 + $0x81] sm:$0xff]  ;;  %v3060_v51 = vld [vmem:[#allocation2 + $0x89] sm:$0xff]  ;;  %v3064_v53 = vld [vmem:[#allocation2 + $0x98] sm:$0xff]  ;;  %s6421_s10 = sld [smem:[#allocation9 + $0x5]] }
  0x38   :  { %7214 = vst [vmem:[#allocation38_spill] sm:$0xff] %v3012_v26  ;;  %v3062_v52 = vld [vmem:[#allocation2 + $0x90] sm:$0xff]  ;;  %v3066_v54 = vld [vmem:[#allocation2 + $0xa0] sm:$0xff]  ;;  %v3068_v55 = vld [vmem:[#allocation2 + $0xa8] sm:$0xff]  ;;  %v3114_v22 = vmax.f32 %v321_v50, %v419_v35  ;;  %s6431_s11 = sld [smem:[#allocation9 + $0x6]] }
  0x39   :  { %7215 = vst [vmem:[#allocation39_spill] sm:$0xff] %v3014_v27  ;;  %v3076_v59 = vld [vmem:[#allocation2 + $0x91] sm:$0xff]  ;;  %v3078_v60 = vld [vmem:[#allocation2 + $0x99] sm:$0xff]  ;;  %v3080_v61 = vld [vmem:[#allocation2 + $0xa1] sm:$0xff]  ;;  %v7300_v27 = vmax.f32 %v2976_v7, %v2978_v8  ;;  %s6441_s12 = sld [smem:[#allocation9 + $0x7]] }
  0x3a   :  { %7216 = vst [vmem:[#allocation40_spill] sm:$0xff] %v3016_v28  ;;  %v3082_v62 = vld [vmem:[#allocation2 + $0xa9] sm:$0xff]  ;;  %v3088_v1 = vld [vmem:[#allocation2 + $0xc0] sm:$0xff]  ;;  %v3090_v2 = vld [vmem:[#allocation2 + $0xb1] sm:$0xff]  ;;  %s6475_s13 = sld [smem:[#allocation9 + $0x8]] }
  0x3b   :  { %7217 = vst [vmem:[#allocation41_spill] sm:$0xff] %v3018_v29  ;;  %v3086_v0 = vld [vmem:[#allocation2 + $0xb0] sm:$0xff]  ;;  %v3092_v3 = vld [vmem:[#allocation2 + $0xb9] sm:$0xff]  ;;  %v3094_v4 = vld [vmem:[#allocation2 + $0xc1] sm:$0xff]  ;;  %s6477_s14 = sld [smem:[#allocation9 + $0x9]] }
  0x3c   :  { %7218 = vst [vmem:[#allocation42_spill] sm:$0xff] %v3020_v30  ;;  %v3104_v56 = vld [vmem:[#allocation2 + $0xc8] sm:$0xff]  ;;  %v3106_v46 = vld [vmem:[#allocation2 + $0xd0] sm:$0xff]  ;;  %v3108_v45 = vld [vmem:[#allocation2 + $0xd8] sm:$0xff]  ;;  %s6483_s15 = sld [smem:[#allocation9 + $0xa]] }
  0x3d   :  { %7219 = vst [vmem:[#allocation43_spill] sm:$0xff] %v3024_v32  ;;  %v3110_v16 = vld [vmem:[#allocation2 + $0xe0] sm:$0xff]  ;;  %v3116_v58 = vld [vmem:[#allocation2 + $0xc9] sm:$0xff]  ;;  %v3118_v23 = vld [vmem:[#allocation2 + $0xd1] sm:$0xff]  ;;  %s6489_s16 = sld [smem:[#allocation11]] }
  0x3e   :  { %7220 = vst [vmem:[#allocation44_spill] sm:$0xff] %v3026_v33  ;;  %v3120_v57 = vld [vmem:[#allocation2 + $0xd9] sm:$0xff]  ;;  %v3122_v63 = vld [vmem:[#allocation2 + $0xe1] sm:$0xff]  ;;  %v335_v25 = vld [vmem:[#allocation2 + $0xf1] sm:$0xff]  ;;  %s6491_s1 = sld [smem:[#allocation9 + $0xb]] }
  0x3f   :  { %7221 = vst [vmem:[#allocation45_spill] sm:$0xff] %v3028_v34  ;;  %v3128_v20 = vld [vmem:[#allocation2 + $0xe8] sm:$0xff]  ;;  %v3130_v17 = vld [vmem:[#allocation2 + $0xf8] sm:$0xff]  ;;  %v3132_v35 = vld [vmem:[#allocation2 + $0x100] sm:$0xff]  ;;  %s6497_s17 = sld [smem:[#allocation9 + $0xc]] }
  0x40   :  { %7222 = vst [vmem:[#allocation46_spill] sm:$0xff] %v3032_v36  ;;  %v3134_v50 = vld [vmem:[#allocation2 + $0x108] sm:$0xff]  ;;  %v3138_v18 = vld [vmem:[#allocation2 + $0xf9] sm:$0xff]  ;;  %v3152_v28 = vld [vmem:[#allocation2 + $0x110] sm:$0xff]  ;;  %s6503_s2 = sld [smem:[#allocation9 + $0xd]] }
  0x41   :  { %7223 = vst [vmem:[#allocation47_spill] sm:$0xff] %v3034_v37  ;;  %v3136_v19 = vld [vmem:[#allocation2 + $0xe9] sm:$0xff]  ;;  %v3140_v9 = vld [vmem:[#allocation2 + $0x101] sm:$0xff]  ;;  %v3154_v26 = vld [vmem:[#allocation2 + $0x118] sm:$0xff]  ;;  %s6509_s18 = sld [smem:[#allocation9 + $0xe]] }
  0x42   :  { %7224 = vst [vmem:[#allocation48_spill] sm:$0xff] %v3036_v38  ;;  %v3142_v36 = vld [vmem:[#allocation2 + $0x109] sm:$0xff]  ;;  %v3156_v30 = vld [vmem:[#allocation2 + $0x120] sm:$0xff]  ;;  %v3158_v15 = vld [vmem:[#allocation2 + $0x111] sm:$0xff]  ;;  %s6511_s19 = sld [smem:[#allocation9 + $0xf]] }
  0x43   :  { %7225 = vst [vmem:[#allocation49_spill] sm:$0xff] %v3038_v39  ;;  %v3160_v14 = vld [vmem:[#allocation2 + $0x119] sm:$0xff]  ;;  %v3162_v21 = vld [vmem:[#allocation2 + $0x121] sm:$0xff]  ;;  %v3172_v34 = vld [vmem:[#allocation2 + $0x130] sm:$0xff]  ;;  %s6517_s20 = sld [smem:[#allocation11 + $0x1]] }
  0x44   :  { %7226 = vst [vmem:[#allocation50_spill] sm:$0xff] %v3040_v40  ;;  %v3174_v39 = vld [vmem:[#allocation2 + $0x138] sm:$0xff]  ;;  %v3176_v33 = vld [vmem:[#allocation2 + $0x140] sm:$0xff]  ;;  %v3178_v38 = vld [vmem:[#allocation2 + $0x129] sm:$0xff]  ;;  %v7279_v40 = vmax.f32 %v2972_v5, %v2974_v6  ;;  %s6633_s5 = sld [smem:[#allocation17 + $0x3]] }
  0x45   :  { %7227 = vst [vmem:[#allocation51_spill] sm:$0xff] %v3042_v41  ;;  %v3180_v32 = vld [vmem:[#allocation2 + $0x131] sm:$0xff]  ;;  %v3182_v24 = vld [vmem:[#allocation2 + $0x139] sm:$0xff]  ;;  %v3209_v29 = vld [vmem:[#allocation2 + $0x149] sm:$0xff]  ;;  %s6635_s25 = sld [smem:[#allocation17 + $0x4]] }
  0x46   :  { %7228 = vst [vmem:[#allocation52_spill] sm:$0xff] %v3044_v42  ;;  %v3223_v5 = vld [vmem:[#allocation2 + $0x178] sm:$0xff]  ;;  %v3225_v6 = vld [vmem:[#allocation2 + $0x180] sm:$0xff]  ;;  %v3247_v42 = vld [vmem:[#allocation2 + $0x189] sm:$0xff]  ;;  %s6639_s9 = sld [smem:[#allocation17 + $0x5]] }
  0x47   :  { %7229 = vst [vmem:[#allocation53_spill] sm:$0xff] %v3046_v43  ;;  %v3198_v43 = vld [vmem:[#allocation2 + $0x158] sm:$0xff]  ;;  %v3290_v8 = vld [vmem:[#allocation2 + $0x1c8] sm:$0xff] }
  0x48   :  { %7230 = vst [vmem:[#allocation54_spill] sm:$0xff] %v3048_v44  ;;  %v3194_v44 = vld [vmem:[#allocation2 + $0x148] sm:$0xff]  ;;  %v3249_v41 = vld [vmem:[#allocation2 + $0x191] sm:$0xff]  ;;  %v3411_v37 = vld [vmem:[#allocation2 + $0x279] sm:$0xff] }
  0x49   :  { %7231 = vst [vmem:[#allocation55_spill] sm:$0xff] %v3054_v47  ;;  %v3184_v47 = vld [vmem:[#allocation2 + $0x141] sm:$0xff]  ;;  %v3343_v7 = vld [vmem:[#allocation2 + $0x209] sm:$0xff] }
  0x4a   :  { %7232 = vst [vmem:[#allocation56_spill] sm:$0xff] %v3056_v48  ;;  %v3200_v48 = vld [vmem:[#allocation2 + $0x168] sm:$0xff] }
  0x4b   :  { %7233 = vst [vmem:[#allocation57_spill] sm:$0xff] %v3058_v49  ;;  %v3196_v49 = vld [vmem:[#allocation2 + $0x150] sm:$0xff] }
  0x4c   :  { %7234 = vst [vmem:[#allocation58_spill] sm:$0xff] %v3060_v51  ;;  %v3213_v51 = vld [vmem:[#allocation2 + $0x159] sm:$0xff] }
  0x4d   :  { %7235 = vst [vmem:[#allocation59_spill] sm:$0xff] %v3062_v52  ;;  %v3251_v52 = vld [vmem:[#allocation2 + $0x199] sm:$0xff] }
  0x4e   :  { %7236 = vst [vmem:[#allocation60_spill] sm:$0xff] %v3064_v53  ;;  %v3221_v53 = vld [vmem:[#allocation2 + $0x170] sm:$0xff] }
  0x4f   :  { %7237 = vst [vmem:[#allocation61_spill] sm:$0xff] %v3066_v54  ;;  %v3280_v54 = vld [vmem:[#allocation2 + $0x1b9] sm:$0xff] }
  0x50   :  { %7238 = vst [vmem:[#allocation62_spill] sm:$0xff] %v3068_v55  ;;  %v3215_v55 = vld [vmem:[#allocation2 + $0x169] sm:$0xff] }
  0x51   :  { %7239 = vst [vmem:[#allocation63_spill] sm:$0xff] %v3076_v59  ;;  %v3231_v59 = vld [vmem:[#allocation2 + $0x181] sm:$0xff] }
  0x52   :  { %7240 = vst [vmem:[#allocation64_spill] sm:$0xff] %v3078_v60  ;;  %v3207_v60 = vmax.f32 %v335_v25, %v7279_v40  ;;  %v3227_v25 = vld [vmem:[#allocation2 + $0x171] sm:$0xff]  ;;  %v3229_v40 = vld [vmem:[#allocation2 + $0x179] sm:$0xff] }
  0x53   :  { %7241 = vst [vmem:[#allocation65_spill] sm:$0xff] %v3080_v61  ;;  %v3211_v61 = vld [vmem:[#allocation2 + $0x151] sm:$0xff] }
  0x54   :  { %7242 = vst [vmem:[#allocation66_spill] sm:$0xff] %v3082_v62  ;;  %v349_v62 = vld [vmem:[#allocation2 + $0x161] sm:$0xff] }
  0x55   :  { %7243 = vst [vmem:[#allocation67_spill] sm:$0xff] %v3086_v0  ;;  %v3245_v0 = vld [vmem:[#allocation2 + $0x1a0] sm:$0xff] }
  0x56   :  { %7244 = vst [vmem:[#allocation68_spill] sm:$0xff] %v3088_v1  ;;  %v3241_v1 = vld [vmem:[#allocation2 + $0x188] sm:$0xff] }
  0x57   :  { %7245 = vst [vmem:[#allocation69_spill] sm:$0xff] %v3090_v2  ;;  %v3243_v2 = vld [vmem:[#allocation2 + $0x190] sm:$0xff] }
  0x58   :  { %7246 = vst [vmem:[#allocation70_spill] sm:$0xff] %v3094_v4  ;;  %v3276_v4 = vld [vmem:[#allocation2 + $0x1a9] sm:$0xff] }
  0x59   :  { %7247 = vst [vmem:[#allocation71_spill] sm:$0xff] %v3104_v56  ;;  %v3409_v56 = vld [vmem:[#allocation2 + $0x271] sm:$0xff] }
  0x5a   :  { %7248 = vst [vmem:[#allocation72_spill] sm:$0xff] %v3106_v46  ;;  %v3341_v46 = vld [vmem:[#allocation2 + $0x201] sm:$0xff] }
  0x5b   :  { %7249 = vst [vmem:[#allocation73_spill] sm:$0xff] %v3108_v45  ;;  %v3267_v45 = vld [vmem:[#allocation2 + $0x1b8] sm:$0xff] }
  0x5c   :  { %7250 = vst [vmem:[#allocation74_spill] sm:$0xff] %v3110_v16  ;;  %v3263_v16 = vld [vmem:[#allocation2 + $0x1a8] sm:$0xff] }
  0x5d   :  { %7251 = vst [vmem:[#allocation75_spill] sm:$0xff] %v3116_v58  ;;  %v3253_v58 = vld [vmem:[#allocation2 + $0x1a1] sm:$0xff] }
  0x5e   :  { %7252 = vst [vmem:[#allocation76_spill] sm:$0xff] %v3118_v23  ;;  %v3269_v23 = vld [vmem:[#allocation2 + $0x1c0] sm:$0xff] }
  0x5f   :  { %7253 = vst [vmem:[#allocation77_spill] sm:$0xff] %v3120_v57  ;;  %v3265_v57 = vld [vmem:[#allocation2 + $0x1b0] sm:$0xff] }
  0x60   :  { %7254 = vst [vmem:[#allocation78_spill] sm:$0xff] %v3122_v63  ;;  %v3282_v63 = vld [vmem:[#allocation2 + $0x1c1] sm:$0xff] }
  0x61   :  { %7255 = vst [vmem:[#allocation79_spill] sm:$0xff] %v3128_v20  ;;  %v3300_v20 = vld [vmem:[#allocation2 + $0x1c9] sm:$0xff] }
  0x62   :  { %7256 = vst [vmem:[#allocation80_spill] sm:$0xff] %v3130_v17  ;;  %v3316_v17 = vld [vmem:[#allocation2 + $0x1e9] sm:$0xff] }
  0x63   :  { %7257 = vst [vmem:[#allocation81_spill] sm:$0xff] %v3132_v35  ;;  %v3296_v35 = vld [vmem:[#allocation2 + $0x1e8] sm:$0xff] }
  0x64   :  { %7258 = vst [vmem:[#allocation82_spill] sm:$0xff] %v3134_v50  ;;  %v3302_v50 = vld [vmem:[#allocation2 + $0x1d9] sm:$0xff] }
  0x65   :  { %7259 = vst [vmem:[#allocation83_spill] sm:$0xff] %v3136_v19  ;;  %v3274_v19 = vmax.f32 %v349_v62, %v7300_v27  ;;  %v3292_v27 = vld [vmem:[#allocation2 + $0x1d8] sm:$0xff]  ;;  %v3294_v62 = vld [vmem:[#allocation2 + $0x1e0] sm:$0xff] }
  0x66   :  { %7260 = vst [vmem:[#allocation84_spill] sm:$0xff] %v3138_v18  ;;  %v3278_v18 = vld [vmem:[#allocation2 + $0x1b1] sm:$0xff] }
  0x67   :  { %7261 = vst [vmem:[#allocation85_spill] sm:$0xff] %v3140_v9  ;;  %v3347_v9 = vld [vmem:[#allocation2 + $0x219] sm:$0xff] }
  0x68   :  { %7262 = vst [vmem:[#allocation86_spill] sm:$0xff] %v3142_v36  ;;  %v363_v36 = vld [vmem:[#allocation2 + $0x1d1] sm:$0xff] }
  0x69   :  { %7263 = vst [vmem:[#allocation87_spill] sm:$0xff] %v3152_v28  ;;  %v3320_v28 = vld [vmem:[#allocation2 + $0x1f9] sm:$0xff] }
  0x6a   :  { %7264 = vst [vmem:[#allocation88_spill] sm:$0xff] %v3154_v26  ;;  %v3318_v26 = vld [vmem:[#allocation2 + $0x1f1] sm:$0xff] }
  0x6b   :  { %7265 = vst [vmem:[#allocation89_spill] sm:$0xff] %v3156_v30  ;;  %v3312_v30 = vld [vmem:[#allocation2 + $0x1f0] sm:$0xff] }
  0x6c   :  { %7266 = vst [vmem:[#allocation90_spill] sm:$0xff] %v3158_v15  ;;  %v3304_v15 = vld [vmem:[#allocation2 + $0x1e1] sm:$0xff] }
  0x6d   :  { %7267 = vst [vmem:[#allocation91_spill] sm:$0xff] %v3160_v14  ;;  %v3314_v14 = vld [vmem:[#allocation2 + $0x1f8] sm:$0xff] }
  0x6e   :  { %7268 = vst [vmem:[#allocation92_spill] sm:$0xff] %v3162_v21  ;;  %v3367_v21 = vld [vmem:[#allocation2 + $0x229] sm:$0xff] }
  0x6f   :  { %7269 = vst [vmem:[#allocation93_spill] sm:$0xff] %v3172_v34  ;;  %v3391_v34 = vld [vmem:[#allocation2 + $0x259] sm:$0xff] }
  0x70   :  { %7270 = vst [vmem:[#allocation94_spill] sm:$0xff] %v3174_v39  ;;  %v7320_v39 = vmax.f32 %v2982_v10, %v2984_v11  ;;  %v3355_v10 = vld [vmem:[#allocation2 + $0x220] sm:$0xff]  ;;  %v3357_v11 = vld [vmem:[#allocation2 + $0x228] sm:$0xff] }
  0x71   :  { %7271 = vst [vmem:[#allocation95_spill] sm:$0xff] %v3176_v33  ;;  %v3332_v33 = vld [vmem:[#allocation2 + $0x210] sm:$0xff] }
  0x72   :  { %7272 = vst [vmem:[#allocation96_spill] sm:$0xff] %v3180_v32  ;;  %v3339_v32 = vmax.f32 %v363_v36, %v7320_v39  ;;  %v3359_v36 = vld [vmem:[#allocation2 + $0x230] sm:$0xff]  ;;  %v3361_v39 = vld [vmem:[#allocation2 + $0x238] sm:$0xff] }
  0x73   :  { %7273 = vst [vmem:[#allocation97_spill] sm:$0xff] %v3182_v24  ;;  %v3334_v24 = vld [vmem:[#allocation2 + $0x218] sm:$0xff] }
  0x74   :  { %7274 = vst [vmem:[#allocation98_spill] sm:$0xff] %v3184_v47  ;;  %v3330_v47 = vld [vmem:[#allocation2 + $0x200] sm:$0xff] }
  0x75   :  { %7275 = vst [vmem:[#allocation99_spill] sm:$0xff] %v3194_v44  ;;  %v3389_v44 = vld [vmem:[#allocation2 + $0x251] sm:$0xff] }
  0x76   :  { %7276 = vst [vmem:[#allocation100_spill] sm:$0xff] %v3196_v49  ;;  %v3385_v49 = vld [vmem:[#allocation2 + $0x260] sm:$0xff] }
  0x77   :  { %7277 = vst [vmem:[#allocation101_spill] sm:$0xff] %v3198_v43  ;;  %v3365_v43 = vld [vmem:[#allocation2 + $0x221] sm:$0xff] }
  0x78   :  { %7278 = vst [vmem:[#allocation102_spill] sm:$0xff] %v3200_v48  ;;  %v377_v48 = vld [vmem:[#allocation2 + $0x241] sm:$0xff] }
  0x79   :  { %7280 = vst [vmem:[#allocation103_spill] sm:$0xff] %v3209_v29  ;;  %v3387_v29 = vld [vmem:[#allocation2 + $0x249] sm:$0xff] }
  0x7a   :  { %7281 = vst [vmem:[#allocation104_spill] sm:$0xff] %v3211_v61  ;;  %v3345_v61 = vld [vmem:[#allocation2 + $0x211] sm:$0xff] }
  0x7b   :  { %7282 = vst [vmem:[#allocation105_spill] sm:$0xff] %v3213_v51  ;;  %v3381_v51 = vld [vmem:[#allocation2 + $0x250] sm:$0xff] }
  0x7c   :  { %7283 = vst [vmem:[#allocation106_spill] sm:$0xff] %v3215_v55  ;;  %v3371_v55 = vld [vmem:[#allocation2 + $0x239] sm:$0xff] }
  0x7d   :  { %7284 = vst [vmem:[#allocation107_spill] sm:$0xff] %v3221_v53  ;;  %v3383_v53 = vld [vmem:[#allocation2 + $0x258] sm:$0xff] }
  0x7e   :  { %7285 = vst [vmem:[#allocation108_spill] sm:$0xff] %v3223_v5  ;;  %v3379_v5 = vld [vmem:[#allocation2 + $0x248] sm:$0xff] }
  0x7f   :  { %7286 = vst [vmem:[#allocation109_spill] sm:$0xff] %v3225_v6  ;;  %v391_v6 = vld [vmem:[#allocation2 + $0x2b1] sm:$0xff] }
  0x80   :  { %7287 = vst [vmem:[#allocation110_spill] sm:$0xff] %v3227_v25  ;;  %v3369_v25 = vld [vmem:[#allocation2 + $0x231] sm:$0xff] }
  0x81   :  { %7288 = vst [vmem:[#allocation111_spill] sm:$0xff] %v3229_v40  ;;  %v7347_v40 = vmax.f32 %v2986_v12, %v2988_v13  ;;  %v3450_v12 = vld [vmem:[#allocation2 + $0x2b8] sm:$0xff] }
  0x82   :  { %7289 = vst [vmem:[#allocation112_spill] sm:$0xff] %v3231_v59  ;;  %v3393_v59 = vld [vmem:[#allocation2 + $0x261] sm:$0xff]  ;;  %v3452_v13 = vld [vmem:[#allocation2 + $0x299] sm:$0xff] }
  0x83   :  { %7290 = vst [vmem:[#allocation113_spill] sm:$0xff] %v3241_v1  ;;  %v3407_v1 = vld [vmem:[#allocation2 + $0x269] sm:$0xff] }
  0x84   :  { %7291 = vst [vmem:[#allocation114_spill] sm:$0xff] %v3243_v2  ;;  %v3403_v2 = vld [vmem:[#allocation2 + $0x268] sm:$0xff] }
  0x85   :  { %7292 = vst [vmem:[#allocation115_spill] sm:$0xff] %v3245_v0  ;;  %v3436_v0 = vld [vmem:[#allocation2 + $0x289] sm:$0xff] }
  0x86   :  { %7293 = vst [vmem:[#allocation116_spill] sm:$0xff] %v3247_v42  ;;  %v3405_v42 = vld [vmem:[#allocation2 + $0x270] sm:$0xff] }
  0x87   :  { %7294 = vst [vmem:[#allocation117_spill] sm:$0xff] %v3249_v41  ;;  %v3483_v41 = vld [vmem:[#allocation2 + $0x2c8] sm:$0xff] }
  0x88   :  { %7295 = vst [vmem:[#allocation118_spill] sm:$0xff] %v3253_v58  ;;  %v3434_v58 = vld [vmem:[#allocation2 + $0x281] sm:$0xff] }
  0x89   :  { %7296 = vst [vmem:[#allocation119_spill] sm:$0xff] %v3263_v16  ;;  %v3783_v16 = vld [vmem:[#allocation2 + $0xc3] sm:$0xff] }
  0x8a   :  { %7297 = vst [vmem:[#allocation120_spill] sm:$0xff] %v3265_v57  ;;  %v3779_v57 = vld [vmem:[#allocation2 + $0x132] sm:$0xff] }
  0x8b   :  { %7298 = vst [vmem:[#allocation121_spill] sm:$0xff] %v3267_v45  ;;  %v3446_v45 = vld [vmem:[#allocation2 + $0x2a0] sm:$0xff] }
  0x8c   :  { %7299 = vst [vmem:[#allocation122_spill] sm:$0xff] %v3269_v23  ;;  %v3423_v23 = vld [vmem:[#allocation2 + $0x288] sm:$0xff] }
  0x8d   :  { %7301 = vst [vmem:[#allocation123_spill] sm:$0xff] %v3276_v4  ;;  %v3800_v4 = vld [vmem:[#allocation2 + $0x142] sm:$0xff] }
  0x8e   :  { %7302 = vst [vmem:[#allocation124_spill] sm:$0xff] %v3278_v18  ;;  %v3471_v18 = vld [vmem:[#allocation2 + $0x2e9] sm:$0xff] }
  0x8f   :  { %7303 = vst [vmem:[#allocation125_spill] sm:$0xff] %v3280_v54  ;;  %v3425_v54 = vld [vmem:[#allocation2 + $0x290] sm:$0xff] }
  0x90   :  { %7304 = vst [vmem:[#allocation126_spill] sm:$0xff] %v3282_v63  ;;  %v3421_v63 = vld [vmem:[#allocation2 + $0x280] sm:$0xff] }
  0x91   :  { %7305 = vst [vmem:[#allocation127_spill] sm:$0xff] %v3290_v8 }
  0x92   :  { %7306 = vst [vmem:[#allocation128_spill] sm:$0xff] %v3292_v27 }
  0x93   :  { %7307 = vst [vmem:[#allocation129_spill] sm:$0xff] %v3294_v62  ;;  %v3448_v62 = vld [vmem:[#allocation2 + $0x2a8] sm:$0xff] }
  0x94   :  { %7308 = vst [vmem:[#allocation130_spill] sm:$0xff] %v3296_v35  ;;  %v3444_v35 = vld [vmem:[#allocation2 + $0x298] sm:$0xff] }
  0x95   :  { %7309 = vst [vmem:[#allocation131_spill] sm:$0xff] %v3300_v20  ;;  %v3432_v20 = vmax.f32 %v377_v48, %v7347_v40  ;;  %v3454_v48 = vld [vmem:[#allocation2 + $0x2a1] sm:$0xff] }
  0x96   :  { %7310 = vst [vmem:[#allocation132_spill] sm:$0xff] %v3302_v50  ;;  %v7357_v40 = vld [vmem:[#allocation27_spill] sm:$0xff]  ;;  %v7358_v50 = vld [vmem:[#allocation28_spill] sm:$0xff] }
  0x97   :  { %7311 = vst [vmem:[#allocation133_spill] sm:$0xff] %v3304_v15  ;;  %v3438_v15 = vld [vmem:[#allocation2 + $0x291] sm:$0xff]  ;;  %v7359_v27 = vmax.f32 %v7357_v40, %v7358_v50 }
  0x98   :  { %7312 = vst [vmem:[#allocation134_spill] sm:$0xff] %v3312_v30  ;;  %v3469_v30 = vld [vmem:[#allocation2 + $0x2b9] sm:$0xff]  ;;  %v3505_v50 = vld [vmem:[#allocation2 + $0x2d1] sm:$0xff] }
  0x99   :  { %7313 = vst [vmem:[#allocation135_spill] sm:$0xff] %v3314_v14  ;;  %v3459_v8 = vmax.f32 %v391_v6, %v7359_v27  ;;  %v503_v14 = vld [vmem:[#allocation2 + $0x12] sm:$0xff]  ;;  %v3509_v6 = vld [vmem:[#allocation2 + $0x2e1] sm:$0xff] }
  0x9a   :  { %7314 = vst [vmem:[#allocation136_spill] sm:$0xff] %v3316_v17  ;;  %v3485_v17 = vld [vmem:[#allocation2 + $0x2c1] sm:$0xff]  ;;  %v3530_v40 = vld [vmem:[#allocation2 + $0x2f1] sm:$0xff] }
  0x9b   :  { %7315 = vst [vmem:[#allocation137_spill] sm:$0xff] %v3318_v26  ;;  %v3467_v26 = vld [vmem:[#allocation2 + $0x2a9] sm:$0xff]  ;;  %v783_v27 = vmax.f32 %v3471_v18, %v3459_v8  ;;  %v7384_v8 = vmax.f32 %v3178_v38, %v3207_v60  ;;  %v3582_v38 = vld [vmem:[#allocation2 + $0x1a] sm:$0xff] }
  0x9c   :  { %7316 = vst [vmem:[#allocation138_spill] sm:$0xff] %v3320_v28  ;;  %v3481_v28 = vld [vmem:[#allocation2 + $0x2c0] sm:$0xff]  ;;  %v3586_v60 = vld [vmem:[#allocation2 + $0x2a] sm:$0xff] }
  0x9d   :  { %7317 = vst [vmem:[#allocation139_spill] sm:$0xff] %v3330_v47  ;;  %v3777_v47 = vld [vmem:[#allocation2 + $0x122] sm:$0xff] }
  0x9e   :  { %7318 = vst [vmem:[#allocation140_spill] sm:$0xff] %v3332_v33  ;;  %v3762_v33 = vld [vmem:[#allocation2 + $0xb3] sm:$0xff] }
  0x9f   :  { %7319 = vst [vmem:[#allocation141_spill] sm:$0xff] %v3334_v24  ;;  %v3743_v24 = vld [vmem:[#allocation2 + $0xa3] sm:$0xff] }
  0xa0   :  { %7321 = vst [vmem:[#allocation142_spill] sm:$0xff] %v3341_v46  ;;  %v3764_v46 = vld [vmem:[#allocation2 + $0xbb] sm:$0xff] }
  0xa1   :  { %7322 = vst [vmem:[#allocation143_spill] sm:$0xff] %v3345_v61  ;;  %v3760_v61 = vld [vmem:[#allocation2 + $0xab] sm:$0xff] }
  0xa2   :  { %7323 = vst [vmem:[#allocation144_spill] sm:$0xff] %v3347_v9  ;;  %v3487_v9 = vld [vmem:[#allocation2 + $0x2c9] sm:$0xff] }
  0xa3   :  { %7324 = vst [vmem:[#allocation145_spill] sm:$0xff] %v3355_v10  ;;  %v3739_v10 = vld [vmem:[#allocation2 + $0x93] sm:$0xff] }
  0xa4   :  { %7325 = vst [vmem:[#allocation146_spill] sm:$0xff] %v3357_v11  ;;  %v3524_v11 = vld [vmem:[#allocation2 + $0x300] sm:$0xff] }
  0xa5   :  { %7326 = vst [vmem:[#allocation147_spill] sm:$0xff] %v3359_v36  ;;  %v3501_v36 = vld [vmem:[#allocation2 + $0x2e0] sm:$0xff] }
  0xa6   :  { %7327 = vst [vmem:[#allocation148_spill] sm:$0xff] %v3361_v39  ;;  %v3497_v39 = vld [vmem:[#allocation2 + $0x2d0] sm:$0xff] }
  0xa7   :  { %7328 = vst [vmem:[#allocation149_spill] sm:$0xff] %v3365_v43  ;;  %v3526_v43 = vld [vmem:[#allocation2 + $0x308] sm:$0x1f] }
  0xa8   :  { %7329 = vst [vmem:[#allocation150_spill] sm:$0xff] %v3367_v21  ;;  %v769_v21 = vmax.f32 %v3411_v37, %v3432_v20  ;;  %v559_v20 = vld [vmem:[#allocation2 + $0x1d2] sm:$0xff] }
  0xa9   :  { %7330 = vst [vmem:[#allocation151_spill] sm:$0xff] %v3369_v25  ;;  %v3499_v25 = vld [vmem:[#allocation2 + $0x2d8] sm:$0xff]  ;;  %v3520_v37 = vld [vmem:[#allocation2 + $0x2f0] sm:$0xff] }
  0xaa   :  { %7331 = vst [vmem:[#allocation152_spill] sm:$0xff] %v3371_v55  ;;  %v517_v55 = vld [vmem:[#allocation2 + $0x82] sm:$0xff] }
  0xab   :  { %7332 = vst [vmem:[#allocation153_spill] sm:$0xff] %v3379_v5  ;;  %v3522_v5 = vld [vmem:[#allocation2 + $0x2f8] sm:$0xff] }
  0xac   :  { %7333 = vst [vmem:[#allocation154_spill] sm:$0xff] %v3381_v51  ;;  %v545_v51 = vld [vmem:[#allocation2 + $0x162] sm:$0xff] }
  0xad   :  { %7334 = vst [vmem:[#allocation155_spill] sm:$0xff] %v3383_v53 }
  0xae   :  { %7335 = vst [vmem:[#allocation156_spill] sm:$0xff] %v3385_v49  ;;  %v7373_v49 = vld [vmem:[#allocation46_spill] sm:$0xff] }
  0xaf   :  { %7336 = vst [vmem:[#allocation157_spill] sm:$0xff] %v3387_v29  ;;  %v3507_v29 = vld [vmem:[#allocation2 + $0x2d9] sm:$0xff] }
  0xb0   :  { %7337 = vst [vmem:[#allocation158_spill] sm:$0xff] %v3389_v44  ;;  %v531_v44 = vld [vmem:[#allocation2 + $0xf2] sm:$0xff] }
  0xb1   :  { %7338 = vst [vmem:[#allocation159_spill] sm:$0xff] %v3391_v34  ;;  %v3566_v18 = vmax.f32 %v531_v44, %v7384_v8  ;;  %v3584_v44 = vld [vmem:[#allocation2 + $0x22] sm:$0xff]  ;;  %v3609_v8 = vld [vmem:[#allocation2 + $0x27a] sm:$0xff] }
  0xb2   :  { %7339 = vst [vmem:[#allocation160_spill] sm:$0xff] %v3393_v59  ;;  %v7372_v59 = vld [vmem:[#allocation42_spill] sm:$0xff] }
  0xb3   :  { %7340 = vst [vmem:[#allocation161_spill] sm:$0xff] %v3403_v2  ;;  %v7374_v34 = vmax.f32 %v7372_v59, %v7373_v49  ;;  %v510_v59 = vld [vmem:[#allocation2 + $0x4a] sm:$0xff] }
  0xb4   :  { %7341 = vst [vmem:[#allocation162_spill] sm:$0xff] %v3405_v42  ;;  %v3538_v42 = vld [vmem:[#allocation2 + $0x2f9] sm:$0xff]  ;;  %v3542_v2 = vld [vmem:[#allocation2 + $0x309] sm:$0x1f] }
  0xb5   :  { %7342 = vst [vmem:[#allocation163_spill] sm:$0xff] %v3407_v1  ;;  %v3518_v53 = vmax.f32 %v503_v14, %v7374_v34  ;;  %v3540_v1 = vld [vmem:[#allocation2 + $0x301] sm:$0xff]  ;;  %v7385_v34 = vmax.f32 %v3251_v52, %v3274_v19 }
  0xb6   :  { %7343 = vst [vmem:[#allocation164_spill] sm:$0xff] %v3409_v56  ;;  %v573_v56 = vld [vmem:[#allocation2 + $0x242] sm:$0xff] }
  0xb7   :  { %7344 = vst [vmem:[#allocation165_spill] sm:$0xff] %v3421_v63  ;;  %v3552_v14 = vld [vmem:[#allocation2 + $0x2] sm:$0xff]  ;;  %v3571_v49 = vmax.f32 %v545_v51, %v7385_v34  ;;  %v797_v19 = vmax.f32 %v510_v59, %v3518_v53  ;;  %v3589_v51 = vld [vmem:[#allocation2 + $0x12a] sm:$0xff]  ;;  %v3595_v52 = vmax.f32 %v573_v56, %v769_v21  ;;  %v3603_v34 = vld [vmem:[#allocation2 + $0x32] sm:$0xff] }
  0xb8   :  { %7345 = vst [vmem:[#allocation166_spill] sm:$0xff] %v3423_v23  ;;  %v3561_v23 = vld [vmem:[#allocation2 + $0xba] sm:$0xff]  ;;  %v3607_v59 = vld [vmem:[#allocation2 + $0x42] sm:$0xff]  ;;  %v3631_v21 = vld [vmem:[#allocation2 + $0x72] sm:$0xff] }
  0xb9   :  { %7346 = vst [vmem:[#allocation167_spill] sm:$0xff] %v3425_v54  ;;  %v7383_v54 = vmax.f32 %v3092_v3, %v3114_v22  ;;  %v587_v22 = vld [vmem:[#allocation2 + $0x2b2] sm:$0xff]  ;;  %v3605_v53 = vld [vmem:[#allocation2 + $0x3a] sm:$0xff] }
  0xba   :  { %7348 = vst [vmem:[#allocation168_spill] sm:$0xff] %v3434_v58  ;;  %v3621_v3 = vld [vmem:[#allocation2 + $0x52] sm:$0xff]  ;;  %v3735_v58 = vld [vmem:[#allocation2 + $0x102] sm:$0xff] }
  0xbb   :  { %7349 = vst [vmem:[#allocation169_spill] sm:$0xff] %v3436_v0  ;;  %v3559_v0 = vmax.f32 %v517_v55, %v7383_v54  ;;  %v3611_v55 = vmax.f32 %v587_v22, %v783_v27  ;;  %v3623_v54 = vld [vmem:[#allocation2 + $0x5a] sm:$0xff]  ;;  %v3627_v27 = vld [vmem:[#allocation2 + $0x62] sm:$0xff]  ;;  %v3629_v22 = vld [vmem:[#allocation2 + $0x6a] sm:$0xff] }
  0xbc   :  { %7350 = vst [vmem:[#allocation170_spill] sm:$0xff] %v3438_v15  ;;  %v3554_v15 = vld [vmem:[#allocation2 + $0xa] sm:$0xff] }
  0xbd   :  { %7351 = vst [vmem:[#allocation171_spill] sm:$0xff] %v3444_v35  ;;  %v811_v56 = vmax.f32 %v3561_v23, %v3559_v0  ;;  %v602_v0 = vld [vmem:[#allocation2 + $0x1b] sm:$0xff] }
  0xbe   :  { %7352 = vst [vmem:[#allocation172_spill] sm:$0xff] %v3446_v45  ;;  %v615_v45 = vld [vmem:[#allocation2 + $0x83] sm:$0xff]  ;;  %v3733_v35 = vld [vmem:[#allocation2 + $0xfa] sm:$0xff] }
  0xbf   :  { %7353 = vst [vmem:[#allocation173_spill] sm:$0xff] %v3448_v62  ;;  %v3693_v62 = vld [vmem:[#allocation2 + $0xd2] sm:$0xff]  ;;  %v3737_v63 = vmax.f32 %v615_v45, %v811_v56  ;;  %v3758_v56 = vld [vmem:[#allocation2 + $0x11a] sm:$0xff] }
  0xc0   :  { %7354 = vst [vmem:[#allocation174_spill] sm:$0xff] %v3450_v12  ;;  %v3756_v45 = vld [vmem:[#allocation2 + $0x112] sm:$0xff] }
  0xc1   :  { %7355 = vst [vmem:[#allocation175_spill] sm:$0xff] %v3452_v13  ;;  %v3720_v13 = vld [vmem:[#allocation2 + $0x8b] sm:$0xff] }
  0xc2   :  { %7356 = vst [vmem:[#allocation176_spill] sm:$0xff] %v3454_v48  ;;  %v3712_v48 = vld [vmem:[#allocation2 + $0xda] sm:$0xff] }
  0xc3   :  { %7360 = vst [vmem:[#allocation27_spill] sm:$0xff] %v3467_v26  ;;  %v3691_v26 = vld [vmem:[#allocation2 + $0xca] sm:$0xff] }
  0xc4   :  { %7361 = vst [vmem:[#allocation28_spill] sm:$0xff] %v3469_v30  ;;  %v7386_v30 = vmax.f32 %v3343_v7, %v3339_v32  ;;  %v3591_v32 = vld [vmem:[#allocation2 + $0x19a] sm:$0xff]  ;;  %v603_v7 = vld [vmem:[#allocation2 + $0x23] sm:$0xff] }
  0xc5   :  { %7362 = vst [vmem:[#allocation177_spill] sm:$0xff] %v3481_v28  ;;  %v3689_v28 = vld [vmem:[#allocation2 + $0xc2] sm:$0xff] }
  0xc6   :  { %7363 = vst [vmem:[#allocation178_spill] sm:$0xff] %v3483_v41  ;;  %v3576_v12 = vmax.f32 %v559_v20, %v7386_v30  ;;  %v3593_v30 = vld [vmem:[#allocation2 + $0x20a] sm:$0xff]  ;;  %v3674_v41 = vld [vmem:[#allocation2 + $0x53] sm:$0xff] }
  0xc7   :  { %7364 = vst [vmem:[#allocation179_spill] sm:$0xff] %v3485_v17 }
  0xc8   :  { %7365 = vst [vmem:[#allocation180_spill] sm:$0xff] %v3487_v9  ;;  %v3672_v9 = vld [vmem:[#allocation2 + $0x4b] sm:$0xff] }
  0xc9   :  { %7366 = vst [vmem:[#allocation181_spill] sm:$0xff] %v3497_v39  ;;  %v3659_v39 = vld [vmem:[#allocation2 + $0x33] sm:$0xff] }
  0xca   :  { %7367 = vst [vmem:[#allocation182_spill] sm:$0xff] %v3499_v25  ;;  %v3655_v25 = vld [vmem:[#allocation2 + $0xa2] sm:$0xff]  ;;  %v703_v17 = vmax.f32 %v3603_v34, %v3659_v39 }
  0xcb   :  { %7368 = vst [vmem:[#allocation183_spill] sm:$0xff] %v3501_v36  ;;  %v3697_v34 = vld [vmem:[#allocation2 + $0x63] sm:$0xff] }
  0xcc   :  { %7369 = vst [vmem:[#allocation184_spill] sm:$0xff] %v3505_v50  ;;  %v3676_v50 = vld [vmem:[#allocation2 + $0x5b] sm:$0xff] }
  0xcd   :  { %7370 = vst [vmem:[#allocation185_spill] sm:$0xff] %v3507_v29  ;;  %v3653_v29 = vld [vmem:[#allocation2 + $0x9a] sm:$0xff]  ;;  %v3714_v39 = vld [vmem:[#allocation2 + $0xe2] sm:$0xff] }
  0xce   :  { %7371 = vst [vmem:[#allocation186_spill] sm:$0xff] %v3509_v6  ;;  %v3625_v6 = vld [vmem:[#allocation2 + $0x2ea] sm:$0xff] }
  0xcf   :  { %7375 = vst [vmem:[#allocation42_spill] sm:$0xff] %v3520_v37  ;;  %v604_v37 = vld [vmem:[#allocation2 + $0x2b] sm:$0xff] }
  0xd0   :  { %7376 = vst [vmem:[#allocation46_spill] sm:$0xff] %v3522_v5  ;;  %v3643_v5 = vld [vmem:[#allocation2 + $0x8a] sm:$0xff] }
  0xd1   :  { %7377 = vst [vmem:[#allocation187_spill] sm:$0xff] %v3524_v11  ;;  %v601_v11 = vld [vmem:[#allocation2 + $0x13] sm:$0xff] }
  0xd2   :  { %7378 = vst [vmem:[#allocation188_spill] sm:$0xff] %v3526_v43  ;;  %v599_v43 = vld [vmem:[#allocation2 + $0x3] sm:$0xff]  ;;  %v3647_v23 = vmax.f32 %v601_v11, %v797_v19  ;;  %v3661_v11 = vld [vmem:[#allocation2 + $0x3b] sm:$0xff] }
  0xd3   :  { %7379 = vst [vmem:[#allocation189_spill] sm:$0xff] %v3530_v40  ;;  %v697_v20 = vmax.f32 %v3552_v14, %v599_v43  ;;  %v3663_v19 = vld [vmem:[#allocation2 + $0x43] sm:$0xff]  ;;  %v700_v40 = vmax.f32 %v3582_v38, %v602_v0  ;;  %v701_v43 = vmax.f32 %v3584_v44, %v603_v7  ;;  %v3670_v14 = vld [vmem:[#allocation2 + $0xb2] sm:$0xff]  ;;  %v704_v38 = vmax.f32 %v3605_v53, %v3661_v11 }
  0xd4   :  { %7380 = vst [vmem:[#allocation190_spill] sm:$0xff] %v3538_v42  ;;  %v3641_v42 = vld [vmem:[#allocation2 + $0x7a] sm:$0xff]  ;;  %v3699_v53 = vld [vmem:[#allocation2 + $0x6b] sm:$0xff] }
  0xd5   :  { %7381 = vst [vmem:[#allocation191_spill] sm:$0xff] %v3540_v1  ;;  %v600_v1 = vld [vmem:[#allocation2 + $0xb] sm:$0xff]  ;;  %v3701_v11 = vld [vmem:[#allocation2 + $0x73] sm:$0xff] }
  0xd6   :  { %7382 = vst [vmem:[#allocation192_spill] sm:$0xff] %v3542_v2  ;;  %v698_v36 = vmax.f32 %v3554_v15, %v600_v1  ;;  %v3651_v2 = vld [vmem:[#allocation2 + $0x92] sm:$0xff]  ;;  %v702_v15 = vmax.f32 %v3586_v60, %v604_v37  ;;  %v3668_v1 = vld [vmem:[#allocation2 + $0xaa] sm:$0xff]  ;;  %v7395_v37 = vld [vmem:[#allocation26_spill] sm:$0xff] }
  0xd7   :  { %7387 = vst [vmem:[#allocation193_spill] sm:$0xff] %v3595_v52  ;;  %v7396_v60 = vld [vmem:[#allocation29_spill] sm:$0xff]  ;;  %v3808_v52 = vld [vmem:[#allocation2 + $0xeb] sm:$0xff] }
  0xd8   :  { %7388 = vst [vmem:[#allocation194_spill] sm:$0xff] %v3609_v8  ;;  %v7397_v7 = vmax.f32 %v7395_v37, %v7396_v60  ;;  %v7400_v60 = vld [vmem:[#allocation30_spill] sm:$0xff]  ;;  %v3821_v8 = vld [vmem:[#allocation2 + $0x152] sm:$0xff] }
  0xd9   :  { %7389 = vst [vmem:[#allocation195_spill] sm:$0xff] %v3611_v55  ;;  %v3741_v37 = vld [vmem:[#allocation2 + $0x9b] sm:$0xff] }
  0xda   :  { %7390 = vst [vmem:[#allocation196_spill] sm:$0xff] %v3625_v6  ;;  %v3687_v0 = vmax.f32 %v7397_v7, %v697_v20  ;;  %v7401_v7 = vld [vmem:[#allocation34_spill] sm:$0xff] }
  0xdb   :  { %7391 = vst [vmem:[#allocation197_spill] sm:$0xff] %v3647_v23  ;;  %v7402_v44 = vmax.f32 %v7400_v60, %v7401_v7  ;;  %v3716_v23 = vld [vmem:[#allocation2 + $0xea] sm:$0xff]  ;;  %v3798_v55 = vld [vmem:[#allocation2 + $0x13a] sm:$0xff] }
  0xdc   :  { %7392 = vst [vmem:[#allocation198_spill] sm:$0xff] %v3668_v1  ;;  %v7406_v60 = vld [vmem:[#allocation35_spill] sm:$0xff] }
  0xdd   :  { %7393 = vst [vmem:[#allocation199_spill] sm:$0xff] %v3670_v14  ;;  %v3806_v6 = vld [vmem:[#allocation2 + $0xe3] sm:$0xff]  ;;  %v629_v14 = vld [vmem:[#allocation2 + $0xf3] sm:$0xff] }
  0xde   :  { %7394 = vst [vmem:[#allocation200_spill] sm:$0xff] %v3672_v9  ;;  %v3718_v9 = vld [vmem:[#allocation2 + $0x7b] sm:$0xff]  ;;  %v3827_v1 = vld [vmem:[#allocation2 + $0x103] sm:$0xff] }
  0xdf   :  { %7398 = vst [vmem:[#allocation26_spill] sm:$0xff] %v3687_v0  ;;  %v3710_v0 = vmax.f32 %v7402_v44, %v698_v36  ;;  %v7405_v44 = vld [vmem:[#allocation31_spill] sm:$0xff] }
  0xe0   :  { %7399 = vst [vmem:[#allocation29_spill] sm:$0xff] %v3693_v62  ;;  %v7407_v7 = vmax.f32 %v7405_v44, %v7406_v60  ;;  %v7412_v60 = vld [vmem:[#allocation36_spill] sm:$0xff]  ;;  %v3847_v62 = vld [vmem:[#allocation2 + $0x17a] sm:$0xff] }
  0xe1   :  { %7403 = vst [vmem:[#allocation30_spill] sm:$0xff] %v3710_v0  ;;  %v3785_v44 = vld [vmem:[#allocation2 + $0xcb] sm:$0xff] }
  0xe2   :  { %7404 = vst [vmem:[#allocation34_spill] sm:$0xff] %v3716_v23  ;;  %v3731_v0 = vmax.f32 %v7407_v7, %v700_v40  ;;  %v7411_v40 = vld [vmem:[#allocation32_spill] sm:$0xff]  ;;  %v3878_v23 = vld [vmem:[#allocation2 + $0x123] sm:$0xff] }
  0xe3   :  { %7409 = vst [vmem:[#allocation35_spill] sm:$0xff] %v3735_v58  ;;  %v7413_v7 = vmax.f32 %v7411_v40, %v7412_v60  ;;  %v7418_v60 = vld [vmem:[#allocation33_spill] sm:$0xff]  ;;  %v3900_v58 = vld [vmem:[#allocation2 + $0x1aa] sm:$0xff] }
  0xe4   :  { %7408 = vst [vmem:[#allocation31_spill] sm:$0xff] %v3731_v0  ;;  %v3754_v0 = vld [vmem:[#allocation2 + $0x10a] sm:$0xff]  ;;  %v3787_v40 = vld [vmem:[#allocation2 + $0xd3] sm:$0xff] }
  0xe5   :  { %7410 = vst [vmem:[#allocation201_spill] sm:$0xff] %v3737_v63  ;;  %v3752_v20 = vmax.f32 %v7413_v7, %v701_v43  ;;  %v7419_v7 = vld [vmem:[#allocation37_spill] sm:$0xff]  ;;  %v3802_v63 = vld [vmem:[#allocation2 + $0x14a] sm:$0xff] }
  0xe6   :  { %7415 = vst [vmem:[#allocation36_spill] sm:$0xff] %v3760_v61  ;;  %v7420_v36 = vmax.f32 %v7418_v60, %v7419_v7  ;;  %v7425_v60 = vld [vmem:[#allocation40_spill] sm:$0xff]  ;;  %v3825_v61 = vld [vmem:[#allocation2 + $0xfb] sm:$0xff] }
  0xe7   :  { %7414 = vst [vmem:[#allocation32_spill] sm:$0xff] %v3752_v20 }
  0xe8   :  { %7416 = vst [vmem:[#allocation202_spill] sm:$0xff] %v3762_v33  ;;  %v3775_v20 = vmax.f32 %v7420_v36, %v702_v15  ;;  %v7424_v36 = vld [vmem:[#allocation38_spill] sm:$0xff] }
  0xe9   :  { %7417 = vst [vmem:[#allocation203_spill] sm:$0xff] %v3764_v46  ;;  %v7426_v7 = vmax.f32 %v7424_v36, %v7425_v60  ;;  %v3804_v46 = vld [vmem:[#allocation2 + $0xdb] sm:$0xff]  ;;  %v7429_v60 = vld [vmem:[#allocation39_spill] sm:$0xff] }
  0xea   :  { %7421 = vst [vmem:[#allocation33_spill] sm:$0xff] %v3775_v20  ;;  %v3823_v33 = vld [vmem:[#allocation2 + $0x15a] sm:$0xff] }
  0xeb   :  { %7422 = vst [vmem:[#allocation37_spill] sm:$0xff] %v3779_v57  ;;  %v3796_v20 = vmax.f32 %v7426_v7, %v703_v17  ;;  %v7430_v7 = vld [vmem:[#allocation41_spill] sm:$0xff]  ;;  %v7442_v17 = vmax.f32 %v3589_v51, %v3566_v18 }
  0xec   :  { %7423 = vst [vmem:[#allocation204_spill] sm:$0xff] %v3787_v40  ;;  %v7431_v43 = vmax.f32 %v7429_v60, %v7430_v7  ;;  %v3845_v40 = vld [vmem:[#allocation2 + $0x172] sm:$0xff]  ;;  %v3948_v57 = vld [vmem:[#allocation2 + $0x1da] sm:$0xff] }
  0xed   :  { %7427 = vst [vmem:[#allocation38_spill] sm:$0xff] %v3796_v20  ;;  %v3852_v36 = vmax.f32 %v629_v14, %v7442_v17  ;;  %v3854_v60 = vld [vmem:[#allocation2 + $0x10b] sm:$0xff]  ;;  %v3872_v14 = vld [vmem:[#allocation2 + $0x182] sm:$0xff] }
  0xee   :  { %7428 = vst [vmem:[#allocation40_spill] sm:$0xff] %v3808_v52  ;;  %v3819_v20 = vmax.f32 %v7431_v43, %v704_v38  ;;  %v7437_v38 = vmax.f32 %v3607_v59, %v3663_v19  ;;  %v7438_v43 = vld [vmem:[#allocation47_spill] sm:$0xff]  ;;  %v3856_v52 = vld [vmem:[#allocation2 + $0x113] sm:$0xff]  ;;  %v3858_v59 = vld [vmem:[#allocation2 + $0x11b] sm:$0xff] }
  0xef   :  { %7433 = vst [vmem:[#allocation41_spill] sm:$0xff] %v3821_v8  ;;  %v7439_v7 = vmax.f32 %v3022_v31, %v7438_v43  ;;  %v7447_v43 = vld [vmem:[#allocation43_spill] sm:$0xff]  ;;  %v4003_v8 = vld [vmem:[#allocation2 + $0x19b] sm:$0xff] }
  0xf0   :  { %7432 = vst [vmem:[#allocation39_spill] sm:$0xff] %v3819_v20  ;;  %v3843_v20 = vld [vmem:[#allocation2 + $0x16a] sm:$0xff] }
  0xf1   :  { %7434 = vst [vmem:[#allocation205_spill] sm:$0xff] %v3823_v33  ;;  %v3841_v15 = vmax.f32 %v7439_v7, %v7437_v38  ;;  %v7446_v38 = vmax.f32 %v3621_v3, %v3674_v41  ;;  %v7448_v7 = vld [vmem:[#allocation48_spill] sm:$0xff]  ;;  %v3906_v3 = vld [vmem:[#allocation2 + $0x143] sm:$0xff] }
  0xf2   :  { %7435 = vst [vmem:[#allocation206_spill] sm:$0xff] %v3825_v61  ;;  %v7449_v18 = vmax.f32 %v7447_v43, %v7448_v7  ;;  %v3874_v17 = vld [vmem:[#allocation2 + $0x18a] sm:$0xff]  ;;  %v3882_v61 = vld [vmem:[#allocation2 + $0x133] sm:$0xff]  ;;  %v7455_v43 = vmax.f32 %v3623_v54, %v3676_v50  ;;  %v3930_v50 = vld [vmem:[#allocation2 + $0x15b] sm:$0xff]  ;;  %v7478_v54 = vmax.f32 %v3591_v32, %v3571_v49 }
  0xf3   :  { %7436 = vst [vmem:[#allocation207_spill] sm:$0xff] %v3827_v1  ;;  %v3880_v31 = vld [vmem:[#allocation2 + $0x12b] sm:$0xff]  ;;  %v3898_v1 = vld [vmem:[#allocation2 + $0x1a2] sm:$0xff] }
  0xf4   :  { %7440 = vst [vmem:[#allocation47_spill] sm:$0xff] %v3841_v15  ;;  %v3870_v51 = vmax.f32 %v7449_v18, %v7446_v38  ;;  %v3876_v15 = vld [vmem:[#allocation2 + $0x192] sm:$0xff]  ;;  %v4001_v33 = vld [vmem:[#allocation2 + $0x202] sm:$0xff] }
  0xf5   :  { %7441 = vst [vmem:[#allocation208_spill] sm:$0xff] %v3847_v62  ;;  %v7456_v7 = vld [vmem:[#allocation44_spill] sm:$0xff]  ;;  %v7457_v18 = vld [vmem:[#allocation49_spill] sm:$0xff] }
  0xf6   :  { %7443 = vst [vmem:[#allocation209_spill] sm:$0xff] %v3852_v36  ;;  %v7458_v19 = vmax.f32 %v7456_v7, %v7457_v18  ;;  %v3908_v38 = vld [vmem:[#allocation2 + $0x14b] sm:$0xff]  ;;  %v7465_v7 = vld [vmem:[#allocation50_spill] sm:$0xff] }
  0xf7   :  { %7444 = vst [vmem:[#allocation210_spill] sm:$0xff] %v3854_v60  ;;  %v3904_v60 = vld [vmem:[#allocation2 + $0x13b] sm:$0xff]  ;;  %v3922_v41 = vld [vmem:[#allocation2 + $0x1b2] sm:$0xff] }
  0xf8   :  { %7445 = vst [vmem:[#allocation211_spill] sm:$0xff] %v3858_v59  ;;  %v3924_v36 = vld [vmem:[#allocation2 + $0x1ba] sm:$0xff] }
  0xf9   :  { %7450 = vst [vmem:[#allocation43_spill] sm:$0xff] %v3870_v51  ;;  %v3896_v51 = vmax.f32 %v7458_v19, %v7455_v43  ;;  %v7463_v19 = vmax.f32 %v3627_v27, %v3697_v34  ;;  %v7464_v43 = vld [vmem:[#allocation45_spill] sm:$0xff]  ;;  %v3955_v27 = vld [vmem:[#allocation2 + $0x16b] sm:$0xff] }
  0xfa   :  { %7451 = vst [vmem:[#allocation48_spill] sm:$0xff] %v3876_v15  ;;  %v7466_v18 = vmax.f32 %v7464_v43, %v7465_v7  ;;  %v3928_v59 = vld [vmem:[#allocation2 + $0x153] sm:$0xff]  ;;  %v7472_v43 = vld [vmem:[#allocation51_spill] sm:$0xff] }
  0xfb   :  { %7452 = vst [vmem:[#allocation212_spill] sm:$0xff] %v3878_v23  ;;  %v643_v23 = vld [vmem:[#allocation2 + $0x163] sm:$0xff]  ;;  %v3957_v34 = vld [vmem:[#allocation2 + $0x173] sm:$0xff]  ;;  %v4055_v15 = vld [vmem:[#allocation2 + $0x1cb] sm:$0xff] }
  0xfc   :  { %7453 = vst [vmem:[#allocation213_spill] sm:$0xff] %v3880_v31  ;;  %v3926_v31 = vld [vmem:[#allocation2 + $0x1c2] sm:$0xff]  ;;  %v4025_v62 = vld [vmem:[#allocation2 + $0x21a] sm:$0xff] }
  0xfd   :  { %7454 = vst [vmem:[#allocation214_spill] sm:$0xff] %v3882_v61  ;;  %v7473_v7 = vld [vmem:[#allocation55_spill] sm:$0xff] }
  0xfe   :  { %7459 = vst [vmem:[#allocation44_spill] sm:$0xff] %v3896_v51  ;;  %v3920_v51 = vmax.f32 %v7466_v18, %v7463_v19  ;;  %v7471_v19 = vmax.f32 %v3629_v22, %v3699_v53  ;;  %v7474_v18 = vmax.f32 %v7472_v43, %v7473_v7  ;;  %v3946_v61 = vld [vmem:[#allocation2 + $0x1ca] sm:$0xff] }
  0xff   :  { %7460 = vst [vmem:[#allocation49_spill] sm:$0xff] %v3900_v58  ;;  %v7483_v43 = vld [vmem:[#allocation52_spill] sm:$0xff] }
 0x100   :  { %7461 = vst [vmem:[#allocation215_spill] sm:$0xff] %v3904_v60  ;;  %v3953_v60 = vmax.f32 %v643_v23, %v7478_v54  ;;  %v7484_v7 = vld [vmem:[#allocation56_spill] sm:$0xff]  ;;  %v3973_v23 = vld [vmem:[#allocation2 + $0x1e2] sm:$0xff] }
 0x101   :  { %7462 = vst [vmem:[#allocation216_spill] sm:$0xff] %v3908_v38  ;;  %v3959_v38 = vld [vmem:[#allocation2 + $0x17b] sm:$0xff]  ;;  %v7485_v49 = vmax.f32 %v7483_v43, %v7484_v7  ;;  %v3975_v54 = vld [vmem:[#allocation2 + $0x1ea] sm:$0xff]  ;;  %v7489_v43 = vmax.f32 %v3641_v42, %v3718_v9  ;;  %v4075_v58 = vld [vmem:[#allocation2 + $0x252] sm:$0xff] }
 0x102   :  { %7467 = vst [vmem:[#allocation45_spill] sm:$0xff] %v3920_v51  ;;  %v3944_v51 = vmax.f32 %v7474_v18, %v7471_v19  ;;  %v7482_v19 = vmax.f32 %v3631_v21, %v3701_v11  ;;  %v3977_v18 = vld [vmem:[#allocation2 + $0x1f2] sm:$0xff]  ;;  %v4005_v21 = vld [vmem:[#allocation2 + $0x1a3] sm:$0xff]  ;;  %v4033_v42 = vld [vmem:[#allocation2 + $0x1bb] sm:$0xff] }
 0x103   :  { %7468 = vst [vmem:[#allocation50_spill] sm:$0xff] %v3926_v31  ;;  %v3981_v22 = vld [vmem:[#allocation2 + $0x18b] sm:$0xff]  ;;  %v7490_v7 = vld [vmem:[#allocation53_spill] sm:$0xff]  ;;  %v4128_v31 = vld [vmem:[#allocation2 + $0x282] sm:$0xff] }
 0x104   :  { %7469 = vst [vmem:[#allocation217_spill] sm:$0xff] %v3928_v59  ;;  %v3971_v32 = vmax.f32 %v7485_v49, %v7482_v19  ;;  %v3983_v59 = vld [vmem:[#allocation2 + $0x193] sm:$0xff]  ;;  %v4007_v11 = vld [vmem:[#allocation2 + $0x1ab] sm:$0xff] }
 0x105   :  { %7470 = vst [vmem:[#allocation218_spill] sm:$0xff] %v3930_v50  ;;  %v7491_v49 = vld [vmem:[#allocation57_spill] sm:$0xff]  ;;  %v4049_v9 = vld [vmem:[#allocation2 + $0x22a] sm:$0xff] }
 0x106   :  { %7475 = vst [vmem:[#allocation51_spill] sm:$0xff] %v3944_v51  ;;  %v3979_v51 = vld [vmem:[#allocation2 + $0x183] sm:$0xff]  ;;  %v7492_v53 = vmax.f32 %v7490_v7, %v7491_v49  ;;  %v3999_v50 = vld [vmem:[#allocation2 + $0x1fa] sm:$0xff] }
 0x107   :  { %7476 = vst [vmem:[#allocation55_spill] sm:$0xff] %v3946_v61  ;;  %v7501_v7 = vld [vmem:[#allocation58_spill] sm:$0xff]  ;;  %v4031_v19 = vld [vmem:[#allocation2 + $0x1b3] sm:$0xff] }
 0x108   :  { %7477 = vst [vmem:[#allocation219_spill] sm:$0xff] %v3948_v57  ;;  %v4126_v61 = vld [vmem:[#allocation2 + $0x272] sm:$0xff] }
 0x109   :  { %7479 = vst [vmem:[#allocation220_spill] sm:$0xff] %v3953_v60  ;;  %v4051_v60 = vld [vmem:[#allocation2 + $0x232] sm:$0xff] }
 0x10a   :  { %7480 = vst [vmem:[#allocation221_spill] sm:$0xff] %v3957_v34  ;;  %v4027_v34 = vld [vmem:[#allocation2 + $0x222] sm:$0xff] }
 0x10b   :  { %7481 = vst [vmem:[#allocation222_spill] sm:$0xff] %v3959_v38  ;;  %v4023_v38 = vld [vmem:[#allocation2 + $0x212] sm:$0xff] }
 0x10c   :  { %7486 = vst [vmem:[#allocation52_spill] sm:$0xff] %v3971_v32  ;;  %v3997_v32 = vmax.f32 %v7492_v53, %v7489_v43  ;;  %v7499_v53 = vmax.f32 %v3643_v5, %v3720_v13  ;;  %v7500_v43 = vld [vmem:[#allocation54_spill] sm:$0xff]  ;;  %v657_v5 = vld [vmem:[#allocation2 + $0x1d3] sm:$0xff]  ;;  %v7523_v13 = vmax.f32 %v3593_v30, %v3576_v12 }
 0x10d   :  { %7487 = vst [vmem:[#allocation56_spill] sm:$0xff] %v3977_v18  ;;  %v7502_v49 = vmax.f32 %v7500_v43, %v7501_v7  ;;  %v7508_v43 = vld [vmem:[#allocation59_spill] sm:$0xff] }
 0x10e   :  { %7488 = vst [vmem:[#allocation223_spill] sm:$0xff] %v3983_v59  ;;  %v4035_v59 = vld [vmem:[#allocation2 + $0x1c3] sm:$0xff] }
 0x10f   :  { %7493 = vst [vmem:[#allocation53_spill] sm:$0xff] %v3997_v32  ;;  %v4021_v32 = vmax.f32 %v7502_v49, %v7499_v53  ;;  %v7507_v53 = vmax.f32 %v3651_v2, %v3739_v10  ;;  %v7509_v7 = vld [vmem:[#allocation63_spill] sm:$0xff] }
 0x110   :  { %7494 = vst [vmem:[#allocation57_spill] sm:$0xff] %v3999_v50  ;;  %v7510_v49 = vmax.f32 %v7508_v43, %v7509_v7  ;;  %v7518_v43 = vld [vmem:[#allocation60_spill] sm:$0xff]  ;;  %v4082_v2 = vld [vmem:[#allocation2 + $0x1e3] sm:$0xff] }
 0x111   :  { %7495 = vst [vmem:[#allocation224_spill] sm:$0xff] %v4001_v33  ;;  %v7519_v7 = vld [vmem:[#allocation64_spill] sm:$0xff]  ;;  %v671_v50 = vld [vmem:[#allocation2 + $0x243] sm:$0xff] }
 0x112   :  { %7496 = vst [vmem:[#allocation225_spill] sm:$0xff] %v4003_v8  ;;  %v4053_v8 = vld [vmem:[#allocation2 + $0x23a] sm:$0xff]  ;;  %v4084_v10 = vld [vmem:[#allocation2 + $0x1eb] sm:$0xff] }
 0x113   :  { %7497 = vst [vmem:[#allocation226_spill] sm:$0xff] %v4005_v21  ;;  %v4057_v21 = vld [vmem:[#allocation2 + $0x1db] sm:$0xff]  ;;  %v4178_v33 = vld [vmem:[#allocation2 + $0x2aa] sm:$0xff] }
 0x114   :  { %7498 = vst [vmem:[#allocation227_spill] sm:$0xff] %v4007_v11  ;;  %v4073_v11 = vld [vmem:[#allocation2 + $0x24a] sm:$0xff] }
 0x115   :  { %7503 = vst [vmem:[#allocation54_spill] sm:$0xff] %v4021_v32  ;;  %v4047_v32 = vmax.f32 %v7510_v49, %v7507_v53  ;;  %v7517_v53 = vmax.f32 %v3653_v29, %v3741_v37  ;;  %v7520_v49 = vmax.f32 %v7518_v43, %v7519_v7  ;;  %v7529_v43 = vld [vmem:[#allocation61_spill] sm:$0xff]  ;;  %v4108_v29 = vld [vmem:[#allocation2 + $0x203] sm:$0xff] }
 0x116   :  { %7504 = vst [vmem:[#allocation58_spill] sm:$0xff] %v4027_v34  ;;  %v7530_v7 = vld [vmem:[#allocation65_spill] sm:$0xff]  ;;  %v7540_v37 = vld [vmem:[#allocation62_spill] sm:$0xff]  ;;  %v4202_v34 = vld [vmem:[#allocation2 + $0x2ca] sm:$0xff] }
 0x117   :  { %7505 = vst [vmem:[#allocation228_spill] sm:$0xff] %v4031_v19  ;;  %v4080_v19 = vmax.f32 %v657_v5, %v7523_v13  ;;  %v7531_v12 = vmax.f32 %v7529_v43, %v7530_v7  ;;  %v4100_v5 = vld [vmem:[#allocation2 + $0x25a] sm:$0xff]  ;;  %v4102_v13 = vld [vmem:[#allocation2 + $0x262] sm:$0xff]  ;;  %v7538_v7 = vld [vmem:[#allocation36_spill] sm:$0xff] }
 0x118   :  { %7506 = vst [vmem:[#allocation229_spill] sm:$0xff] %v4035_v59  ;;  %v4086_v59 = vld [vmem:[#allocation2 + $0x1f3] sm:$0xff]  ;;  %v7537_v43 = vld [vmem:[#allocation198_spill] sm:$0xff] }
 0x119   :  { %7511 = vst [vmem:[#allocation59_spill] sm:$0xff] %v4047_v32  ;;  %v4071_v32 = vmax.f32 %v7520_v49, %v7517_v53  ;;  %v7528_v53 = vmax.f32 %v3655_v25, %v3743_v24  ;;  %v4104_v49 = vld [vmem:[#allocation2 + $0x26a] sm:$0xff]  ;;  %v4134_v25 = vld [vmem:[#allocation2 + $0x21b] sm:$0xff] }
 0x11a   :  { %7512 = vst [vmem:[#allocation63_spill] sm:$0xff] %v4049_v9  ;;  %v4150_v24 = vld [vmem:[#allocation2 + $0x28a] sm:$0xff]  ;;  %v4233_v9 = vld [vmem:[#allocation2 + $0x273] sm:$0xff] }
 0x11b   :  { %7513 = vst [vmem:[#allocation230_spill] sm:$0xff] %v4051_v60  ;;  %v4098_v30 = vmax.f32 %v7531_v12, %v7528_v53  ;;  %v7539_v12 = vmax.f32 %v7537_v43, %v7538_v7  ;;  %v4136_v53 = vld [vmem:[#allocation2 + $0x223] sm:$0xff]  ;;  %v4158_v43 = vld [vmem:[#allocation2 + $0x233] sm:$0xff] }
 0x11c   :  { %7514 = vst [vmem:[#allocation231_spill] sm:$0xff] %v4053_v8  ;;  %v7583_v8 = vld [vmem:[#allocation76_spill] sm:$0xff]  ;;  %v4231_v60 = vld [vmem:[#allocation2 + $0x2e2] sm:$0xff] }
 0x11d   :  { %7515 = vst [vmem:[#allocation232_spill] sm:$0xff] %v4055_v15  ;;  %v4110_v15 = vld [vmem:[#allocation2 + $0x20b] sm:$0xff] }
 0x11e   :  { %7516 = vst [vmem:[#allocation233_spill] sm:$0xff] %v4057_v21 }
 0x11f   :  { %7521 = vst [vmem:[#allocation60_spill] sm:$0xff] %v4071_v32  ;;  %v4106_v32 = vld [vmem:[#allocation2 + $0x1fb] sm:$0xff] }
 0x120   :  { %7522 = vst [vmem:[#allocation64_spill] sm:$0xff] %v4075_v58  ;;  %v4255_v58 = vld [vmem:[#allocation2 + $0x2fa] sm:$0xff] }
 0x121   :  { %7524 = vst [vmem:[#allocation234_spill] sm:$0xff] %v4080_v19  ;;  %v4152_v19 = vld [vmem:[#allocation2 + $0x292] sm:$0xff] }
 0x122   :  { %7525 = vst [vmem:[#allocation235_spill] sm:$0xff] %v4082_v2  ;;  %v4132_v2 = vld [vmem:[#allocation2 + $0x213] sm:$0xff] }
 0x123   :  { %7526 = vst [vmem:[#allocation236_spill] sm:$0xff] %v4084_v10  ;;  %v4156_v10 = vld [vmem:[#allocation2 + $0x22b] sm:$0xff] }
 0x124   :  { %7527 = vst [vmem:[#allocation237_spill] sm:$0xff] %v4086_v59 }
 0x125   :  { %7532 = vst [vmem:[#allocation61_spill] sm:$0xff] %v4098_v30  ;;  %v7541_v30 = vld [vmem:[#allocation66_spill] sm:$0xff] }
 0x126   :  { %7533 = vst [vmem:[#allocation65_spill] sm:$0xff] %v4104_v49  ;;  %v7542_v21 = vmax.f32 %v7540_v37, %v7541_v30  ;;  %v7548_v37 = vld [vmem:[#allocation199_spill] sm:$0xff]  ;;  %v7549_v30 = vld [vmem:[#allocation202_spill] sm:$0xff] }
 0x127   :  { %7534 = vst [vmem:[#allocation238_spill] sm:$0xff] %v4106_v32  ;;  %v7550_v7 = vmax.f32 %v7548_v37, %v7549_v30  ;;  %v4160_v32 = vld [vmem:[#allocation2 + $0x23b] sm:$0xff]  ;;  %v7558_v30 = vmax.f32 %v3689_v28, %v3783_v16  ;;  %v4180_v37 = vld [vmem:[#allocation2 + $0x24b] sm:$0xff] }
 0x128   :  { %7535 = vst [vmem:[#allocation239_spill] sm:$0xff] %v4108_v29  ;;  %v4124_v57 = vmax.f32 %v7542_v21, %v7539_v12  ;;  %v7551_v12 = vld [vmem:[#allocation67_spill] sm:$0xff]  ;;  %v4209_v28 = vld [vmem:[#allocation2 + $0x25b] sm:$0xff] }
 0x129   :  { %7536 = vst [vmem:[#allocation240_spill] sm:$0xff] %v4110_v15  ;;  %v4154_v15 = vld [vmem:[#allocation2 + $0x29a] sm:$0xff]  ;;  %v4176_v29 = vld [vmem:[#allocation2 + $0x2a2] sm:$0xff] }
 0x12a   :  { %7543 = vst [vmem:[#allocation198_spill] sm:$0xff] %v4124_v57  ;;  %v7552_v57 = vld [vmem:[#allocation69_spill] sm:$0xff] }
 0x12b   :  { %7544 = vst [vmem:[#allocation36_spill] sm:$0xff] %v4126_v61  ;;  %v7553_v59 = vmax.f32 %v7551_v12, %v7552_v57  ;;  %v7560_v12 = vld [vmem:[#allocation70_spill] sm:$0xff]  ;;  %v7610_v61 = vld [vmem:[#allocation195_spill] sm:$0xff] }
 0x12c   :  { %7545 = vst [vmem:[#allocation62_spill] sm:$0xff] %v4128_v31 }
 0x12d   :  { %7546 = vst [vmem:[#allocation66_spill] sm:$0xff] %v4132_v2  ;;  %v4148_v18 = vmax.f32 %v7553_v59, %v7550_v7  ;;  %v7559_v7 = vld [vmem:[#allocation68_spill] sm:$0xff]  ;;  %v7572_v59 = vld [vmem:[#allocation194_spill] sm:$0xff] }
 0x12e   :  { %7547 = vst [vmem:[#allocation241_spill] sm:$0xff] %v4136_v53  ;;  %v7561_v21 = vmax.f32 %v7559_v7, %v7560_v12  ;;  %v4182_v2 = vld [vmem:[#allocation2 + $0x253] sm:$0xff]  ;;  %v7568_v7 = vld [vmem:[#allocation75_spill] sm:$0xff] }
 0x12f   :  { %7554 = vst [vmem:[#allocation199_spill] sm:$0xff] %v4148_v18  ;;  %v4200_v53 = vld [vmem:[#allocation2 + $0x2c2] sm:$0xff] }
 0x130   :  { %7555 = vst [vmem:[#allocation202_spill] sm:$0xff] %v4156_v10  ;;  %v4174_v18 = vmax.f32 %v7561_v21, %v7558_v30  ;;  %v7566_v21 = vmax.f32 %v3691_v26, %v3785_v44  ;;  %v7567_v30 = vld [vmem:[#allocation71_spill] sm:$0xff]  ;;  %v7573_v10 = vld [vmem:[#allocation193_spill] sm:$0xff] }
 0x131   :  { %7556 = vst [vmem:[#allocation67_spill] sm:$0xff] %v4158_v43  ;;  %v7569_v12 = vmax.f32 %v7567_v30, %v7568_v7  ;;  %v7574_v16 = vmax.f32 %v7572_v59, %v7573_v10  ;;  %v4213_v26 = vld [vmem:[#allocation2 + $0x26b] sm:$0xff]  ;;  %v7579_v30 = vld [vmem:[#allocation29_spill] sm:$0xff] }
 0x132   :  { %7557 = vst [vmem:[#allocation69_spill] sm:$0xff] %v4160_v32  ;;  %v4211_v32 = vld [vmem:[#allocation2 + $0x263] sm:$0xff]  ;;  %v7580_v7 = vld [vmem:[#allocation204_spill] sm:$0xff]  ;;  %v4235_v44 = vld [vmem:[#allocation2 + $0x27b] sm:$0xff] }
 0x133   :  { %7562 = vst [vmem:[#allocation68_spill] sm:$0xff] %v4174_v18  ;;  %v4196_v57 = vmax.f32 %v7569_v12, %v7566_v21  ;;  %v4198_v18 = vld [vmem:[#allocation2 + $0x2ba] sm:$0xff]  ;;  %v4207_v43 = vmax.f32 %v671_v50, %v7574_v16  ;;  %v7581_v12 = vmax.f32 %v7579_v30, %v7580_v7  ;;  %v4227_v59 = vld [vmem:[#allocation2 + $0x2d2] sm:$0xff]  ;;  %v7589_v7 = vmax.f32 %v3712_v48, %v3804_v46  ;;  %v4277_v30 = vld [vmem:[#allocation2 + $0x302] sm:$0xff] }
 0x134   :  { %7563 = vst [vmem:[#allocation70_spill] sm:$0xff] %v4178_v33  ;;  %v4229_v16 = vld [vmem:[#allocation2 + $0x2da] sm:$0xff] }
 0x135   :  { %7564 = vst [vmem:[#allocation242_spill] sm:$0xff] %v4180_v37  ;;  %v4237_v37 = vld [vmem:[#allocation2 + $0x283] sm:$0xff]  ;;  %v685_v46 = vld [vmem:[#allocation2 + $0x2b3] sm:$0xff]  ;;  %v4304_v48 = vld [vmem:[#allocation2 + $0x2bb] sm:$0xff] }
 0x136   :  { %7565 = vst [vmem:[#allocation243_spill] sm:$0xff] %v4182_v2  ;;  %v4253_v2 = vld [vmem:[#allocation2 + $0x2f2] sm:$0xff] }
 0x137   :  { %7570 = vst [vmem:[#allocation71_spill] sm:$0xff] %v4196_v57  ;;  %v7582_v57 = vld [vmem:[#allocation72_spill] sm:$0xff] }
 0x138   :  { %7571 = vst [vmem:[#allocation75_spill] sm:$0xff] %v4202_v34  ;;  %v7584_v10 = vmax.f32 %v7582_v57, %v7583_v8  ;;  %v4261_v8 = vld [vmem:[#allocation2 + $0x293] sm:$0xff]  ;;  %v4263_v57 = vld [vmem:[#allocation2 + $0x29b] sm:$0xff]  ;;  %v696_v34 = vld [vmem:[#allocation2 + $0x30b] sm:$0x1f] }
 0x139   :  { %7575 = vst [vmem:[#allocation194_spill] sm:$0xff] %v4207_v43  ;;  %v4279_v43 = vld [vmem:[#allocation2 + $0x30a] sm:$0x1f]  ;;  %v4344_v33 = vld [vmem:[#allocation2 + $0x2f3] sm:$0xff] }
 0x13a   :  { %7576 = vst [vmem:[#allocation193_spill] sm:$0xff] %v4209_v28  ;;  %v4225_v50 = vmax.f32 %v7584_v10, %v7581_v12  ;;  %v7590_v12 = vld [vmem:[#allocation73_spill] sm:$0xff]  ;;  %v4259_v28 = vld [vmem:[#allocation2 + $0x28b] sm:$0xff] }
 0x13b   :  { %7577 = vst [vmem:[#allocation244_spill] sm:$0xff] %v4211_v32  ;;  %v7591_v10 = vld [vmem:[#allocation77_spill] sm:$0xff] }
 0x13c   :  { %7578 = vst [vmem:[#allocation245_spill] sm:$0xff] %v4213_v26  ;;  %v7592_v21 = vmax.f32 %v7590_v12, %v7591_v10  ;;  %v7597_v12 = vld [vmem:[#allocation78_spill] sm:$0xff]  ;;  %v4283_v26 = vld [vmem:[#allocation2 + $0x2ab] sm:$0xff] }
 0x13d   :  { %7585 = vst [vmem:[#allocation29_spill] sm:$0xff] %v4225_v50 }
 0x13e   :  { %7586 = vst [vmem:[#allocation204_spill] sm:$0xff] %v4233_v9  ;;  %v4251_v50 = vmax.f32 %v7592_v21, %v7589_v7  ;;  %v7595_v21 = vmax.f32 %v3714_v39, %v3806_v6  ;;  %v7596_v7 = vld [vmem:[#allocation74_spill] sm:$0xff]  ;;  %v7609_v9 = vld [vmem:[#allocation196_spill] sm:$0xff] }
 0x13f   :  { %7587 = vst [vmem:[#allocation72_spill] sm:$0xff] %v4235_v44  ;;  %v7598_v10 = vmax.f32 %v7596_v7, %v7597_v12  ;;  %v4281_v44 = vld [vmem:[#allocation2 + $0x2a3] sm:$0xff]  ;;  %v7603_v7 = vld [vmem:[#allocation40_spill] sm:$0xff]  ;;  %v7611_v49 = vmax.f32 %v7609_v9, %v7610_v61 }
 0x140   :  { %7588 = vst [vmem:[#allocation76_spill] sm:$0xff] %v4237_v37  ;;  %v4308_v6 = vld [vmem:[#allocation2 + $0x2cb] sm:$0xff] }
 0x141   :  { %7593 = vst [vmem:[#allocation73_spill] sm:$0xff] %v4251_v50  ;;  %v4275_v50 = vmax.f32 %v7598_v10, %v7595_v21  ;;  %v7602_v21 = vld [vmem:[#allocation34_spill] sm:$0xff]  ;;  %v7605_v10 = vld [vmem:[#allocation79_spill] sm:$0xff]  ;;  %v4302_v32 = vmax.f32 %v685_v46, %v7611_v49  ;;  %v4322_v49 = vld [vmem:[#allocation2 + $0x2d3] sm:$0xff] }
 0x142   :  { %7594 = vst [vmem:[#allocation77_spill] sm:$0xff] %v4259_v28  ;;  %v7604_v12 = vmax.f32 %v7602_v21, %v7603_v7  ;;  %v4306_v28 = vld [vmem:[#allocation2 + $0x2c3] sm:$0xff]  ;;  %v7615_v7 = vld [vmem:[#allocation80_spill] sm:$0xff]  ;;  %v4324_v46 = vld [vmem:[#allocation2 + $0x2db] sm:$0xff]  ;;  %v787_v21 = vmax.f32 %v4227_v59, %v4322_v49  ;;  %v791_v59 = vmax.f32 %v4253_v2, %v4344_v33 }
 0x143   :  { %7599 = vst [vmem:[#allocation74_spill] sm:$0xff] %v4275_v50  ;;  %v7606_v50 = vld [vmem:[#allocation83_spill] sm:$0xff]  ;;  %v7633_v49 = vld [vmem:[#allocation90_spill] sm:$0xff] }
 0x144   :  { %7600 = vst [vmem:[#allocation78_spill] sm:$0xff] %v4281_v44  ;;  %v7607_v37 = vmax.f32 %v7605_v10, %v7606_v50  ;;  %v4326_v10 = vld [vmem:[#allocation2 + $0x2e3] sm:$0xff]  ;;  %v4346_v44 = vld [vmem:[#allocation2 + $0x2fb] sm:$0xff] }
 0x145   :  { %7601 = vst [vmem:[#allocation246_spill] sm:$0xff] %v4283_v26  ;;  %v4342_v26 = vld [vmem:[#allocation2 + $0x2eb] sm:$0xff] }
 0x146   :  { %v4297_v31 = vmax.f32 %v7607_v37, %v7604_v12  ;;  %7612 = vst [vmem:[#allocation40_spill] sm:$0xff] %v4308_v6  ;;  %v7613_v37 = vld [vmem:[#allocation206_spill] sm:$0xff]  ;;  %v7616_v12 = vld [vmem:[#allocation84_spill] sm:$0xff]  ;;  %v7638_v33 = vld [vmem:[#allocation91_spill] sm:$0xff] }
 0x147   :  { %v7614_v50 = vmax.f32 %v3733_v35, %v7613_v37  ;;  %v7617_v61 = vmax.f32 %v7615_v7, %v7616_v12  ;;  %v7619_v37 = vld [vmem:[#allocation35_spill] sm:$0xff]  ;;  %v7623_v12 = vld [vmem:[#allocation85_spill] sm:$0xff]  ;;  %v788_v35 = vmax.f32 %v4229_v16, %v4324_v46  ;;  %v792_v16 = vmax.f32 %v4255_v58, %v4346_v44  ;;  %v7641_v58 = vld [vmem:[#allocation212_spill] sm:$0xff] }
 0x148   :  { %7608 = vst [vmem:[#allocation34_spill] sm:$0xff] %v4297_v31  ;;  %v7620_v31 = vld [vmem:[#allocation207_spill] sm:$0xff]  ;;  %v7644_v44 = vld [vmem:[#allocation92_spill] sm:$0xff] }
 0x149   :  { %v4320_v9 = vmax.f32 %v7617_v61, %v7614_v50  ;;  %v7621_v7 = vmax.f32 %v7619_v37, %v7620_v31  ;;  %v7622_v50 = vld [vmem:[#allocation81_spill] sm:$0xff]  ;;  %v789_v31 = vmax.f32 %v4231_v60, %v4326_v10  ;;  %v7626_v37 = vld [vmem:[#allocation210_spill] sm:$0xff]  ;;  %v7631_v60 = vmax.f32 %v3756_v45, %v3856_v52 }
 0x14a   :  { %v7624_v61 = vmax.f32 %v7622_v50, %v7623_v12  ;;  %v7627_v50 = vmax.f32 %v3754_v0, %v7626_v37  ;;  %v7629_v12 = vld [vmem:[#allocation86_spill] sm:$0xff]  ;;  %v7632_v0 = vld [vmem:[#allocation87_spill] sm:$0xff]  ;;  %v7642_v52 = vmax.f32 %v3777_v47, %v7641_v58  ;;  %v7643_v45 = vld [vmem:[#allocation89_spill] sm:$0xff]  ;;  %v7660_v58 = vmax.f32 %v3800_v4, %v3906_v3 }
 0x14b   :  { %7618 = vst [vmem:[#allocation79_spill] sm:$0xff] %v4320_v9  ;;  %v695_v6 = vld [vmem:[#allocation2 + $0x303] sm:$0xff]  ;;  %v7634_v46 = vmax.f32 %v7632_v0, %v7633_v49  ;;  %v7645_v0 = vmax.f32 %v7643_v45, %v7644_v44  ;;  %v7647_v49 = vld [vmem:[#allocation37_spill] sm:$0xff] }
 0x14c   :  { %v4340_v9 = vmax.f32 %v7624_v61, %v7621_v7  ;;  %v7628_v7 = vld [vmem:[#allocation82_spill] sm:$0xff]  ;;  %v793_v37 = vmax.f32 %v4277_v30, %v695_v6  ;;  %v7678_v3 = vld [vmem:[#allocation205_spill] sm:$0xff] }
 0x14d   :  { %v7630_v61 = vmax.f32 %v7628_v7, %v7629_v12  ;;  %v4374_v10 = vmax.f32 %v7634_v46, %v7631_v60  ;;  %v7635_v7 = vld [vmem:[#allocation211_spill] sm:$0xff]  ;;  %v4392_v60 = vmax.f32 %v7645_v0, %v7642_v52  ;;  %v7648_v30 = vld [vmem:[#allocation214_spill] sm:$0xff] }
 0x14e   :  { %7625 = vst [vmem:[#allocation83_spill] sm:$0xff] %v4340_v9  ;;  %v7636_v12 = vmax.f32 %v3758_v56, %v7635_v7  ;;  %v7649_v6 = vmax.f32 %v7647_v49, %v7648_v30  ;;  %v7654_v7 = vld [vmem:[#allocation215_spill] sm:$0xff]  ;;  %v7662_v45 = vld [vmem:[#allocation98_spill] sm:$0xff]  ;;  %v7665_v49 = vld [vmem:[#allocation216_spill] sm:$0xff] }
 0x14f   :  { %v4360_v39 = vmax.f32 %v7630_v61, %v7627_v50  ;;  %v794_v50 = vmax.f32 %v4279_v43, %v696_v34  ;;  %v7637_v61 = vld [vmem:[#allocation88_spill] sm:$0xff]  ;;  %7646 = vst [vmem:[#allocation195_spill] sm:$0xff] %v4392_v60  ;;  %v7650_v34 = vld [vmem:[#allocation93_spill] sm:$0xff]  ;;  %v7661_v52 = vld [vmem:[#allocation95_spill] sm:$0xff]  ;;  %v7666_v30 = vmax.f32 %v3802_v63, %v7665_v49  ;;  %v7685_v49 = vmax.f32 %v3843_v20, %v3955_v27 }
 0x150   :  { %v7639_v2 = vmax.f32 %v7637_v61, %v7638_v33  ;;  %v7651_v43 = vld [vmem:[#allocation96_spill] sm:$0xff]  ;;  %v7656_v61 = vld [vmem:[#allocation94_spill] sm:$0xff]  ;;  %v7657_v33 = vld [vmem:[#allocation97_spill] sm:$0xff]  ;;  %v7663_v44 = vmax.f32 %v7661_v52, %v7662_v45  ;;  %v7702_v27 = vmax.f32 %v3872_v14, %v3979_v51 }
 0x151   :  { %v7652_v46 = vmax.f32 %v7650_v34, %v7651_v43  ;;  %v7668_v34 = vld [vmem:[#allocation103_spill] sm:$0xff]  ;;  %v7679_v52 = vld [vmem:[#allocation218_spill] sm:$0xff]  ;;  %v7681_v45 = vld [vmem:[#allocation101_spill] sm:$0xff] }
 0x152   :  { %v4384_v9 = vmax.f32 %v7639_v2, %v7636_v12  ;;  %v7655_v12 = vmax.f32 %v3798_v55, %v7654_v7  ;;  %v7658_v2 = vmax.f32 %v7656_v61, %v7657_v33  ;;  %v4416_v0 = vmax.f32 %v7663_v44, %v7660_v58  ;;  %v7672_v7 = vld [vmem:[#allocation217_spill] sm:$0xff]  ;;  %v7674_v61 = vld [vmem:[#allocation100_spill] sm:$0xff]  ;;  %v7718_v14 = vld [vmem:[#allocation226_spill] sm:$0xff] }
 0x153   :  { %v4400_v56 = vmax.f32 %v7652_v46, %v7649_v6  ;;  %v7667_v6 = vld [vmem:[#allocation99_spill] sm:$0xff]  ;;  %v7671_v46 = vld [vmem:[#allocation41_spill] sm:$0xff]  ;;  %v7675_v33 = vld [vmem:[#allocation104_spill] sm:$0xff]  ;;  %v7680_v58 = vmax.f32 %v7678_v3, %v7679_v52 }
 0x154   :  { %7640 = vst [vmem:[#allocation196_spill] sm:$0xff] %v4384_v9  ;;  %v4408_v47 = vmax.f32 %v7658_v2, %v7655_v12  ;;  %v7669_v43 = vmax.f32 %v7667_v6, %v7668_v34  ;;  %v7673_v12 = vmax.f32 %v7671_v46, %v7672_v7  ;;  %v7676_v2 = vmax.f32 %v7674_v61, %v7675_v33  ;;  %v7682_v44 = vld [vmem:[#allocation105_spill] sm:$0xff]  ;;  %v7687_v6 = vld [vmem:[#allocation106_spill] sm:$0xff]  ;;  %v7696_v3 = vld [vmem:[#allocation208_spill] sm:$0xff] }
 0x155   :  { %7653 = vst [vmem:[#allocation206_spill] sm:$0xff] %v4400_v56  ;;  %v7690_v46 = vld [vmem:[#allocation221_spill] sm:$0xff]  ;;  %v7693_v61 = vld [vmem:[#allocation110_spill] sm:$0xff] }
 0x156   :  { %7659 = vst [vmem:[#allocation80_spill] sm:$0xff] %v4408_v47  ;;  %v4424_v55 = vmax.f32 %v7669_v43, %v7666_v30  ;;  %v4432_v4 = vmax.f32 %v7676_v2, %v7673_v12  ;;  %v7686_v30 = vld [vmem:[#allocation102_spill] sm:$0xff]  ;;  %v7691_v7 = vmax.f32 %v3845_v40, %v7690_v46  ;;  %v7692_v12 = vld [vmem:[#allocation107_spill] sm:$0xff]  ;;  %v7707_v46 = vld [vmem:[#allocation113_spill] sm:$0xff] }
 0x157   :  { %7664 = vst [vmem:[#allocation84_spill] sm:$0xff] %v4416_v0  ;;  %v7683_v0 = vmax.f32 %v7681_v45, %v7682_v44  ;;  %v7688_v34 = vmax.f32 %v7686_v30, %v7687_v6  ;;  %v7694_v33 = vmax.f32 %v7692_v12, %v7693_v61  ;;  %v7697_v52 = vld [vmem:[#allocation222_spill] sm:$0xff]  ;;  %v7700_v45 = vld [vmem:[#allocation111_spill] sm:$0xff]  ;;  %v7704_v30 = vld [vmem:[#allocation112_spill] sm:$0xff] }
 0x158   :  { %7670 = vst [vmem:[#allocation35_spill] sm:$0xff] %v4424_v55 }
 0x159   :  { %7677 = vst [vmem:[#allocation207_spill] sm:$0xff] %v4432_v4  ;;  %v4440_v63 = vmax.f32 %v7683_v0, %v7680_v58  ;;  %v4448_v43 = vmax.f32 %v7688_v34, %v7685_v49  ;;  %v4456_v2 = vmax.f32 %v7694_v33, %v7691_v7  ;;  %v7698_v0 = vmax.f32 %v7696_v3, %v7697_v52  ;;  %v7699_v58 = vld [vmem:[#allocation108_spill] sm:$0xff]  ;;  %v7703_v49 = vld [vmem:[#allocation109_spill] sm:$0xff]  ;;  %v7712_v3 = vld [vmem:[#allocation223_spill] sm:$0xff] }
 0x15a   :  { %v7701_v44 = vmax.f32 %v7699_v58, %v7700_v45  ;;  %v7705_v6 = vmax.f32 %v7703_v49, %v7704_v30  ;;  %v7706_v34 = vmax.f32 %v3874_v17, %v3981_v22  ;;  %v7708_v7 = vld [vmem:[#allocation116_spill] sm:$0xff]  ;;  %v7715_v58 = vld [vmem:[#allocation117_spill] sm:$0xff]  ;;  %v7721_v49 = vld [vmem:[#allocation118_spill] sm:$0xff] }
 0x15b   :  { %7684 = vst [vmem:[#allocation81_spill] sm:$0xff] %v4440_v63  ;;  %v7709_v12 = vmax.f32 %v7707_v46, %v7708_v7  ;;  %v7711_v33 = vld [vmem:[#allocation48_spill] sm:$0xff]  ;;  %v7724_v22 = vld [vmem:[#allocation49_spill] sm:$0xff]  ;;  %v7727_v46 = vld [vmem:[#allocation119_spill] sm:$0xff] }
 0x15c   :  { %7689 = vst [vmem:[#allocation85_spill] sm:$0xff] %v4448_v43  ;;  %v4464_v20 = vmax.f32 %v7701_v44, %v7698_v0  ;;  %v4472_v40 = vmax.f32 %v7705_v6, %v7702_v27  ;;  %v7713_v52 = vmax.f32 %v7711_v33, %v7712_v3  ;;  %v7714_v0 = vld [vmem:[#allocation114_spill] sm:$0xff]  ;;  %v7719_v44 = vmax.f32 %v3898_v1, %v7718_v14  ;;  %v7720_v27 = vld [vmem:[#allocation115_spill] sm:$0xff]  ;;  %v7731_v3 = vld [vmem:[#allocation228_spill] sm:$0xff] }
 0x15d   :  { %7695 = vst [vmem:[#allocation210_spill] sm:$0xff] %v4456_v2  ;;  %v4480_v61 = vmax.f32 %v7709_v12, %v7706_v34  ;;  %v7716_v45 = vmax.f32 %v7714_v0, %v7715_v58  ;;  %v7722_v30 = vmax.f32 %v7720_v27, %v7721_v49  ;;  %v7725_v6 = vld [vmem:[#allocation227_spill] sm:$0xff]  ;;  %v7733_v0 = vld [vmem:[#allocation120_spill] sm:$0xff]  ;;  %v7737_v14 = vmax.f32 %v3924_v36, %v4033_v42  ;;  %v7739_v27 = vld [vmem:[#allocation125_spill] sm:$0xff] }
 0x15e   :  { %v7726_v34 = vmax.f32 %v7724_v22, %v7725_v6  ;;  %v7728_v7 = vld [vmem:[#allocation123_spill] sm:$0xff]  ;;  %v7734_v58 = vld [vmem:[#allocation124_spill] sm:$0xff]  ;;  %v7742_v22 = vld [vmem:[#allocation50_spill] sm:$0xff] }
 0x15f   :  { %7710 = vst [vmem:[#allocation82_spill] sm:$0xff] %v4480_v61  ;;  %v4488_v51 = vmax.f32 %v7716_v45, %v7713_v52  ;;  %v4496_v17 = vmax.f32 %v7722_v30, %v7719_v44  ;;  %v7729_v12 = vmax.f32 %v7727_v46, %v7728_v7  ;;  %v7732_v52 = vmax.f32 %v3922_v41, %v7731_v3  ;;  %v7738_v44 = vld [vmem:[#allocation121_spill] sm:$0xff]  ;;  %v7745_v46 = vld [vmem:[#allocation122_spill] sm:$0xff]  ;;  %v7749_v3 = vld [vmem:[#allocation55_spill] sm:$0xff] }
 0x160   :  { %v7735_v45 = vmax.f32 %v7733_v0, %v7734_v58  ;;  %v7740_v49 = vmax.f32 %v7738_v44, %v7739_v27  ;;  %v7743_v6 = vld [vmem:[#allocation229_spill] sm:$0xff]  ;;  %v7746_v7 = vld [vmem:[#allocation126_spill] sm:$0xff]  ;;  %v7750_v0 = vld [vmem:[#allocation232_spill] sm:$0xff] }
 0x161   :  { %7717 = vst [vmem:[#allocation86_spill] sm:$0xff] %v4488_v51  ;;  %v4504_v33 = vmax.f32 %v7729_v12, %v7726_v34  ;;  %v7744_v34 = vmax.f32 %v7742_v22, %v7743_v6  ;;  %v7747_v12 = vmax.f32 %v7745_v46, %v7746_v7  ;;  %v7752_v58 = vld [vmem:[#allocation127_spill] sm:$0xff]  ;;  %v7757_v44 = vld [vmem:[#allocation233_spill] sm:$0xff]  ;;  %v7759_v27 = vld [vmem:[#allocation128_spill] sm:$0xff] }
 0x162   :  { %7723 = vst [vmem:[#allocation87_spill] sm:$0xff] %v4496_v17  ;;  %v4512_v1 = vmax.f32 %v7735_v45, %v7732_v52  ;;  %v4520_v30 = vmax.f32 %v7740_v49, %v7737_v14  ;;  %v7751_v52 = vmax.f32 %v7749_v3, %v7750_v0  ;;  %v7753_v45 = vld [vmem:[#allocation131_spill] sm:$0xff]  ;;  %v7760_v49 = vld [vmem:[#allocation132_spill] sm:$0xff]  ;;  %v7765_v46 = vld [vmem:[#allocation129_spill] sm:$0xff] }
 0x163   :  { %7730 = vst [vmem:[#allocation90_spill] sm:$0xff] %v4504_v33  ;;  %v4528_v41 = vmax.f32 %v7747_v12, %v7744_v34  ;;  %v7756_v42 = vld [vmem:[#allocation219_spill] sm:$0xff]  ;;  %v7766_v7 = vld [vmem:[#allocation133_spill] sm:$0xff]  ;;  %v7769_v0 = vld [vmem:[#allocation236_spill] sm:$0xff] }
 0x164   :  { %7736 = vst [vmem:[#allocation211_spill] sm:$0xff] %v4512_v1  ;;  %v7754_v1 = vmax.f32 %v7752_v58, %v7753_v45  ;;  %v7758_v14 = vmax.f32 %v7756_v42, %v7757_v44  ;;  %v7763_v6 = vld [vmem:[#allocation235_spill] sm:$0xff]  ;;  %v7767_v12 = vmax.f32 %v7765_v46, %v7766_v7  ;;  %v7772_v58 = vld [vmem:[#allocation136_spill] sm:$0xff]  ;;  %v7781_v46 = vld [vmem:[#allocation238_spill] sm:$0xff] }
 0x165   :  { %7741 = vst [vmem:[#allocation88_spill] sm:$0xff] %v4520_v30  ;;  %v7761_v30 = vmax.f32 %v7759_v27, %v7760_v49  ;;  %v7764_v34 = vmax.f32 %v3973_v23, %v7763_v6  ;;  %v7774_v44 = vld [vmem:[#allocation56_spill] sm:$0xff]  ;;  %v7775_v27 = vld [vmem:[#allocation237_spill] sm:$0xff]  ;;  %v7783_v7 = vld [vmem:[#allocation135_spill] sm:$0xff] }
 0x166   :  { %7748 = vst [vmem:[#allocation91_spill] sm:$0xff] %v4528_v41  ;;  %v4536_v36 = vmax.f32 %v7754_v1, %v7751_v52  ;;  %v7770_v1 = vmax.f32 %v3975_v54, %v7769_v0  ;;  %v7771_v52 = vld [vmem:[#allocation130_spill] sm:$0xff]  ;;  %v7778_v49 = vld [vmem:[#allocation137_spill] sm:$0xff]  ;;  %v7787_v0 = vld [vmem:[#allocation224_spill] sm:$0xff] }
 0x167   :  { %v4544_v22 = vmax.f32 %v7761_v30, %v7758_v14  ;;  %v4552_v3 = vmax.f32 %v7767_v12, %v7764_v34  ;;  %v7773_v45 = vmax.f32 %v7771_v52, %v7772_v58  ;;  %v7776_v30 = vmax.f32 %v7774_v44, %v7775_v27  ;;  %v7777_v14 = vld [vmem:[#allocation134_spill] sm:$0xff]  ;;  %v7780_v6 = vld [vmem:[#allocation57_spill] sm:$0xff]  ;;  %v7788_v52 = vld [vmem:[#allocation239_spill] sm:$0xff] }
 0x168   :  { %7755 = vst [vmem:[#allocation212_spill] sm:$0xff] %v4536_v36  ;;  %v7779_v33 = vmax.f32 %v7777_v14, %v7778_v49  ;;  %v7782_v34 = vmax.f32 %v7780_v6, %v7781_v46  ;;  %v7784_v12 = vld [vmem:[#allocation138_spill] sm:$0xff]  ;;  %v7790_v58 = vld [vmem:[#allocation139_spill] sm:$0xff]  ;;  %v7801_v46 = vld [vmem:[#allocation141_spill] sm:$0xff] }
 0x169   :  { %7762 = vst [vmem:[#allocation89_spill] sm:$0xff] %v4544_v22  ;;  %v4560_v42 = vmax.f32 %v7773_v45, %v7770_v1  ;;  %v7785_v17 = vmax.f32 %v7783_v7, %v7784_v12  ;;  %v7789_v1 = vmax.f32 %v7787_v0, %v7788_v52  ;;  %v7791_v45 = vld [vmem:[#allocation142_spill] sm:$0xff]  ;;  %v7797_v14 = vld [vmem:[#allocation143_spill] sm:$0xff]  ;;  %v7806_v52 = vld [vmem:[#allocation241_spill] sm:$0xff] }
 0x16a   :  { %7768 = vst [vmem:[#allocation92_spill] sm:$0xff] %v4552_v3  ;;  %v4568_v23 = vmax.f32 %v7779_v33, %v7776_v30  ;;  %v7792_v55 = vmax.f32 %v7790_v58, %v7791_v45  ;;  %v7794_v27 = vld [vmem:[#allocation66_spill] sm:$0xff]  ;;  %v7796_v30 = vld [vmem:[#allocation140_spill] sm:$0xff]  ;;  %v7809_v58 = vld [vmem:[#allocation149_spill] sm:$0xff] }
 0x16b   :  { %v4576_v54 = vmax.f32 %v7785_v17, %v7782_v34  ;;  %v7795_v33 = vmax.f32 %v4023_v38, %v7794_v27  ;;  %v7798_v49 = vmax.f32 %v7796_v30, %v7797_v14  ;;  %v7800_v17 = vmax.f32 %v4025_v62, %v4134_v25  ;;  %v7802_v34 = vld [vmem:[#allocation144_spill] sm:$0xff]  ;;  %v7805_v0 = vld [vmem:[#allocation58_spill] sm:$0xff]  ;;  %v7812_v27 = vld [vmem:[#allocation63_spill] sm:$0xff] }
 0x16c   :  { %v4584_v44 = vmax.f32 %v7792_v55, %v7789_v1  ;;  %v7803_v7 = vmax.f32 %v7801_v46, %v7802_v34  ;;  %v7807_v55 = vmax.f32 %v7805_v0, %v7806_v52  ;;  %v7808_v1 = vld [vmem:[#allocation145_spill] sm:$0xff]  ;;  %v7813_v30 = vld [vmem:[#allocation202_spill] sm:$0xff]  ;;  %v7820_v46 = vld [vmem:[#allocation67_spill] sm:$0xff] }
 0x16d   :  { %7786 = vst [vmem:[#allocation37_spill] sm:$0xff] %v4576_v54  ;;  %v4592_v6 = vmax.f32 %v7798_v49, %v7795_v33  ;;  %v7810_v45 = vmax.f32 %v7808_v1, %v7809_v58  ;;  %v7814_v33 = vmax.f32 %v7812_v27, %v7813_v30  ;;  %v7815_v14 = vld [vmem:[#allocation146_spill] sm:$0xff]  ;;  %v7822_v34 = vld [vmem:[#allocation147_spill] sm:$0xff]  ;;  %v7827_v1 = vld [vmem:[#allocation69_spill] sm:$0xff] }
 0x16e   :  { %7793 = vst [vmem:[#allocation214_spill] sm:$0xff] %v4584_v44  ;;  %v4600_v12 = vmax.f32 %v7803_v7, %v7800_v17  ;;  %v7816_v49 = vld [vmem:[#allocation150_spill] sm:$0xff]  ;;  %v7823_v7 = vld [vmem:[#allocation151_spill] sm:$0xff]  ;;  %v7829_v58 = vld [vmem:[#allocation148_spill] sm:$0xff] }
 0x16f   :  { %7799 = vst [vmem:[#allocation93_spill] sm:$0xff] %v4592_v6  ;;  %v4608_v38 = vmax.f32 %v7810_v45, %v7807_v55  ;;  %v7817_v6 = vmax.f32 %v7815_v14, %v7816_v49  ;;  %v7819_v25 = vld [vmem:[#allocation230_spill] sm:$0xff]  ;;  %v7826_v52 = vld [vmem:[#allocation231_spill] sm:$0xff]  ;;  %v7830_v45 = vld [vmem:[#allocation152_spill] sm:$0xff] }
 0x170   :  { %7804 = vst [vmem:[#allocation96_spill] sm:$0xff] %v4600_v12  ;;  %v7821_v17 = vmax.f32 %v7819_v25, %v7820_v46  ;;  %v7824_v12 = vmax.f32 %v7822_v34, %v7823_v7  ;;  %v7828_v55 = vmax.f32 %v7826_v52, %v7827_v1  ;;  %v7833_v30 = vld [vmem:[#allocation242_spill] sm:$0xff]  ;;  %v7836_v14 = vld [vmem:[#allocation157_spill] sm:$0xff]  ;;  %v7839_v46 = vld [vmem:[#allocation64_spill] sm:$0xff] }
 0x171   :  { %7811 = vst [vmem:[#allocation215_spill] sm:$0xff] %v4608_v38  ;;  %v4616_v62 = vmax.f32 %v7817_v6, %v7814_v33  ;;  %v7831_v38 = vmax.f32 %v7829_v58, %v7830_v45  ;;  %v7834_v6 = vmax.f32 %v4073_v11, %v7833_v30  ;;  %v7835_v33 = vld [vmem:[#allocation153_spill] sm:$0xff]  ;;  %v7840_v34 = vld [vmem:[#allocation243_spill] sm:$0xff]  ;;  %v7843_v7 = vld [vmem:[#allocation158_spill] sm:$0xff] }
 0x172   :  { %v4624_v0 = vmax.f32 %v7824_v12, %v7821_v17  ;;  %v7837_v49 = vmax.f32 %v7835_v33, %v7836_v14  ;;  %v7841_v12 = vmax.f32 %v7839_v46, %v7840_v34  ;;  %v7842_v17 = vld [vmem:[#allocation154_spill] sm:$0xff]  ;;  %v7846_v1 = vld [vmem:[#allocation193_spill] sm:$0xff]  ;;  %v7849_v58 = vld [vmem:[#allocation159_spill] sm:$0xff] }
 0x173   :  { %7818 = vst [vmem:[#allocation94_spill] sm:$0xff] %v4616_v62  ;;  %v4632_v27 = vmax.f32 %v7831_v38, %v7828_v55  ;;  %v7844_v62 = vmax.f32 %v7842_v17, %v7843_v7  ;;  %v7847_v38 = vmax.f32 %v4100_v5, %v7846_v1  ;;  %v7848_v55 = vld [vmem:[#allocation155_spill] sm:$0xff]  ;;  %v7851_v30 = vld [vmem:[#allocation244_spill] sm:$0xff]  ;;  %v7856_v34 = vld [vmem:[#allocation65_spill] sm:$0xff] }
 0x174   :  { %7825 = vst [vmem:[#allocation97_spill] sm:$0xff] %v4624_v0  ;;  %v4640_v25 = vmax.f32 %v7837_v49, %v7834_v6  ;;  %v7850_v45 = vmax.f32 %v7848_v55, %v7849_v58  ;;  %v7852_v6 = vmax.f32 %v4102_v13, %v7851_v30  ;;  %v7853_v33 = vld [vmem:[#allocation156_spill] sm:$0xff]  ;;  %v7857_v17 = vld [vmem:[#allocation245_spill] sm:$0xff]  ;;  %v7860_v7 = vld [vmem:[#allocation163_spill] sm:$0xff] }
 0x175   :  { %7832 = vst [vmem:[#allocation95_spill] sm:$0xff] %v4632_v27  ;;  %v4648_v52 = vmax.f32 %v7844_v62, %v7841_v12  ;;  %v7854_v14 = vld [vmem:[#allocation160_spill] sm:$0xff]  ;;  %v7858_v62 = vmax.f32 %v7856_v34, %v7857_v17  ;;  %v7859_v12 = vld [vmem:[#allocation161_spill] sm:$0xff]  ;;  %v7866_v58 = vld [vmem:[#allocation162_spill] sm:$0xff] }
 0x176   :  { %7838 = vst [vmem:[#allocation98_spill] sm:$0xff] %v4640_v25  ;;  %v4656_v11 = vmax.f32 %v7850_v45, %v7847_v38  ;;  %v7855_v49 = vmax.f32 %v7853_v33, %v7854_v14  ;;  %v7861_v47 = vmax.f32 %v7859_v12, %v7860_v7  ;;  %v7863_v1 = vld [vmem:[#allocation36_spill] sm:$0xff]  ;;  %v7870_v30 = vld [vmem:[#allocation62_spill] sm:$0xff]  ;;  %v7873_v14 = vld [vmem:[#allocation165_spill] sm:$0xff] }
 0x177   :  { %7845 = vst [vmem:[#allocation216_spill] sm:$0xff] %v4648_v52  ;;  %v7864_v55 = vld [vmem:[#allocation204_spill] sm:$0xff]  ;;  %v7877_v17 = vld [vmem:[#allocation77_spill] sm:$0xff] }
 0x178   :  { %v4664_v46 = vmax.f32 %v7855_v49, %v7852_v6  ;;  %v4672_v5 = vmax.f32 %v7861_v47, %v7858_v62  ;;  %v7865_v38 = vmax.f32 %v7863_v1, %v7864_v55  ;;  %v7867_v45 = vld [vmem:[#allocation164_spill] sm:$0xff]  ;;  %v7878_v47 = vmax.f32 %v4150_v24, %v7877_v17  ;;  %v7879_v62 = vld [vmem:[#allocation166_spill] sm:$0xff]  ;;  %v7880_v12 = vld [vmem:[#allocation169_spill] sm:$0xff] }
 0x179   :  { %v7868_v56 = vmax.f32 %v7866_v58, %v7867_v45  ;;  %v7871_v33 = vld [vmem:[#allocation76_spill] sm:$0xff]  ;;  %v7881_v7 = vmax.f32 %v7879_v62, %v7880_v12  ;;  %v7884_v55 = vld [vmem:[#allocation167_spill] sm:$0xff]  ;;  %v7900_v12 = vld [vmem:[#allocation246_spill] sm:$0xff] }
 0x17a   :  { %7862 = vst [vmem:[#allocation99_spill] sm:$0xff] %v4672_v5  ;;  %v7872_v6 = vmax.f32 %v7870_v30, %v7871_v33  ;;  %v7874_v49 = vld [vmem:[#allocation168_spill] sm:$0xff]  ;;  %v7889_v30 = vld [vmem:[#allocation171_spill] sm:$0xff] }
 0x17b   :  { %v4680_v13 = vmax.f32 %v7868_v56, %v7865_v38  ;;  %v7875_v27 = vmax.f32 %v7873_v14, %v7874_v49  ;;  %v4696_v1 = vmax.f32 %v7881_v7, %v7878_v47  ;;  %v7883_v56 = vmax.f32 %v4152_v19, %v4261_v8  ;;  %v7885_v38 = vld [vmem:[#allocation170_spill] sm:$0xff]  ;;  %v7890_v33 = vld [vmem:[#allocation175_spill] sm:$0xff]  ;;  %v7895_v17 = vld [vmem:[#allocation172_spill] sm:$0xff] }
 0x17c   :  { %v7886_v58 = vmax.f32 %v7884_v55, %v7885_v38  ;;  %v7893_v14 = vld [vmem:[#allocation78_spill] sm:$0xff]  ;;  %v7896_v47 = vld [vmem:[#allocation176_spill] sm:$0xff]  ;;  %v7903_v55 = vld [vmem:[#allocation27_spill] sm:$0xff] }
 0x17d   :  { %7869 = vst [vmem:[#allocation103_spill] sm:$0xff] %v4680_v13  ;;  %v4688_v34 = vmax.f32 %v7875_v27, %v7872_v6  ;;  %v7888_v27 = vmax.f32 %v4154_v15, %v4263_v57  ;;  %v7891_v6 = vmax.f32 %v7889_v30, %v7890_v33  ;;  %v7894_v49 = vmax.f32 %v4176_v29, %v7893_v14  ;;  %v7899_v8 = vld [vmem:[#allocation70_spill] sm:$0xff]  ;;  %v7912_v14 = vld [vmem:[#allocation179_spill] sm:$0xff] }
 0x17e   :  { %7882 = vst [vmem:[#allocation217_spill] sm:$0xff] %v4696_v1  ;;  %v4704_v45 = vmax.f32 %v7886_v58, %v7883_v56  ;;  %v7897_v62 = vmax.f32 %v7895_v17, %v7896_v47  ;;  %v7901_v7 = vmax.f32 %v7899_v8, %v7900_v12  ;;  %v7902_v56 = vld [vmem:[#allocation173_spill] sm:$0xff]  ;;  %v7906_v57 = vmax.f32 %v4198_v18, %v4304_v48  ;;  %v7907_v58 = vld [vmem:[#allocation174_spill] sm:$0xff]  ;;  %v7914_v47 = vld [vmem:[#allocation75_spill] sm:$0xff] }
 0x17f   :  { %7876 = vst [vmem:[#allocation41_spill] sm:$0xff] %v4688_v34  ;;  %v4712_v24 = vmax.f32 %v7891_v6, %v7888_v27  ;;  %v7904_v38 = vmax.f32 %v7902_v56, %v7903_v55  ;;  %v7908_v27 = vld [vmem:[#allocation28_spill] sm:$0xff]  ;;  %v7910_v33 = vmax.f32 %v4200_v53, %v4306_v28  ;;  %v7911_v6 = vld [vmem:[#allocation177_spill] sm:$0xff]  ;;  %v7917_v12 = vld [vmem:[#allocation178_spill] sm:$0xff] }
 0x180   :  { %7887 = vst [vmem:[#allocation100_spill] sm:$0xff] %v4704_v45  ;;  %v4720_v19 = vmax.f32 %v7897_v62, %v7894_v49  ;;  %v7909_v30 = vmax.f32 %v7907_v58, %v7908_v27  ;;  %v7913_v49 = vmax.f32 %v7911_v6, %v7912_v14  ;;  %v7915_v62 = vld [vmem:[#allocation40_spill] sm:$0xff]  ;;  %v7920_v48 = vld [vmem:[#allocation181_spill] sm:$0xff]  ;;  %v7923_v58 = vld [vmem:[#allocation182_spill] sm:$0xff] }
 0x181   :  { %7892 = vst [vmem:[#allocation104_spill] sm:$0xff] %v4712_v24  ;;  %v4728_v15 = vmax.f32 %v7904_v38, %v7901_v7  ;;  %v7916_v8 = vmax.f32 %v7914_v47, %v7915_v62  ;;  %v7918_v7 = vld [vmem:[#allocation180_spill] sm:$0xff]  ;;  %v7924_v53 = vld [vmem:[#allocation185_spill] sm:$0xff]  ;;  %v7964_v24 = vld [vmem:[#allocation199_spill] sm:$0xff] }
 0x182   :  { %7898 = vst [vmem:[#allocation205_spill] sm:$0xff] %v4720_v19  ;;  %v4736_v29 = vmax.f32 %v7909_v30, %v7906_v57  ;;  %v4744_v17 = vmax.f32 %v7913_v49, %v7910_v33  ;;  %v7919_v56 = vmax.f32 %v7917_v12, %v7918_v7  ;;  %v7921_v55 = vld [vmem:[#allocation184_spill] sm:$0xff]  ;;  %v7925_v28 = vmax.f32 %v7923_v58, %v7924_v53  ;;  %v7927_v30 = vld [vmem:[#allocation183_spill] sm:$0xff]  ;;  %v7928_v33 = vld [vmem:[#allocation186_spill] sm:$0xff] }
 0x183   :  { %7905 = vst [vmem:[#allocation218_spill] sm:$0xff] %v4728_v15  ;;  %v7922_v38 = vmax.f32 %v7920_v48, %v7921_v55  ;;  %v7929_v6 = vmax.f32 %v7927_v30, %v7928_v33  ;;  %v7931_v49 = vld [vmem:[#allocation42_spill] sm:$0xff]  ;;  %v7932_v47 = vld [vmem:[#allocation189_spill] sm:$0xff]  ;;  %v7939_v48 = vld [vmem:[#allocation187_spill] sm:$0xff] }
 0x184   :  { %v4752_v18 = vmax.f32 %v7919_v56, %v7916_v8  ;;  %v4762_v27 = vmax.f32 %v7925_v28, %v788_v35  ;;  %v7933_v62 = vmax.f32 %v7931_v49, %v7932_v47  ;;  %v7935_v12 = vld [vmem:[#allocation46_spill] sm:$0xff]  ;;  %v7940_v55 = vld [vmem:[#allocation191_spill] sm:$0xff]  ;;  %v7943_v58 = vld [vmem:[#allocation188_spill] sm:$0xff] }
 0x185   :  { %v4757_v57 = vmax.f32 %v7922_v38, %v787_v21  ;;  %v4767_v14 = vmax.f32 %v7929_v6, %v789_v31  ;;  %v7936_v7 = vld [vmem:[#allocation190_spill] sm:$0xff]  ;;  %v7941_v38 = vmax.f32 %v7939_v48, %v7940_v55  ;;  %v7944_v53 = vld [vmem:[#allocation192_spill] sm:$0xff]  ;;  %v7947_v30 = vld [vmem:[#allocation31_spill] sm:$0xff] }
 0x186   :  { %7926 = vst [vmem:[#allocation101_spill] sm:$0xff] %v4762_v27  ;;  %v4772_v8 = vmax.f32 %v7933_v62, %v791_v59  ;;  %v7937_v56 = vmax.f32 %v7935_v12, %v7936_v7  ;;  %v7945_v28 = vmax.f32 %v7943_v58, %v7944_v53  ;;  %v934_v33 = vrot.slane %v7947_v30, 4  ;;  %v7948_v59 = vld [vmem:[#allocation32_spill] sm:$0xff]  ;;  %v7949_v49 = vld [vmem:[#allocation33_spill] sm:$0xff]  ;;  %v7950_v62 = vld [vmem:[#allocation38_spill] sm:$0xff] }
 0x187   :  { %7930 = vst [vmem:[#allocation105_spill] sm:$0xff] %v4767_v14  ;;  %v4782_v35 = vmax.f32 %v7941_v38, %v793_v37  ;;  %v935_v6 = vrot.slane %v7948_v59, 4  ;;  %v937_v47 = vrot.slane %v7949_v49, 4  ;;  %v7951_v12 = vld [vmem:[#allocation39_spill] sm:$0xff]  ;;  %v7953_v37 = vld [vmem:[#allocation54_spill] sm:$0xff] }
 0x188   :  { %7934 = vst [vmem:[#allocation102_spill] sm:$0xff] %v4772_v8  ;;  %v4777_v21 = vmax.f32 %v7937_v56, %v792_v16  ;;  %v4787_v31 = vmax.f32 %v7945_v28, %v794_v50  ;;  %v939_v16 = vrot.slane %v7950_v62, 4  ;;  %v941_v7 = vrot.slane %v7951_v12, 4  ;;  %v7952_v56 = vld [vmem:[#allocation47_spill] sm:$0xff]  ;;  %v7955_v28 = vld [vmem:[#allocation60_spill] sm:$0xff] }
 0x189   :  { %7942 = vst [vmem:[#allocation221_spill] sm:$0xff] %v4782_v35  ;;  %v943_v48 = vrot.slane %v7952_v56, 4  ;;  %v945_v55 = vrot.slane %v7953_v37, 4  ;;  %v4797_v38 = vsel %vm933_vm0, %v934_v33, %v935_v6  ;;  %v4800_v50 = vsel %vm933_vm0, %v935_v6, %v937_v47  ;;  %v7954_v58 = vld [vmem:[#allocation59_spill] sm:$0xff]  ;;  %v7957_v56 = vld [vmem:[#allocation61_spill] sm:$0xff] }
 0x18a   :  { %7938 = vst [vmem:[#allocation106_spill] sm:$0xff] %v4777_v21  ;;  %v946_v53 = vrot.slane %v7954_v58, 4  ;;  %v948_v14 = vrot.slane %v7955_v28, 4  ;;  %v940_v49 = vsel %vm933_vm0, %v937_v47, %v939_v16  ;;  %v4806_v62 = vsel %vm933_vm0, %v939_v16, %v941_v7  ;;  %v7959_v33 = vld [vmem:[#allocation197_spill] sm:$0xff]  ;;  %v7963_v47 = vld [vmem:[#allocation198_spill] sm:$0xff]  ;;  %v7967_v34 = vld [vmem:[#allocation203_spill] sm:$0xff] }
 0x18b   :  { %7946 = vst [vmem:[#allocation107_spill] sm:$0xff] %v4787_v31  ;;  %v4809_v27 = vsel %vm933_vm0, %v941_v7, %v943_v48  ;;  %v950_v12 = vrot.slane %v7957_v56, 4  ;;  %v7958_v31 = vld [vmem:[#allocation200_spill] sm:$0xff]  ;;  %v952_v8 = vrot.slane %v7963_v47, 4  ;;  %v954_v7 = vrot.slane %v7964_v24, 4  ;;  %v7965_v48 = vld [vmem:[#allocation79_spill] sm:$0xff] }
 0x18c   :  { %7956 = vst [vmem:[#allocation110_spill] sm:$0xff] %v4809_v27  ;;  %v7960_v35 = vmax.f32 %v7958_v31, %v7959_v33  ;;  %v4818_v6 = vsel %vm933_vm0, %v945_v55, %v946_v53  ;;  %v4821_v28 = vsel %vm933_vm0, %v946_v53, %v948_v14  ;;  %v956_v45 = vrot.slane %v7965_v48, 4  ;;  %v7966_v56 = vld [vmem:[#allocation83_spill] sm:$0xff]  ;;  %v7968_v31 = vld [vmem:[#allocation201_spill] sm:$0xff] }
 0x18d   :  { %7962 = vst [vmem:[#allocation222_spill] sm:$0xff] %v4821_v28  ;;  %v951_v16 = vsel %vm933_vm0, %v948_v14, %v950_v12  ;;  %v957_v1 = vrot.slane %v7966_v56, 4  ;;  %v4834_v55 = vsel %vm933_vm0, %v950_v12, %v952_v8  ;;  %v959_v53 = vrot.slane %v4360_v39, 4  ;;  %v8014_v27 = vld [vmem:[#allocation43_spill] sm:$0xff] }
 0x18e   :  { %v4815_v21 = vmax.f32 %v940_v49, %v7960_v35  ;;  %v7969_v35 = vmax.f32 %v7967_v34, %v7968_v31  ;;  %7971 = vst [vmem:[#allocation111_spill] sm:$0xff] %v4834_v55  ;;  %v961_v33 = vrot.slane %v4374_v10, 4  ;;  %v4839_v14 = vsel %vm933_vm0, %v952_v8, %v954_v7  ;;  %v7975_v10 = vld [vmem:[#allocation213_spill] sm:$0xff] }
 0x18f   :  { %7972 = vst [vmem:[#allocation109_spill] sm:$0xff] %v4839_v14  ;;  %v4842_v24 = vsel %vm933_vm0, %v956_v45, %v957_v1  ;;  %v963_v47 = vrot.slane %v4384_v9, 4  ;;  %v4847_v34 = vsel %vm933_vm0, %v957_v1, %v959_v53  ;;  %v968_v39 = vrot.slane %v4456_v2, 4  ;;  %v7976_v31 = vld [vmem:[#allocation209_spill] sm:$0xff] }
 0x190   :  { %7961 = vst [vmem:[#allocation208_spill] sm:$0xff] %v4815_v21  ;;  %v4831_v49 = vmax.f32 %v951_v16, %v7969_v35  ;;  %v965_v21 = vrot.slane %v4392_v60, 4  ;;  %v962_v12 = vsel %vm933_vm0, %v959_v53, %v961_v33  ;;  %v967_v16 = vrot.slane %v4448_v43, 4 }
 0x191   :  { %7973 = vst [vmem:[#allocation112_spill] sm:$0xff] %v4842_v24  ;;  %v7977_v8 = vmax.f32 %v7975_v10, %v7976_v31  ;;  %v4858_v45 = vsel %vm933_vm0, %v961_v33, %v963_v47  ;;  %v970_v1 = vrot.slane %v4464_v20, 4  ;;  %v972_v53 = vrot.slane %v4472_v40, 4  ;;  %v7985_v31 = vld [vmem:[#allocation225_spill] sm:$0xff] }
 0x192   :  { %7970 = vst [vmem:[#allocation108_spill] sm:$0xff] %v4831_v49  ;;  %v4861_v35 = vsel %vm933_vm0, %v963_v47, %v965_v21  ;;  %v4865_v60 = vsel %vm933_vm0, %v967_v16, %v968_v39  ;;  %v974_v9 = vrot.slane %v4480_v61, 4  ;;  %v976_v49 = vrot.slane %v4488_v51, 4  ;;  %v8051_v55 = vld [vmem:[#allocation107_spill] sm:$0xff] }
 0x193   :  { %7974 = vst [vmem:[#allocation113_spill] sm:$0xff] %v4847_v34  ;;  %v4855_v7 = vmax.f32 %v962_v12, %v7977_v8  ;;  %v4871_v12 = vsel %vm933_vm0, %v968_v39, %v970_v1  ;;  %v978_v33 = vrot.slane %v4544_v22, 4  ;;  %v979_v10 = vrot.slane %v4552_v3, 4  ;;  %v7986_v8 = vld [vmem:[#allocation220_spill] sm:$0xff]  ;;  %v8017_v3 = vld [vmem:[#allocation51_spill] sm:$0xff] }
 0x194   :  { %7979 = vst [vmem:[#allocation48_spill] sm:$0xff] %v4858_v45  ;;  %v981_v21 = vrot.slane %v4560_v42, 4  ;;  %v973_v20 = vsel %vm933_vm0, %v970_v1, %v972_v53  ;;  %v4878_v47 = vsel %vm933_vm0, %v972_v53, %v974_v9  ;;  %v4881_v40 = vsel %vm933_vm0, %v974_v9, %v976_v49  ;;  %v8040_v34 = vld [vmem:[#allocation215_spill] sm:$0xff] }
 0x195   :  { %7978 = vst [vmem:[#allocation116_spill] sm:$0xff] %v4855_v7  ;;  %v983_v16 = vrot.slane %v4568_v23, 4  ;;  %v7987_v39 = vmax.f32 %v7985_v31, %v7986_v8  ;;  %v4890_v61 = vsel %vm933_vm0, %v978_v33, %v979_v10  ;;  %v985_v1 = vrot.slane %v4576_v54, 4  ;;  %v7991_v7 = vld [vmem:[#allocation240_spill] sm:$0xff]  ;;  %v7992_v31 = vld [vmem:[#allocation234_spill] sm:$0xff] }
 0x196   :  { %7980 = vst [vmem:[#allocation223_spill] sm:$0xff] %v4861_v35  ;;  %v4893_v42 = vsel %vm933_vm0, %v979_v10, %v981_v21  ;;  %v987_v9 = vrot.slane %v4584_v44, 4  ;;  %v989_v49 = vrot.slane %v4640_v25, 4  ;;  %v990_v23 = vrot.slane %v4648_v52, 4  ;;  %v8035_v35 = vld [vmem:[#allocation88_spill] sm:$0xff] }
 0x197   :  { %7981 = vst [vmem:[#allocation114_spill] sm:$0xff] %v4865_v60  ;;  %v4887_v51 = vmax.f32 %v973_v20, %v7987_v39  ;;  %v984_v53 = vsel %vm933_vm0, %v981_v21, %v983_v16  ;;  %v7993_v20 = vmax.f32 %v7991_v7, %v7992_v31  ;;  %v4906_v33 = vsel %vm933_vm0, %v983_v16, %v985_v1  ;;  %v7999_v31 = vld [vmem:[#allocation194_spill] sm:$0xff] }
 0x198   :  { %7982 = vst [vmem:[#allocation117_spill] sm:$0xff] %v4871_v12  ;;  %v992_v10 = vrot.slane %v4656_v11, 4  ;;  %v994_v39 = vrot.slane %v4664_v46, 4  ;;  %v4911_v21 = vsel %vm933_vm0, %v985_v1, %v987_v9  ;;  %v4914_v44 = vsel %vm933_vm0, %v989_v49, %v990_v23  ;;  %v7998_v46 = vld [vmem:[#allocation72_spill] sm:$0xff] }
 0x199   :  { %7983 = vst [vmem:[#allocation226_spill] sm:$0xff] %v4878_v47  ;;  %v4903_v8 = vmax.f32 %v984_v53, %v7993_v20  ;;  %v996_v54 = vrot.slane %v4672_v5, 4  ;;  %v1000_v53 = vrot.slane %v4736_v29, 4  ;;  %v1001_v11 = vrot.slane %v4744_v17, 4  ;;  %v8004_v17 = vld [vmem:[#allocation26_spill] sm:$0xff]  ;;  %v8028_v47 = vld [vmem:[#allocation108_spill] sm:$0xff] }
 0x19a   :  { %7984 = vst [vmem:[#allocation115_spill] sm:$0xff] %v4881_v40  ;;  %v4919_v7 = vsel %vm933_vm0, %v990_v23, %v992_v10  ;;  %v995_v16 = vsel %vm933_vm0, %v992_v10, %v994_v39  ;;  %v8000_v1 = vmax.f32 %v7998_v46, %v7999_v31  ;;  %v1003_v23 = vrot.slane %v4752_v18, 4  ;;  %v8005_v46 = vld [vmem:[#allocation30_spill] sm:$0xff]  ;;  %v8007_v18 = vld [vmem:[#allocation52_spill] sm:$0xff] }
 0x19b   :  { %7988 = vst [vmem:[#allocation118_spill] sm:$0xff] %v4887_v51  ;;  %v998_v51 = vrot.slane %v4680_v13, 4  ;;  %v4930_v49 = vsel %vm933_vm0, %v994_v39, %v996_v54  ;;  %v4937_v13 = vsel %vm933_vm0, %v1000_v53, %v1001_v11  ;;  %v1005_v10 = vrot.slane %v4757_v57, 4  ;;  %v8008_v53 = vld [vmem:[#allocation53_spill] sm:$0xff]  ;;  %v8011_v39 = vld [vmem:[#allocation34_spill] sm:$0xff] }
 0x19c   :  { %7989 = vst [vmem:[#allocation49_spill] sm:$0xff] %v4890_v61  ;;  %v4927_v9 = vmax.f32 %v995_v16, %v8000_v1  ;;  %v4945_v31 = vsel %vm933_vm0, %v1001_v11, %v1003_v23  ;;  %v8026_v61 = vld [vmem:[#allocation84_spill] sm:$0xff]  ;;  %v1153_v56 = vrot.slane %v8035_v35, 4  ;;  %v1186_v37 = vrot.slane %v8051_v55, 4 }
 0x19d   :  { %7990 = vst [vmem:[#allocation227_spill] sm:$0xff] %v4893_v42  ;;  %v4933_v20 = vsel %vm933_vm0, %v996_v54, %v998_v51  ;;  %v1006_v57 = vsel %vm933_vm0, %v1003_v23, %v1005_v10  ;;  %v8009_v51 = vmax.f32 %v4342_v26, %v4302_v32  ;;  %v8010_v54 = vld [vmem:[#allocation74_spill] sm:$0xff]  ;;  %v8012_v26 = vld [vmem:[#allocation95_spill] sm:$0xff]  ;;  %v5002_v11 = vmax.f32 %v4736_v29, %v1005_v10  ;;  %v8016_v23 = vld [vmem:[#allocation45_spill] sm:$0xff] }
 0x19e   :  { %7994 = vst [vmem:[#allocation119_spill] sm:$0xff] %v4906_v33  ;;  %v1115_v32 = vrot.slane %v8014_v27, 4  ;;  %v1140_v40 = vrot.slane %v8026_v61, 4 }
 0x19f   :  { %7995 = vst [vmem:[#allocation123_spill] sm:$0xff] %v4911_v21  ;;  %v4963_v5 = vmax.f32 %v1006_v57, %v8009_v51  ;;  %v1120_v51 = vrot.slane %v8017_v3, 4  ;;  %v1124_v57 = vrot.slane %v8008_v53, 4 }
 0x1a0   :  { %7996 = vst [vmem:[#allocation228_spill] sm:$0xff] %v4914_v44  ;;  %v8015_v44 = vld [vmem:[#allocation44_spill] sm:$0xff] }
 0x1a1   :  { %7997 = vst [vmem:[#allocation120_spill] sm:$0xff] %v4919_v7  ;;  %v1116_v21 = vrot.slane %v8015_v44, 4  ;;  %v1118_v7 = vrot.slane %v8016_v23, 4 }
 0x1a2   :  { %8001 = vst [vmem:[#allocation124_spill] sm:$0xff] %v4930_v49  ;;  %v1122_v49 = vrot.slane %v8007_v18, 4 }
 0x1a3   :  { %8002 = vst [vmem:[#allocation121_spill] sm:$0xff] %v4933_v20  ;;  %v8018_v20 = vld [vmem:[#allocation68_spill] sm:$0xff]  ;;  %v5013_v16 = vsel %vm933_vm0, %v1115_v32, %v1116_v21  ;;  %v5016_v29 = vsel %vm933_vm0, %v1116_v21, %v1118_v7  ;;  %v1121_v10 = vsel %vm933_vm0, %v1118_v7, %v1120_v51  ;;  %v8023_v21 = vld [vmem:[#allocation73_spill] sm:$0xff]  ;;  %v1133_v7 = vrot.slane %v8010_v54, 4 }
 0x1a4   :  { %8003 = vst [vmem:[#allocation125_spill] sm:$0xff] %v4937_v13  ;;  %v1126_v1 = vrot.slane %v8018_v20, 4  ;;  %v8019_v13 = vld [vmem:[#allocation71_spill] sm:$0xff]  ;;  %v5024_v25 = vsel %vm933_vm0, %v1120_v51, %v1122_v49  ;;  %v5027_v33 = vsel %vm933_vm0, %v1122_v49, %v1124_v57  ;;  %v1131_v42 = vrot.slane %v8023_v21, 4  ;;  %v8042_v54 = vld [vmem:[#allocation41_spill] sm:$0xff] }
 0x1a5   :  { %8006 = vst [vmem:[#allocation50_spill] sm:$0xff] %v4945_v31  ;;  %v1127_v52 = vrot.slane %v8019_v13, 4  ;;  %v8021_v31 = vld [vmem:[#allocation208_spill] sm:$0xff]  ;;  %v8027_v49 = vld [vmem:[#allocation35_spill] sm:$0xff]  ;;  %v1144_v21 = vrot.slane %v4432_v4, 4 }
 0x1a6   :  { %8013 = vst [vmem:[#allocation229_spill] sm:$0xff] %v5002_v11  ;;  %v8020_v11 = vld [vmem:[#allocation29_spill] sm:$0xff]  ;;  %v5021_v3 = vmax.f32 %v1121_v10, %v8021_v31  ;;  %v8024_v31 = vld [vmem:[#allocation206_spill] sm:$0xff]  ;;  %v1142_v57 = vrot.slane %v8027_v49, 4  ;;  %v5044_v2 = vsel %vm933_vm0, %v1131_v42, %v1133_v7 }
 0x1a7   :  { %v1129_v23 = vrot.slane %v8020_v11, 4  ;;  %v5030_v22 = vsel %vm933_vm0, %v1126_v1, %v1127_v52  ;;  %v1135_v11 = vrot.slane %v8011_v39, 4  ;;  %v1137_v10 = vrot.slane %v8024_v31, 4  ;;  %v8041_v39 = vld [vmem:[#allocation94_spill] sm:$0xff] }
 0x1a8   :  { %8022 = vst [vmem:[#allocation122_spill] sm:$0xff] %v5021_v3  ;;  %v8025_v3 = vld [vmem:[#allocation80_spill] sm:$0xff]  ;;  %v1143_v49 = vsel %vm933_vm0, %v1140_v40, %v1142_v57  ;;  %v1164_v24 = vrot.slane %v8041_v39, 4 }
 0x1a9   :  { %v5033_v32 = vsel %vm933_vm0, %v1127_v52, %v1129_v23  ;;  %v1138_v51 = vrot.slane %v8025_v3, 4  ;;  %v1132_v1 = vsel %vm933_vm0, %v1129_v23, %v1131_v42  ;;  %v5047_v52 = vsel %vm933_vm0, %v1133_v7, %v1135_v11  ;;  %v8030_v23 = vld [vmem:[#allocation116_spill] sm:$0xff]  ;;  %v8032_v11 = vld [vmem:[#allocation87_spill] sm:$0xff] }
 0x1aa   :  { %v5051_v43 = vmax.f32 %v1132_v1, %v8028_v47  ;;  %v5061_v60 = vmax.f32 %v1143_v49, %v8030_v23  ;;  %v5064_v42 = vsel %vm933_vm0, %v1142_v57, %v1144_v21  ;;  %v1146_v7 = vrot.slane %v4440_v63, 4  ;;  %v8033_v47 = vld [vmem:[#allocation90_spill] sm:$0xff]  ;;  %v8036_v23 = vld [vmem:[#allocation93_spill] sm:$0xff] }
 0x1ab   :  { %v5054_v12 = vsel %vm933_vm0, %v1137_v10, %v1138_v51  ;;  %v5057_v61 = vsel %vm933_vm0, %v1138_v51, %v1140_v40  ;;  %v1148_v4 = vrot.slane %v8032_v11, 4  ;;  %v1149_v1 = vrot.slane %v8033_v47, 4 }
 0x1ac   :  { %8029 = vst [vmem:[#allocation126_spill] sm:$0xff] %v5051_v43  ;;  %v8034_v43 = vld [vmem:[#allocation211_spill] sm:$0xff]  ;;  %v1155_v51 = vrot.slane %v4528_v41, 4  ;;  %v5073_v40 = vsel %vm933_vm0, %v1144_v21, %v1146_v7  ;;  %v1157_v49 = vrot.slane %v4536_v36, 4  ;;  %v1159_v57 = vrot.slane %v8036_v23, 4  ;;  %v8038_v41 = vld [vmem:[#allocation118_spill] sm:$0xff] }
 0x1ad   :  { %8031 = vst [vmem:[#allocation55_spill] sm:$0xff] %v5061_v60  ;;  %v1151_v10 = vrot.slane %v8034_v43, 4  ;;  %v8037_v60 = vld [vmem:[#allocation96_spill] sm:$0xff]  ;;  %v5079_v63 = vsel %vm933_vm0, %v1148_v4, %v1149_v1  ;;  %v1162_v4 = vrot.slane %v8040_v34, 4 }
 0x1ae   :  { %v1160_v45 = vrot.slane %v8037_v60, 4  ;;  %v5086_v35 = vsel %vm933_vm0, %v1153_v56, %v1155_v51  ;;  %v5092_v7 = vsel %vm933_vm0, %v1155_v51, %v1157_v49  ;;  %v8044_v51 = vld [vmem:[#allocation100_spill] sm:$0xff] }
 0x1af   :  { %v5082_v48 = vsel %vm933_vm0, %v1149_v1, %v1151_v10  ;;  %v1154_v43 = vsel %vm933_vm0, %v1151_v10, %v1153_v56  ;;  %v1166_v1 = vrot.slane %v4624_v0, 4  ;;  %v1168_v10 = vrot.slane %v8012_v26, 4 }
 0x1b0   :  { %v5089_v21 = vmax.f32 %v1154_v43, %v8038_v41  ;;  %v5095_v36 = vsel %vm933_vm0, %v1159_v57, %v1160_v45  ;;  %v1170_v56 = vrot.slane %v8042_v54, 4  ;;  %v5103_v14 = vsel %vm933_vm0, %v1160_v45, %v1162_v4  ;;  %v8043_v41 = vld [vmem:[#allocation217_spill] sm:$0xff] }
 0x1b1   :  { %v1171_v43 = vrot.slane %v8043_v41, 4  ;;  %v1173_v49 = vrot.slane %v8044_v51, 4  ;;  %v1165_v58 = vsel %vm933_vm0, %v1162_v4, %v1164_v24  ;;  %v5110_v34 = vsel %vm933_vm0, %v1164_v24, %v1166_v1 }
 0x1b2   :  { %8039 = vst [vmem:[#allocation232_spill] sm:$0xff] %v5089_v21  ;;  %v8045_v21 = vld [vmem:[#allocation104_spill] sm:$0xff]  ;;  %v5113_v39 = vsel %vm933_vm0, %v1166_v1, %v1168_v10  ;;  %v1177_v26 = vrot.slane %v4720_v19, 4  ;;  %v5117_v0 = vmax.f32 %v1165_v58, %v4903_v8  ;;  %v1179_v1 = vrot.slane %v4728_v15, 4  ;;  %v8048_v10 = vld [vmem:[#allocation102_spill] sm:$0xff] }
 0x1b3   :  { %v1175_v57 = vrot.slane %v8045_v21, 4  ;;  %v5120_v45 = vsel %vm933_vm0, %v1170_v56, %v1171_v43  ;;  %v5123_v51 = vsel %vm933_vm0, %v1171_v43, %v1173_v49  ;;  %v1181_v19 = vrot.slane %v8048_v10, 4  ;;  %v8049_v58 = vld [vmem:[#allocation106_spill] sm:$0xff]  ;;  %v8052_v43 = vld [vmem:[#allocation39_spill] sm:$0xff] }
 0x1b4   :  { %8046 = vst [vmem:[#allocation127_spill] sm:$0xff] %v5117_v0  ;;  %v1182_v8 = vrot.slane %v8049_v58, 4  ;;  %v8050_v0 = vld [vmem:[#allocation221_spill] sm:$0xff]  ;;  %v1222_v28 = vmax.f32 %v8052_v43, %v5013_v16  ;;  %v8054_v15 = vld [vmem:[#allocation198_spill] sm:$0xff] }
 0x1b5   :  { %v1176_v21 = vsel %vm933_vm0, %v1173_v49, %v1175_v57  ;;  %v5130_v24 = vsel %vm933_vm0, %v1175_v57, %v1177_v26  ;;  %v1184_v56 = vrot.slane %v8050_v0, 4  ;;  %v1180_v49 = vsel %vm933_vm0, %v1177_v26, %v1179_v1 }
 0x1b6   :  { %v5127_v4 = vmax.f32 %v1176_v21, %v4927_v9  ;;  %v8053_v9 = vld [vmem:[#allocation47_spill] sm:$0xff]  ;;  %v1225_v57 = vmax.f32 %v8014_v27, %v5024_v25  ;;  %v1183_v58 = vsel %vm933_vm0, %v1181_v19, %v1182_v8  ;;  %v1227_v16 = vmax.f32 %v8054_v15, %v5030_v22  ;;  %v8057_v19 = vld [vmem:[#allocation196_spill] sm:$0xff]  ;;  %v8059_v15 = vld [vmem:[#allocation82_spill] sm:$0xff] }
 0x1b7   :  { %v1223_v21 = vmax.f32 %v8053_v9, %v5016_v29  ;;  %v1185_v0 = vsel %vm933_vm0, %v1182_v8, %v1184_v56  ;;  %v1187_v55 = vsel %vm933_vm0, %v1184_v56, %v1186_v37  ;;  %v8056_v29 = vld [vmem:[#allocation199_spill] sm:$0xff]  ;;  %v1230_v25 = vmax.f32 %v8018_v20, %v5044_v2  ;;  %v8060_v2 = vld [vmem:[#allocation86_spill] sm:$0xff]  ;;  %v8066_v56 = vld [vmem:[#allocation105_spill] sm:$0xff] }
 0x1b8   :  { %8047 = vst [vmem:[#allocation131_spill] sm:$0xff] %v5127_v4  ;;  %v1226_v4 = vmax.f32 %v8015_v44, %v5027_v33  ;;  %v5152_v26 = vmax.f32 %v1187_v55, %v4963_v5  ;;  %v1228_v1 = vmax.f32 %v8056_v29, %v5033_v32  ;;  %v1231_v44 = vmax.f32 %v8019_v13, %v5047_v52  ;;  %v8058_v33 = vld [vmem:[#allocation195_spill] sm:$0xff]  ;;  %v8061_v52 = vld [vmem:[#allocation37_spill] sm:$0xff] }
 0x1b9   :  { %v1232_v27 = vmax.f32 %v8057_v19, %v5054_v12  ;;  %v1233_v8 = vmax.f32 %v8058_v33, %v5057_v61  ;;  %v1235_v22 = vmax.f32 %v8024_v31, %v5064_v42  ;;  %v1236_v5 = vmax.f32 %v8025_v3, %v5073_v40  ;;  %v8062_v61 = vld [vmem:[#allocation214_spill] sm:$0xff]  ;;  %v8063_v42 = vld [vmem:[#allocation99_spill] sm:$0xff]  ;;  %v8094_v55 = vld [vmem:[#allocation113_spill] sm:$0xff] }
 0x1ba   :  { %8055 = vst [vmem:[#allocation219_spill] sm:$0xff] %v5152_v26  ;;  %v1237_v32 = vmax.f32 %v8059_v15, %v5079_v63  ;;  %v1238_v20 = vmax.f32 %v8060_v2, %v5082_v48  ;;  %v1240_v13 = vmax.f32 %v8032_v11, %v5086_v35  ;;  %v1241_v12 = vmax.f32 %v8033_v47, %v5092_v7  ;;  %v8064_v47 = vld [vmem:[#allocation103_spill] sm:$0xff] }
 0x1bb   :  { %v1242_v31 = vmax.f32 %v8061_v52, %v5095_v36  ;;  %v1243_v3 = vmax.f32 %v8062_v61, %v5103_v14  ;;  %v1245_v63 = vmax.f32 %v8036_v23, %v5110_v34  ;;  %v1246_v48 = vmax.f32 %v8037_v60, %v5113_v39  ;;  %v8065_v14 = vld [vmem:[#allocation101_spill] sm:$0xff]  ;;  %v8085_v9 = vld [vmem:[#allocation59_spill] sm:$0xff]  ;;  %v8106_v61 = vld [vmem:[#allocation114_spill] sm:$0xff] }
 0x1bc   :  { %v1247_v11 = vmax.f32 %v8063_v42, %v5120_v45  ;;  %v1248_v40 = vmax.f32 %v8064_v47, %v5123_v51  ;;  %v1250_v36 = vmax.f32 %v8042_v54, %v5130_v24  ;;  %v1251_v35 = vmax.f32 %v8043_v41, %v1180_v49  ;;  %v8073_v24 = vld [vmem:[#allocation110_spill] sm:$0xff]  ;;  %v8097_v29 = vld [vmem:[#allocation79_spill] sm:$0xff]  ;;  %v8109_v47 = vld [vmem:[#allocation81_spill] sm:$0xff] }
 0x1bd   :  { %v1252_v7 = vmax.f32 %v8065_v14, %v1183_v58  ;;  %v1253_v23 = vmax.f32 %v8066_v56, %v1185_v0  ;;  %v1255_v34 = vmax.f32 %v8048_v10, %v1186_v37  ;;  %v8067_v60 = vmax.f32 %v8004_v17, %v4797_v38  ;;  %v8082_v10 = vld [vmem:[#allocation111_spill] sm:$0xff]  ;;  %v8090_v58 = vld [vmem:[#allocation112_spill] sm:$0xff]  ;;  %v8093_v0 = vld [vmem:[#allocation34_spill] sm:$0xff] }
 0x1be   :  { %v8069_v45 = vmax.f32 %v8005_v46, %v4800_v50  ;;  %v8071_v54 = vmax.f32 %v7947_v30, %v4806_v62  ;;  %v8074_v43 = vmax.f32 %v7948_v59, %v8073_v24  ;;  %v8076_v37 = vmax.f32 %v8007_v18, %v4818_v6  ;;  %v8081_v46 = vld [vmem:[#allocation54_spill] sm:$0xff]  ;;  %v8101_v33 = vld [vmem:[#allocation83_spill] sm:$0xff]  ;;  %v8110_v14 = vld [vmem:[#allocation117_spill] sm:$0xff] }
 0x1bf   :  { %v5201_v39 = vmax.f32 %v8067_v60, %v1222_v28  ;;  %v8078_v28 = vld [vmem:[#allocation222_spill] sm:$0xff]  ;;  %v8083_v30 = vmax.f32 %v8081_v46, %v8082_v10  ;;  %v8102_v15 = vld [vmem:[#allocation223_spill] sm:$0xff]  ;;  %v8113_v60 = vld [vmem:[#allocation85_spill] sm:$0xff] }
 0x1c0   :  { %v5206_v51 = vmax.f32 %v8069_v45, %v1223_v21  ;;  %v5211_v41 = vmax.f32 %v8071_v54, %v1225_v57  ;;  %v5216_v49 = vmax.f32 %v8074_v43, %v1226_v4  ;;  %v5221_v38 = vmax.f32 %v8076_v37, %v1227_v16  ;;  %v8086_v21 = vld [vmem:[#allocation109_spill] sm:$0xff]  ;;  %v8089_v57 = vld [vmem:[#allocation74_spill] sm:$0xff]  ;;  %v8105_v52 = vld [vmem:[#allocation207_spill] sm:$0xff] }
 0x1c1   :  { %8068 = vst [vmem:[#allocation233_spill] sm:$0xff] %v5201_v39  ;;  %v8079_v50 = vmax.f32 %v8008_v53, %v8078_v28  ;;  %v5231_v62 = vmax.f32 %v8083_v30, %v1230_v25  ;;  %v8087_v59 = vmax.f32 %v8085_v9, %v8086_v21  ;;  %v8091_v6 = vmax.f32 %v8089_v57, %v8090_v58  ;;  %v8117_v24 = vld [vmem:[#allocation210_spill] sm:$0xff]  ;;  %v8121_v28 = vld [vmem:[#allocation91_spill] sm:$0xff]  ;;  %v8125_v10 = vld [vmem:[#allocation212_spill] sm:$0xff] }
 0x1c2   :  { %8070 = vst [vmem:[#allocation128_spill] sm:$0xff] %v5206_v51  ;;  %v8095_v53 = vmax.f32 %v8093_v0, %v8094_v55  ;;  %v8103_v2 = vmax.f32 %v8101_v33, %v8102_v15  ;;  %v8107_v42 = vmax.f32 %v8105_v52, %v8106_v61  ;;  %v8126_v30 = vld [vmem:[#allocation227_spill] sm:$0xff]  ;;  %v8129_v21 = vld [vmem:[#allocation89_spill] sm:$0xff]  ;;  %v8133_v58 = vld [vmem:[#allocation92_spill] sm:$0xff] }
 0x1c3   :  { %8072 = vst [vmem:[#allocation132_spill] sm:$0xff] %v5211_v41  ;;  %v5226_v17 = vmax.f32 %v8079_v50, %v1228_v1  ;;  %v5236_v4 = vmax.f32 %v8087_v59, %v1231_v44  ;;  %v5241_v18 = vmax.f32 %v8091_v6, %v1232_v27  ;;  %v8098_v1 = vld [vmem:[#allocation48_spill] sm:$0xff]  ;;  %v8122_v50 = vld [vmem:[#allocation49_spill] sm:$0xff]  ;;  %v8127_v9 = vmax.f32 %v8125_v10, %v8126_v30  ;;  %v8130_v59 = vld [vmem:[#allocation119_spill] sm:$0xff] }
 0x1c4   :  { %8075 = vst [vmem:[#allocation235_spill] sm:$0xff] %v5216_v49  ;;  %v5246_v16 = vmax.f32 %v8095_v53, %v1233_v8  ;;  %v8099_v19 = vmax.f32 %v8097_v29, %v8098_v1  ;;  %v5256_v44 = vmax.f32 %v8103_v2, %v1236_v5  ;;  %v5261_v27 = vmax.f32 %v8107_v42, %v1237_v32  ;;  %v8118_v5 = vld [vmem:[#allocation115_spill] sm:$0xff]  ;;  %v8137_v55 = vld [vmem:[#allocation97_spill] sm:$0xff]  ;;  %v8138_v53 = vld [vmem:[#allocation228_spill] sm:$0xff] }
 0x1c5   :  { %8077 = vst [vmem:[#allocation129_spill] sm:$0xff] %v5221_v38  ;;  %v8111_v8 = vmax.f32 %v8109_v47, %v8110_v14  ;;  %v8119_v43 = vmax.f32 %v8117_v24, %v8118_v5  ;;  %v8123_v32 = vmax.f32 %v8121_v28, %v8122_v50  ;;  %v8131_v57 = vmax.f32 %v8129_v21, %v8130_v59  ;;  %v8134_v6 = vld [vmem:[#allocation123_spill] sm:$0xff]  ;;  %v8145_v15 = vld [vmem:[#allocation98_spill] sm:$0xff]  ;;  %v8146_v2 = vld [vmem:[#allocation124_spill] sm:$0xff] }
 0x1c6   :  { %8080 = vst [vmem:[#allocation133_spill] sm:$0xff] %v5226_v17  ;;  %v5251_v25 = vmax.f32 %v8099_v19, %v1235_v22  ;;  %v8114_v22 = vld [vmem:[#allocation226_spill] sm:$0xff]  ;;  %v8135_v0 = vmax.f32 %v8133_v58, %v8134_v6  ;;  %v8139_v29 = vmax.f32 %v8137_v55, %v8138_v53  ;;  %v8141_v1 = vld [vmem:[#allocation95_spill] sm:$0xff]  ;;  %v8142_v19 = vld [vmem:[#allocation120_spill] sm:$0xff]  ;;  %v8147_v52 = vmax.f32 %v8145_v15, %v8146_v2 }
 0x1c7   :  { %8084 = vst [vmem:[#allocation236_spill] sm:$0xff] %v5231_v62  ;;  %v5266_v56 = vmax.f32 %v8111_v8, %v1238_v20  ;;  %v8115_v45 = vmax.f32 %v8113_v60, %v8114_v22  ;;  %v5276_v37 = vmax.f32 %v8119_v43, %v1241_v12  ;;  %v5281_v46 = vmax.f32 %v8123_v32, %v1242_v31  ;;  %v8149_v61 = vld [vmem:[#allocation216_spill] sm:$0xff]  ;;  %v8150_v42 = vld [vmem:[#allocation121_spill] sm:$0xff]  ;;  %v8157_v22 = vld [vmem:[#allocation218_spill] sm:$0xff] }
 0x1c8   :  { %8088 = vst [vmem:[#allocation130_spill] sm:$0xff] %v5236_v4  ;;  %v5286_v20 = vmax.f32 %v8127_v9, %v1243_v3  ;;  %v5296_v12 = vmax.f32 %v8135_v0, %v1246_v48  ;;  %v5301_v31 = vmax.f32 %v8139_v29, %v1247_v11  ;;  %v8143_v33 = vmax.f32 %v8141_v1, %v8142_v19  ;;  %v8153_v14 = vld [vmem:[#allocation205_spill] sm:$0xff]  ;;  %v8163_v32 = vld [vmem:[#allocation122_spill] sm:$0xff]  ;;  %v8165_v58 = vld [vmem:[#allocation55_spill] sm:$0xff] }
 0x1c9   :  { %8092 = vst [vmem:[#allocation136_spill] sm:$0xff] %v5241_v18  ;;  %v5271_v54 = vmax.f32 %v8115_v45, %v1240_v13  ;;  %v5291_v13 = vmax.f32 %v8131_v57, %v1245_v63  ;;  %v5311_v63 = vmax.f32 %v8147_v52, %v1250_v36  ;;  %v8151_v47 = vmax.f32 %v8149_v61, %v8150_v42  ;;  %v8154_v8 = vld [vmem:[#allocation125_spill] sm:$0xff]  ;;  %v8158_v45 = vld [vmem:[#allocation50_spill] sm:$0xff]  ;;  %v8166_v29 = vld [vmem:[#allocation232_spill] sm:$0xff] }
 0x1ca   :  { %8096 = vst [vmem:[#allocation56_spill] sm:$0xff] %v5246_v16  ;;  %v5306_v3 = vmax.f32 %v8143_v33, %v1248_v40  ;;  %v8155_v60 = vmax.f32 %v8153_v14, %v8154_v8  ;;  %v8159_v24 = vmax.f32 %v8157_v22, %v8158_v45  ;;  %v8161_v5 = vld [vmem:[#allocation229_spill] sm:$0xff]  ;;  %v1290_v36 = vstv %s5176_s4  ;;  %v8164_v30 = vld [vmem:[#allocation126_spill] sm:$0xff]  ;;  %v8167_v2 = vld [vmem:[#allocation127_spill] sm:$0xff]  ;;  %s6519_s4 = sld [smem:[#allocation12]] }
 0x1cb   :  { %8100 = vst [vmem:[#allocation237_spill] sm:$0xff] %v5251_v25  ;;  %v5316_v48 = vmax.f32 %v8151_v47, %v1251_v35  ;;  %v5329_v43 = vmax.f32 %v8161_v5, %v1255_v34  ;;  %v1314_v28 = vstv %s5186_s6  ;;  %v5334_v50 = vmul.f32 %v1290_v36, %v5201_v39  ;;  %v8171_v14 = vld [vmem:[#allocation131_spill] sm:$0xff]  ;;  %s6521_s6 = sld [smem:[#allocation12 + $0x1]] }
 0x1cc   :  { %8104 = vst [vmem:[#allocation134_spill] sm:$0xff] %v5256_v44  ;;  %v5321_v11 = vmax.f32 %v8155_v60, %v1252_v7  ;;  %v5326_v40 = vmax.f32 %v8159_v24, %v1253_v23  ;;  %v5337_v35 = vmul.f32 %v1290_v36, %v5206_v51  ;;  %v5340_v10 = vmul.f32 %v1290_v36, %v8163_v32 }
 0x1cd   :  { %8108 = vst [vmem:[#allocation137_spill] sm:$0xff] %v5261_v27  ;;  %v5343_v7 = vmul.f32 %v1290_v36, %v5211_v41  ;;  %v5346_v23 = vmul.f32 %v1290_v36, %v5221_v38  ;;  %v5349_v34 = vmul.f32 %v1290_v36, %v5226_v17  ;;  %v5352_v9 = vmul.f32 %v1290_v36, %v8164_v30 }
 0x1ce   :  { %8112 = vst [vmem:[#allocation57_spill] sm:$0xff] %v5266_v56  ;;  %v5355_v21 = vmul.f32 %v1290_v36, %v5231_v62  ;;  %v5358_v59 = vmul.f32 %v1290_v36, %v5241_v18  ;;  %v5361_v57 = vmul.f32 %v1290_v36, %v5246_v16  ;;  %v5364_v6 = vmul.f32 %v1290_v36, %v8165_v58 }
 0x1cf   :  { %8116 = vst [vmem:[#allocation238_spill] sm:$0xff] %v5271_v54  ;;  %v5367_v0 = vmul.f32 %v1290_v36, %v5251_v25  ;;  %v5370_v55 = vmul.f32 %v1290_v36, %v5261_v27  ;;  %v5373_v53 = vmul.f32 %v1290_v36, %v5266_v56  ;;  %v5376_v1 = vmul.f32 %v1290_v36, %v8166_v29 }
 0x1d0   :  { %8120 = vst [vmem:[#allocation135_spill] sm:$0xff] %v5276_v37  ;;  %v5379_v19 = vmul.f32 %v1290_v36, %v5271_v54  ;;  %v5382_v33 = vmul.f32 %v1290_v36, %v5281_v46  ;;  %v5385_v15 = vmul.f32 %v1290_v36, %v5286_v20  ;;  %v5388_v52 = vmul.f32 %v1290_v36, %v8167_v2 }
 0x1d1   :  { %8124 = vst [vmem:[#allocation138_spill] sm:$0xff] %v5281_v46  ;;  %v5391_v61 = vmul.f32 %v1290_v36, %v5291_v13  ;;  %v5394_v42 = vmul.f32 %v1290_v36, %v5301_v31  ;;  %v5397_v47 = vmul.f32 %v1290_v36, %v5306_v3  ;;  %v5400_v8 = vmul.f32 %v1290_v36, %v8171_v14 }
 0x1d2   :  { %8128 = vst [vmem:[#allocation224_spill] sm:$0xff] %v5286_v20  ;;  %v1315_v60 = vmul.f32 %v1314_v28, %v5201_v39  ;;  %v1316_v22 = vmul.f32 %v1314_v28, %v5206_v51  ;;  %v1317_v45 = vmul.f32 %v1314_v28, %v8163_v32  ;;  %v1318_v24 = vmul.f32 %v1314_v28, %v5211_v41 }
 0x1d3   :  { %8132 = vst [vmem:[#allocation239_spill] sm:$0xff] %v5291_v13  ;;  %v1319_v5 = vmul.f32 %v1314_v28, %v5216_v49  ;;  %v1322_v26 = vmul.f32 %v1314_v28, %v8164_v30  ;;  %v1324_v36 = vmul.f32 %v1314_v28, %v5236_v4  ;;  %v1325_v39 = vmul.f32 %v1314_v28, %v5241_v18 }
 0x1d4   :  { %8136 = vst [vmem:[#allocation139_spill] sm:$0xff] %v5296_v12  ;;  %v1326_v51 = vmul.f32 %v1314_v28, %v5246_v16  ;;  %v1327_v32 = vmul.f32 %v1314_v28, %v8165_v58  ;;  %v1328_v41 = vmul.f32 %v1314_v28, %v5251_v25  ;;  %v1329_v49 = vmul.f32 %v1314_v28, %v5256_v44 }
 0x1d5   :  { %8140 = vst [vmem:[#allocation142_spill] sm:$0xff] %v5301_v31  ;;  %v1332_v30 = vmul.f32 %v1314_v28, %v8166_v29  ;;  %v1334_v4 = vmul.f32 %v1314_v28, %v5276_v37  ;;  %v1335_v18 = vmul.f32 %v1314_v28, %v5281_v46  ;;  %v1336_v16 = vmul.f32 %v1314_v28, %v5286_v20 }
 0x1d6   :  { %8144 = vst [vmem:[#allocation66_spill] sm:$0xff] %v5306_v3  ;;  %v1337_v58 = vmul.f32 %v1314_v28, %v8167_v2  ;;  %v1338_v25 = vmul.f32 %v1314_v28, %v5291_v13  ;;  %v1339_v44 = vmul.f32 %v1314_v28, %v5296_v12  ;;  %v1342_v29 = vmul.f32 %v1314_v28, %v8171_v14 }
 0x1d7   :  { %8148 = vst [vmem:[#allocation140_spill] sm:$0xff] %v5311_v63  ;;  %v1374_v37 = vrot.slane %v1316_v22, 4  ;;  %v1378_v46 = vrot.slane %v1318_v24, 4  ;;  %v1385_v2 = vrot.slane %v1322_v26, 4  ;;  %v1398_v24 = vrot.slane %v1329_v49, 4 }
 0x1d8   :  { %8152 = vst [vmem:[#allocation143_spill] sm:$0xff] %v5316_v48  ;;  %v1321_v48 = vmul.f32 %v1314_v28, %v5226_v17  ;;  %v1331_v17 = vmul.f32 %v1314_v28, %v5266_v56  ;;  %v1341_v56 = vmul.f32 %v1314_v28, %v5306_v3 }
 0x1d9   :  { %8156 = vst [vmem:[#allocation141_spill] sm:$0xff] %v5321_v11  ;;  %v1330_v11 = vmul.f32 %v1314_v28, %v5261_v27  ;;  %v1340_v27 = vmul.f32 %v1314_v28, %v5301_v31 }
 0x1da   :  { %8160 = vst [vmem:[#allocation144_spill] sm:$0xff] %v5326_v40  ;;  %v1323_v40 = vmul.f32 %v1314_v28, %v5231_v62  ;;  %v1333_v62 = vmul.f32 %v1314_v28, %v5271_v54  ;;  %v1343_v54 = vmul.f32 %v1314_v28, %v5311_v63 }
 0x1db   :  { %8162 = vst [vmem:[#allocation58_spill] sm:$0xff] %v5329_v43  ;;  %v1320_v43 = vmul.f32 %v1314_v28, %v5221_v38  ;;  %v1373_v38 = vrot.slane %v1315_v60, 4  ;;  %v1389_v60 = vrot.slane %v1324_v36, 4  ;;  %v1414_v36 = vrot.slane %v1338_v25, 4 }
 0x1dc   :  { %8168 = vst [vmem:[#allocation241_spill] sm:$0xff] %v5391_v61  ;;  %v1387_v61 = vrot.slane %v1323_v40, 4 }
 0x1dd   :  { %8169 = vst [vmem:[#allocation145_spill] sm:$0xff] %v5394_v42  ;;  %v1382_v20 = vrot.slane %v1320_v43, 4  ;;  %v1383_v42 = vrot.slane %v1321_v48, 4  ;;  %v1375_v13 = vsel %vm933_vm0, %v1373_v38, %v1374_v37  ;;  %v1392_v43 = vrot.slane %v1326_v51, 4 }
 0x1de   :  { %8170 = vst [vmem:[#allocation149_spill] sm:$0xff] %v5397_v47  ;;  %v1380_v47 = vrot.slane %v1319_v5, 4  ;;  %v1388_v22 = vsel %vm933_vm0, %v1385_v2, %v1387_v61  ;;  %v1394_v48 = vrot.slane %v1327_v32, 4  ;;  %v1390_v26 = vsel %vm933_vm0, %v1387_v61, %v1389_v60 }
 0x1df   :  { %8172 = vst [vmem:[#allocation63_spill] sm:$0xff] %v5400_v8  ;;  %v1376_v8 = vrot.slane %v1317_v45, 4  ;;  %v1384_v14 = vsel %vm933_vm0, %v1382_v20, %v1383_v42  ;;  %v1386_v28 = vsel %vm933_vm0, %v1383_v42, %v1385_v2  ;;  %v1391_v45 = vrot.slane %v1325_v39, 4 }
 0x1e0   :  { %v1381_v3 = vsel %vm933_vm0, %v1378_v46, %v1380_v47  ;;  %v1396_v38 = vrot.slane %v1328_v41, 4  ;;  %v1395_v40 = vsel %vm933_vm0, %v1392_v43, %v1394_v48  ;;  %v1403_v47 = vrot.slane %v1332_v30, 4 }
 0x1e1   :  { %v1377_v12 = vsel %vm933_vm0, %v1374_v37, %v1376_v8  ;;  %v1379_v31 = vsel %vm933_vm0, %v1376_v8, %v1378_v46  ;;  %v1400_v37 = vrot.slane %v1330_v11, 4  ;;  %v1393_v8 = vsel %vm933_vm0, %v1391_v45, %v1392_v43 }
 0x1e2   :  { %v1401_v46 = vrot.slane %v1331_v17, 4  ;;  %v1397_v20 = vsel %vm933_vm0, %v1394_v48, %v1396_v38  ;;  %v1399_v42 = vsel %vm933_vm0, %v1396_v38, %v1398_v24  ;;  %v1405_v5 = vrot.slane %v1333_v62, 4 }
 0x1e3   :  { %v1407_v2 = vrot.slane %v1334_v4, 4  ;;  %v1409_v32 = vrot.slane %v1335_v18, 4  ;;  %v1410_v41 = vrot.slane %v1336_v16, 4  ;;  %v1412_v61 = vrot.slane %v1337_v58, 4 }
 0x1e4   :  { %v1402_v39 = vsel %vm933_vm0, %v1400_v37, %v1401_v46  ;;  %v1404_v51 = vsel %vm933_vm0, %v1401_v46, %v1403_v47  ;;  %v1406_v49 = vsel %vm933_vm0, %v1403_v47, %v1405_v5  ;;  %v1416_v30 = vrot.slane %v1339_v44, 4  ;;  %v8203_v37 = vld [vmem:[#allocation236_spill] sm:$0xff] }
 0x1e5   :  { %v1408_v11 = vsel %vm933_vm0, %v1405_v5, %v1407_v2  ;;  %v1411_v17 = vsel %vm933_vm0, %v1409_v32, %v1410_v41  ;;  %v1418_v60 = vrot.slane %v1340_v27, 4  ;;  %v1419_v62 = vrot.slane %v1341_v56, 4  ;;  %v8205_v47 = vld [vmem:[#allocation56_spill] sm:$0xff]  ;;  %v8207_v2 = vld [vmem:[#allocation237_spill] sm:$0xff] }
 0x1e6   :  { %v1413_v4 = vsel %vm933_vm0, %v1410_v41, %v1412_v61  ;;  %v1415_v45 = vsel %vm933_vm0, %v1412_v61, %v1414_v36  ;;  %v1421_v43 = vrot.slane %v1342_v29, 4  ;;  %v1423_v18 = vrot.slane %v1343_v54, 4  ;;  %v8209_v41 = vld [vmem:[#allocation57_spill] sm:$0xff] }
 0x1e7   :  { %v1417_v16 = vsel %vm933_vm0, %v1414_v36, %v1416_v30  ;;  %v1420_v48 = vsel %vm933_vm0, %v1418_v60, %v1419_v62  ;;  %v5455_v58 = vadd.f32 %v1375_v13, %v5334_v50  ;;  %v5458_v25 = vadd.f32 %v1377_v12, %v5337_v35  ;;  %v8211_v36 = vld [vmem:[#allocation238_spill] sm:$0xff] }
 0x1e8   :  { %v1422_v44 = vsel %vm933_vm0, %v1419_v62, %v1421_v43  ;;  %v1424_v27 = vsel %vm933_vm0, %v1421_v43, %v1423_v18  ;;  %v5463_v56 = vadd.f32 %v1379_v31, %v5340_v10  ;;  %v5466_v29 = vadd.f32 %v1381_v3, %v5343_v7  ;;  %v8212_v30 = vld [vmem:[#allocation138_spill] sm:$0xff]  ;;  %v8213_v62 = vld [vmem:[#allocation224_spill] sm:$0xff]  ;;  %v8215_v18 = vld [vmem:[#allocation239_spill] sm:$0xff] }
 0x1e9   :  { %8173 = vst [vmem:[#allocation202_spill] sm:$0xff] %v5455_v58  ;;  %v5469_v54 = vadd.f32 %v1384_v14, %v5346_v23  ;;  %v5472_v38 = vadd.f32 %v1386_v28, %v5349_v34  ;;  %v5475_v13 = vadd.f32 %v1388_v22, %v5352_v9  ;;  %v5478_v12 = vadd.f32 %v1390_v26, %v5355_v21  ;;  %v8200_v28 = vld [vmem:[#allocation129_spill] sm:$0xff] }
 0x1ea   :  { %8174 = vst [vmem:[#allocation146_spill] sm:$0xff] %v5458_v25  ;;  %v5481_v50 = vadd.f32 %v1393_v8, %v5358_v59  ;;  %v5484_v31 = vadd.f32 %v1395_v40, %v5361_v57  ;;  %v5487_v3 = vadd.f32 %v1397_v20, %v5364_v6  ;;  %v5490_v35 = vadd.f32 %v1399_v42, %v5367_v0  ;;  %v8192_v57 = vld [vmem:[#allocation241_spill] sm:$0xff]  ;;  %v8204_v40 = vld [vmem:[#allocation136_spill] sm:$0xff]  ;;  %v8206_v42 = vld [vmem:[#allocation55_spill] sm:$0xff] }
 0x1eb   :  { %8175 = vst [vmem:[#allocation150_spill] sm:$0xff] %v5463_v56  ;;  %v5495_v10 = vadd.f32 %v1402_v39, %v5370_v55  ;;  %v5498_v7 = vadd.f32 %v1404_v51, %v5373_v53  ;;  %v5501_v23 = vadd.f32 %v1406_v49, %v5376_v1  ;;  %v5504_v34 = vadd.f32 %v1408_v11, %v5379_v19  ;;  %v8194_v0 = vld [vmem:[#allocation145_spill] sm:$0xff]  ;;  %v8198_v19 = vld [vmem:[#allocation63_spill] sm:$0xff]  ;;  %v8210_v11 = vld [vmem:[#allocation232_spill] sm:$0xff] }
 0x1ec   :  { %8176 = vst [vmem:[#allocation230_spill] sm:$0xff] %v5466_v29  ;;  %v5507_v9 = vadd.f32 %v1411_v17, %v5382_v33  ;;  %v5510_v21 = vadd.f32 %v1413_v4, %v5385_v15  ;;  %v5513_v59 = vadd.f32 %v1415_v45, %v5388_v52  ;;  %v5516_v6 = vadd.f32 %v1417_v16, %v8192_v57  ;;  %v8196_v53 = vld [vmem:[#allocation149_spill] sm:$0xff]  ;;  %v8202_v52 = vld [vmem:[#allocation126_spill] sm:$0xff]  ;;  %v8214_v45 = vld [vmem:[#allocation127_spill] sm:$0xff] }
 0x1ed   :  { %8177 = vst [vmem:[#allocation67_spill] sm:$0xff] %v5469_v54  ;;  %v5519_v55 = vadd.f32 %v1420_v48, %v8194_v0  ;;  %v5522_v1 = vadd.f32 %v1422_v44, %v8196_v53  ;;  %v5525_v14 = vadd.f32 %v1424_v27, %v8198_v19  ;;  %v1471_v33 = vstv %s5447_s8  ;;  %v8201_v15 = vld [vmem:[#allocation133_spill] sm:$0xff]  ;;  %v8216_v48 = vld [vmem:[#allocation142_spill] sm:$0xff]  ;;  %v8218_v0 = vld [vmem:[#allocation131_spill] sm:$0xff]  ;;  %s6526_s8 = sld [smem:[#allocation12 + $0x2]] }
 0x1ee   :  { %8178 = vst [vmem:[#allocation147_spill] sm:$0xff] %v5472_v38  ;;  %v5529_v22 = vmul.f32 %v1471_v33, %v8200_v28  ;;  %v5532_v26 = vmul.f32 %v1471_v33, %v8201_v15  ;;  %v5535_v24 = vmul.f32 %v1471_v33, %v8202_v52  ;;  %v5538_v8 = vmul.f32 %v1471_v33, %v8203_v37  ;;  %v8208_v51 = vld [vmem:[#allocation137_spill] sm:$0xff]  ;;  %v8217_v27 = vld [vmem:[#allocation66_spill] sm:$0xff]  ;;  %v8228_v54 = vld [vmem:[#allocation135_spill] sm:$0xff] }
 0x1ef   :  { %8179 = vst [vmem:[#allocation151_spill] sm:$0xff] %v5475_v13  ;;  %v5541_v46 = vmul.f32 %v1471_v33, %v8204_v40  ;;  %v5544_v20 = vmul.f32 %v1471_v33, %v8205_v47  ;;  %v5547_v5 = vmul.f32 %v1471_v33, %v8206_v42  ;;  %v5550_v39 = vmul.f32 %v1471_v33, %v8207_v2  ;;  %v8227_v13 = vld [vmem:[#allocation134_spill] sm:$0xff]  ;;  %v8229_v29 = vld [vmem:[#allocation139_spill] sm:$0xff] }
 0x1f0   :  { %8180 = vst [vmem:[#allocation231_spill] sm:$0xff] %v5478_v12  ;;  %v5553_v32 = vmul.f32 %v1471_v33, %v8208_v51  ;;  %v5556_v49 = vmul.f32 %v1471_v33, %v8209_v41  ;;  %v5559_v61 = vmul.f32 %v1471_v33, %v8210_v11  ;;  %v5562_v17 = vmul.f32 %v1471_v33, %v8211_v36  ;;  %v8230_v56 = vld [vmem:[#allocation143_spill] sm:$0xff]  ;;  %v8231_v25 = vld [vmem:[#allocation58_spill] sm:$0xff] }
 0x1f1   :  { %8181 = vst [vmem:[#allocation69_spill] sm:$0xff] %v5481_v50  ;;  %v5565_v60 = vmul.f32 %v1471_v33, %v8212_v30  ;;  %v5568_v4 = vmul.f32 %v1471_v33, %v8213_v62  ;;  %v5571_v43 = vmul.f32 %v1471_v33, %v8214_v45  ;;  %v5574_v16 = vmul.f32 %v1471_v33, %v8215_v18 }
 0x1f2   :  { %8182 = vst [vmem:[#allocation148_spill] sm:$0xff] %v5484_v31  ;;  %v5577_v44 = vmul.f32 %v1471_v33, %v8216_v48  ;;  %v5580_v57 = vmul.f32 %v1471_v33, %v8217_v27  ;;  %v5583_v53 = vmul.f32 %v1471_v33, %v8218_v0  ;;  %v5586_v19 = vmul.f32 %v1471_v33, %v5311_v63 }
 0x1f3   :  { %8183 = vst [vmem:[#allocation152_spill] sm:$0xff] %v5487_v3 }
 0x1f4   :  { %8184 = vst [vmem:[#allocation242_spill] sm:$0xff] %v5490_v35  ;;  %v8226_v35 = vld [vmem:[#allocation130_spill] sm:$0xff] }
 0x1f5   :  { %8185 = vst [vmem:[#allocation153_spill] sm:$0xff] %v5495_v10 }
 0x1f6   :  { %8186 = vst [vmem:[#allocation157_spill] sm:$0xff] %v5498_v7 }
 0x1f7   :  { %8187 = vst [vmem:[#allocation64_spill] sm:$0xff] %v5501_v23 }
 0x1f8   :  { %8188 = vst [vmem:[#allocation243_spill] sm:$0xff] %v5504_v34 }
 0x1f9   :  { %8189 = vst [vmem:[#allocation154_spill] sm:$0xff] %v5507_v9  ;;  %v1495_v9 = vstv %s5492_s21  ;;  %s6528_s21 = sld [smem:[#allocation12 + $0x3]] }
 0x1fa   :  { %8190 = vst [vmem:[#allocation158_spill] sm:$0xff] %v5510_v21  ;;  %v1496_v34 = vmul.f32 %v1495_v9, %v8200_v28  ;;  %v1497_v23 = vmul.f32 %v1495_v9, %v8201_v15  ;;  %v1498_v7 = vmul.f32 %v1495_v9, %v8202_v52  ;;  %v1499_v10 = vmul.f32 %v1495_v9, %v8203_v37 }
 0x1fb   :  { %8191 = vst [vmem:[#allocation193_spill] sm:$0xff] %v5513_v59  ;;  %v8224_v59 = vld [vmem:[#allocation219_spill] sm:$0xff]  ;;  %v1500_v3 = vmul.f32 %v1495_v9, %v8226_v35  ;;  %v1501_v31 = vmul.f32 %v1495_v9, %v8204_v40  ;;  %v1502_v50 = vmul.f32 %v1495_v9, %v8205_v47  ;;  %v1503_v12 = vmul.f32 %v1495_v9, %v8206_v42 }
 0x1fc   :  { %8193 = vst [vmem:[#allocation155_spill] sm:$0xff] %v5516_v6  ;;  %v5595_v21 = vmul.f32 %v1471_v33, %v8224_v59  ;;  %v1505_v38 = vmul.f32 %v1495_v9, %v8227_v13  ;;  %v1506_v28 = vmul.f32 %v1495_v9, %v8208_v51  ;;  %v1507_v15 = vmul.f32 %v1495_v9, %v8209_v41 }
 0x1fd   :  { %8195 = vst [vmem:[#allocation159_spill] sm:$0xff] %v5519_v55  ;;  %v8222_v55 = vld [vmem:[#allocation144_spill] sm:$0xff]  ;;  %v1508_v52 = vmul.f32 %v1495_v9, %v8210_v11  ;;  %v1509_v37 = vmul.f32 %v1495_v9, %v8211_v36  ;;  %v1510_v35 = vmul.f32 %v1495_v9, %v8228_v54  ;;  %v1511_v40 = vmul.f32 %v1495_v9, %v8212_v30 }
 0x1fe   :  { %8197 = vst [vmem:[#allocation244_spill] sm:$0xff] %v5522_v1  ;;  %v5592_v6 = vmul.f32 %v1471_v33, %v8222_v55  ;;  %v1512_v47 = vmul.f32 %v1495_v9, %v8213_v62  ;;  %v1513_v42 = vmul.f32 %v1495_v9, %v8214_v45  ;;  %v1515_v13 = vmul.f32 %v1495_v9, %v8229_v29 }
 0x1ff   :  { %8199 = vst [vmem:[#allocation156_spill] sm:$0xff] %v5525_v14  ;;  %v8220_v14 = vld [vmem:[#allocation141_spill] sm:$0xff]  ;;  %v1516_v51 = vmul.f32 %v1495_v9, %v8216_v48  ;;  %v1517_v41 = vmul.f32 %v1495_v9, %v8217_v27  ;;  %v1518_v11 = vmul.f32 %v1495_v9, %v8218_v0  ;;  %v1519_v36 = vmul.f32 %v1495_v9, %v5311_v63 }
 0x200   :  { %8219 = vst [vmem:[#allocation160_spill] sm:$0xff] %v5586_v19  ;;  %v5589_v1 = vmul.f32 %v1471_v33, %v8220_v14  ;;  %v1504_v33 = vmul.f32 %v1495_v9, %v8207_v2  ;;  %v1514_v2 = vmul.f32 %v1495_v9, %v8215_v18  ;;  %v1520_v54 = vmul.f32 %v1495_v9, %v8230_v56 }
 0x201   :  { %8223 = vst [vmem:[#allocation245_spill] sm:$0xff] %v5592_v6  ;;  %v1521_v30 = vmul.f32 %v1495_v9, %v8220_v14  ;;  %v1522_v62 = vmul.f32 %v1495_v9, %v8222_v55  ;;  %v1523_v45 = vmul.f32 %v1495_v9, %v8224_v59  ;;  %v1524_v18 = vmul.f32 %v1495_v9, %v8231_v25 }
 0x202   :  { %8221 = vst [vmem:[#allocation65_spill] sm:$0xff] %v5589_v1  ;;  %v1554_v58 = vrot.slane %v1496_v34, 4  ;;  %v1555_v29 = vrot.slane %v1497_v23, 4  ;;  %v1559_v48 = vrot.slane %v1499_v10, 4  ;;  %v1561_v6 = vrot.slane %v1500_v3, 4 }
 0x203   :  { %8225 = vst [vmem:[#allocation161_spill] sm:$0xff] %v5595_v21  ;;  %v1557_v21 = vrot.slane %v1498_v7, 4  ;;  %v1563_v27 = vrot.slane %v1501_v31, 4  ;;  %v1564_v1 = vrot.slane %v1502_v50, 4  ;;  %v1566_v56 = vrot.slane %v1503_v12, 4 }
 0x204   :  { %v1556_v0 = vsel %vm933_vm0, %v1554_v58, %v1555_v29  ;;  %v1568_v19 = vrot.slane %v1504_v33, 4  ;;  %v1562_v55 = vsel %vm933_vm0, %v1559_v48, %v1561_v6  ;;  %v1570_v9 = vrot.slane %v1505_v38, 4 }
 0x205   :  { %v1558_v63 = vsel %vm933_vm0, %v1555_v29, %v1557_v21  ;;  %v1560_v14 = vsel %vm933_vm0, %v1557_v21, %v1559_v48  ;;  %v1565_v59 = vsel %vm933_vm0, %v1563_v27, %v1564_v1  ;;  %v1567_v23 = vsel %vm933_vm0, %v1564_v1, %v1566_v56 }
 0x206   :  { %v1569_v10 = vsel %vm933_vm0, %v1566_v56, %v1568_v19  ;;  %v1572_v3 = vrot.slane %v1506_v28, 4  ;;  %v1573_v31 = vrot.slane %v1507_v15, 4  ;;  %v1571_v50 = vsel %vm933_vm0, %v1568_v19, %v1570_v9 }
 0x207   :  { %v1575_v58 = vrot.slane %v1508_v52, 4  ;;  %v1577_v7 = vrot.slane %v1509_v37, 4  ;;  %v1579_v29 = vrot.slane %v1510_v35, 4  ;;  %v1581_v34 = vrot.slane %v1511_v40, 4 }
 0x208   :  { %v1574_v12 = vsel %vm933_vm0, %v1572_v3, %v1573_v31  ;;  %v1582_v21 = vrot.slane %v1512_v47, 4  ;;  %v1584_v33 = vrot.slane %v1513_v42, 4  ;;  %v1586_v48 = vrot.slane %v1514_v2, 4 }
 0x209   :  { %v1576_v6 = vsel %vm933_vm0, %v1573_v31, %v1575_v58  ;;  %v1578_v38 = vsel %vm933_vm0, %v1575_v58, %v1577_v7  ;;  %v1580_v1 = vsel %vm933_vm0, %v1577_v7, %v1579_v29  ;;  %v1588_v15 = vrot.slane %v1515_v13, 4 }
 0x20a   :  { %v1583_v56 = vsel %vm933_vm0, %v1581_v34, %v1582_v21  ;;  %v1585_v28 = vsel %vm933_vm0, %v1582_v21, %v1584_v33  ;;  %v1590_v52 = vrot.slane %v1516_v51, 4  ;;  %v1587_v35 = vsel %vm933_vm0, %v1584_v33, %v1586_v48  ;;  %v8239_v21 = vld [vmem:[#allocation230_spill] sm:$0xff]  ;;  %v8240_v33 = vld [vmem:[#allocation67_spill] sm:$0xff] }
 0x20b   :  { %v1591_v37 = vrot.slane %v1517_v41, 4  ;;  %v1593_v27 = vrot.slane %v1518_v11, 4  ;;  %v1595_v40 = vrot.slane %v1519_v36, 4  ;;  %v1589_v47 = vsel %vm933_vm0, %v1586_v48, %v1588_v15  ;;  %v8243_v48 = vld [vmem:[#allocation231_spill] sm:$0xff] }
 0x20c   :  { %v1597_v42 = vrot.slane %v1520_v54, 4  ;;  %v1599_v19 = vrot.slane %v1521_v30, 4  ;;  %v1600_v9 = vrot.slane %v1522_v62, 4  ;;  %v1602_v58 = vrot.slane %v1523_v45, 4 }
 0x20d   :  { %v1592_v3 = vsel %vm933_vm0, %v1590_v52, %v1591_v37  ;;  %v1594_v2 = vsel %vm933_vm0, %v1591_v37, %v1593_v27  ;;  %v1596_v31 = vsel %vm933_vm0, %v1593_v27, %v1595_v40  ;;  %v1604_v7 = vrot.slane %v1524_v18, 4  ;;  %v8245_v52 = vld [vmem:[#allocation148_spill] sm:$0xff] }
 0x20e   :  { %v1598_v13 = vsel %vm933_vm0, %v1595_v40, %v1597_v42  ;;  %v1601_v51 = vsel %vm933_vm0, %v1599_v19, %v1600_v9  ;;  %v1629_v41 = vadd.f32 %v1556_v0, %v5529_v22  ;;  %v1603_v11 = vsel %vm933_vm0, %v1600_v9, %v1602_v58  ;;  %v8246_v37 = vld [vmem:[#allocation152_spill] sm:$0xff]  ;;  %v8247_v40 = vld [vmem:[#allocation242_spill] sm:$0xff]  ;;  %v8248_v42 = vld [vmem:[#allocation153_spill] sm:$0xff] }
 0x20f   :  { %v1630_v54 = vadd.f32 %v1558_v63, %v5532_v26  ;;  %v1631_v36 = vadd.f32 %v1560_v14, %v5535_v24  ;;  %v1632_v30 = vadd.f32 %v1562_v55, %v5538_v8  ;;  %v1605_v62 = vsel %vm933_vm0, %v1602_v58, %v1604_v7  ;;  %v8249_v9 = vld [vmem:[#allocation157_spill] sm:$0xff]  ;;  %v8251_v58 = vld [vmem:[#allocation243_spill] sm:$0xff] }
 0x210   :  { %v1633_v29 = vadd.f32 %v1565_v59, %v5541_v46  ;;  %v1634_v45 = vadd.f32 %v1567_v23, %v5544_v20  ;;  %v1635_v34 = vadd.f32 %v1569_v10, %v5547_v5  ;;  %v1636_v18 = vadd.f32 %v1571_v50, %v5550_v39  ;;  %v8232_v5 = vld [vmem:[#allocation160_spill] sm:$0xff]  ;;  %v8235_v23 = vld [vmem:[#allocation161_spill] sm:$0xff]  ;;  %v8236_v10 = vld [vmem:[#allocation202_spill] sm:$0xff] }
 0x211   :  { %v1637_v22 = vadd.f32 %v1574_v12, %v5553_v32  ;;  %v1638_v0 = vadd.f32 %v1576_v6, %v5556_v49  ;;  %v1639_v63 = vadd.f32 %v1578_v38, %v5559_v61  ;;  %v1640_v55 = vadd.f32 %v1580_v1, %v5562_v17  ;;  %v8233_v32 = vld [vmem:[#allocation65_spill] sm:$0xff]  ;;  %v8237_v50 = vld [vmem:[#allocation146_spill] sm:$0xff]  ;;  %v8241_v6 = vld [vmem:[#allocation147_spill] sm:$0xff] }
 0x212   :  { %v1641_v14 = vadd.f32 %v1583_v56, %v5565_v60  ;;  %v1642_v59 = vadd.f32 %v1585_v28, %v5568_v4  ;;  %v1643_v26 = vadd.f32 %v1587_v35, %v5571_v43  ;;  %v1644_v24 = vadd.f32 %v1589_v47, %v5574_v16  ;;  %v8234_v61 = vld [vmem:[#allocation245_spill] sm:$0xff]  ;;  %v8238_v12 = vld [vmem:[#allocation150_spill] sm:$0xff]  ;;  %v8242_v38 = vld [vmem:[#allocation151_spill] sm:$0xff] }
 0x213   :  { %v1645_v8 = vadd.f32 %v1592_v3, %v5577_v44  ;;  %v1646_v46 = vadd.f32 %v1594_v2, %v5580_v57  ;;  %v1647_v20 = vadd.f32 %v1596_v31, %v5583_v53  ;;  %v1648_v39 = vadd.f32 %v1598_v13, %v8232_v5  ;;  %v8244_v28 = vld [vmem:[#allocation69_spill] sm:$0xff]  ;;  %v8250_v2 = vld [vmem:[#allocation64_spill] sm:$0xff] }
 0x214   :  { %v1649_v49 = vadd.f32 %v1601_v51, %v8233_v32  ;;  %v1650_v17 = vadd.f32 %v1603_v11, %v8234_v61  ;;  %v1651_v60 = vadd.f32 %v1605_v62, %v8235_v23  ;;  %v1652_v4 = vadd.f32 %v1629_v41, %v8236_v10  ;;  %v8252_v51 = vld [vmem:[#allocation154_spill] sm:$0xff] }
 0x215   :  { %v1653_v43 = vadd.f32 %v1630_v54, %v8237_v50  ;;  %v1654_v16 = vadd.f32 %v1631_v36, %v8238_v12  ;;  %v1655_v44 = vadd.f32 %v1632_v30, %v8239_v21  ;;  %v1656_v57 = vadd.f32 %v1633_v29, %v8240_v33  ;;  %v8253_v41 = vld [vmem:[#allocation158_spill] sm:$0xff]  ;;  %v8254_v54 = vld [vmem:[#allocation193_spill] sm:$0xff]  ;;  %v8255_v30 = vld [vmem:[#allocation155_spill] sm:$0xff] }
 0x216   :  { %v1657_v53 = vadd.f32 %v1634_v45, %v8241_v6  ;;  %v1658_v1 = vadd.f32 %v1635_v34, %v8242_v38  ;;  %v1659_v56 = vadd.f32 %v1636_v18, %v8243_v48  ;;  %v1660_v15 = vadd.f32 %v1637_v22, %v8244_v28  ;;  %v8256_v29 = vld [vmem:[#allocation159_spill] sm:$0xff]  ;;  %v8257_v34 = vld [vmem:[#allocation244_spill] sm:$0xff]  ;;  %v8297_v48 = vld [vmem:[#allocation238_spill] sm:$0xff] }
 0x217   :  { %v1661_v35 = vadd.f32 %v1638_v0, %v8245_v52  ;;  %v1662_v27 = vadd.f32 %v1639_v63, %v8246_v37  ;;  %v1663_v47 = vadd.f32 %v1640_v55, %v8247_v40  ;;  %v1664_v19 = vadd.f32 %v1641_v14, %v8248_v42  ;;  %v8258_v22 = vld [vmem:[#allocation156_spill] sm:$0xff]  ;;  %v8292_v42 = vld [vmem:[#allocation55_spill] sm:$0xff]  ;;  %v8293_v40 = vld [vmem:[#allocation237_spill] sm:$0xff] }
 0x218   :  { %v1665_v3 = vadd.f32 %v1642_v59, %v8249_v9  ;;  %v1666_v31 = vadd.f32 %v1643_v26, %v8250_v2  ;;  %v1667_v13 = vadd.f32 %v1644_v24, %v8251_v58  ;;  %v1668_v7 = vadd.f32 %v1645_v8, %v8252_v51  ;;  %v8282_v51 = vld [vmem:[#allocation233_spill] sm:$0xff]  ;;  %v8290_v2 = vld [vmem:[#allocation136_spill] sm:$0xff]  ;;  %v8298_v38 = vld [vmem:[#allocation138_spill] sm:$0xff] }
 0x219   :  { %v1669_v11 = vadd.f32 %v1646_v46, %v8253_v41  ;;  %v1670_v36 = vadd.f32 %v1647_v20, %v8254_v54  ;;  %v1671_v62 = vadd.f32 %v1648_v39, %v8255_v30  ;;  %v1672_v45 = vadd.f32 %v1649_v49, %v8256_v29  ;;  %v8283_v41 = vld [vmem:[#allocation128_spill] sm:$0xff]  ;;  %v8284_v54 = vld [vmem:[#allocation122_spill] sm:$0xff]  ;;  %v8286_v29 = vld [vmem:[#allocation129_spill] sm:$0xff] }
 0x21a   :  { %v1673_v18 = vadd.f32 %v1650_v17, %v8257_v34  ;;  %v1674_v0 = vadd.f32 %v1651_v60, %v8258_v22  ;;  %v1675_v63 = vstv %s5661_s3  ;;  %v1722_v58 = vstv %s5715_s22  ;;  %v8285_v30 = vld [vmem:[#allocation132_spill] sm:$0xff]  ;;  %v8287_v34 = vld [vmem:[#allocation133_spill] sm:$0xff]  ;;  %v8288_v22 = vld [vmem:[#allocation126_spill] sm:$0xff]  ;;  %s6534_s3 = sld [smem:[#allocation14]] }
 0x21b   :  { %v5699_v55 = vadd.f32 %v1675_v63, %v1652_v4  ;;  %v5701_v14 = vadd.f32 %v1675_v63, %v1653_v43  ;;  %v5703_v59 = vadd.f32 %v1675_v63, %v1654_v16  ;;  %v5705_v26 = vadd.f32 %v1675_v63, %v1655_v44  ;;  %v8291_v9 = vld [vmem:[#allocation56_spill] sm:$0xff]  ;;  %v8294_v37 = vld [vmem:[#allocation137_spill] sm:$0xff]  ;;  %v8300_v33 = vld [vmem:[#allocation127_spill] sm:$0xff]  ;;  %s6536_s22 = sld [smem:[#allocation14 + $0x1]] }
 0x21c   :  { %v5707_v24 = vadd.f32 %v1675_v63, %v1656_v57  ;;  %v5709_v8 = vadd.f32 %v1675_v63, %v1657_v53  ;;  %v5711_v46 = vadd.f32 %v1675_v63, %v1658_v1  ;;  %v5713_v20 = vadd.f32 %v1675_v63, %v1659_v56  ;;  %v8295_v52 = vld [vmem:[#allocation57_spill] sm:$0xff]  ;;  %v8296_v28 = vld [vmem:[#allocation232_spill] sm:$0xff] }
 0x21d   :  { %8259 = vst [vmem:[#allocation163_spill] sm:$0xff] %v5699_v55  ;;  %v5717_v5 = vadd.f32 %v1675_v63, %v1660_v15  ;;  %v5719_v39 = vadd.f32 %v1675_v63, %v1661_v35  ;;  %v5721_v32 = vadd.f32 %v1675_v63, %v1662_v27  ;;  %v5723_v49 = vadd.f32 %v1675_v63, %v1663_v47  ;;  %v8299_v6 = vld [vmem:[#allocation224_spill] sm:$0xff] }
 0x21e   :  { %8260 = vst [vmem:[#allocation36_spill] sm:$0xff] %v5701_v14  ;;  %v5727_v61 = vadd.f32 %v1675_v63, %v1664_v19  ;;  %v5729_v17 = vadd.f32 %v1675_v63, %v1665_v3  ;;  %v5731_v23 = vadd.f32 %v1675_v63, %v1666_v31  ;;  %v5733_v60 = vadd.f32 %v1675_v63, %v1667_v13 }
 0x21f   :  { %8261 = vst [vmem:[#allocation204_spill] sm:$0xff] %v5703_v59  ;;  %v5735_v10 = vadd.f32 %v1675_v63, %v1668_v7  ;;  %v5737_v4 = vadd.f32 %v1675_v63, %v1669_v11  ;;  %v5739_v50 = vadd.f32 %v1675_v63, %v1670_v36  ;;  %v5741_v43 = vadd.f32 %v1675_v63, %v1671_v62 }
 0x220   :  { %8262 = vst [vmem:[#allocation162_spill] sm:$0xff] %v5705_v26  ;;  %v5743_v12 = vadd.f32 %v1675_v63, %v1672_v45  ;;  %v5745_v16 = vadd.f32 %v1675_v63, %v1673_v18  ;;  %v5747_v21 = vadd.f32 %v1675_v63, %v1674_v0  ;;  %v1746_v13 = vstv %s5725_s23  ;;  %v8289_v63 = vld [vmem:[#allocation236_spill] sm:$0xff]  ;;  %v8311_v26 = vld [vmem:[#allocation134_spill] sm:$0xff]  ;;  %s6542_s23 = sld [smem:[#allocation15]] }
 0x221   :  { %8263 = vst [vmem:[#allocation164_spill] sm:$0xff] %v5707_v24  ;;  %v5775_v7 = vmul.f32 %v1722_v58, %v8282_v51  ;;  %v5778_v11 = vmul.f32 %v1722_v58, %v8283_v41  ;;  %v5781_v36 = vmul.f32 %v1722_v58, %v8284_v54  ;;  %v5784_v62 = vmul.f32 %v1722_v58, %v8285_v30 }
 0x222   :  { %8264 = vst [vmem:[#allocation62_spill] sm:$0xff] %v5709_v8  ;;  %v5787_v45 = vmul.f32 %v1722_v58, %v8286_v29  ;;  %v5790_v18 = vmul.f32 %v1722_v58, %v8287_v34  ;;  %v5793_v0 = vmul.f32 %v1722_v58, %v8288_v22  ;;  %v5796_v31 = vmul.f32 %v1722_v58, %v8289_v63 }
 0x223   :  { %8265 = vst [vmem:[#allocation76_spill] sm:$0xff] %v5711_v46  ;;  %v5799_v3 = vmul.f32 %v1722_v58, %v8290_v2  ;;  %v5802_v19 = vmul.f32 %v1722_v58, %v8291_v9  ;;  %v5805_v47 = vmul.f32 %v1722_v58, %v8292_v42  ;;  %v5808_v27 = vmul.f32 %v1722_v58, %v8293_v40 }
 0x224   :  { %8266 = vst [vmem:[#allocation165_spill] sm:$0xff] %v5713_v20  ;;  %v5811_v35 = vmul.f32 %v1722_v58, %v8294_v37  ;;  %v5814_v15 = vmul.f32 %v1722_v58, %v8295_v52  ;;  %v5817_v56 = vmul.f32 %v1722_v58, %v8296_v28  ;;  %v5820_v1 = vmul.f32 %v1722_v58, %v8297_v48 }
 0x225   :  { %8267 = vst [vmem:[#allocation168_spill] sm:$0xff] %v5717_v5  ;;  %v5823_v53 = vmul.f32 %v1722_v58, %v8298_v38  ;;  %v5826_v57 = vmul.f32 %v1722_v58, %v8299_v6  ;;  %v5829_v44 = vmul.f32 %v1722_v58, %v8300_v33  ;;  %v1752_v5 = vmul.f32 %v1746_v13, %v8286_v29 }
 0x226   :  { %8268 = vst [vmem:[#allocation77_spill] sm:$0xff] %v5719_v39  ;;  %v1753_v20 = vmul.f32 %v1746_v13, %v8287_v34  ;;  %v1754_v46 = vmul.f32 %v1746_v13, %v8288_v22  ;;  %v1755_v8 = vmul.f32 %v1746_v13, %v8289_v63  ;;  %v1762_v59 = vmul.f32 %v1746_v13, %v8294_v37  ;;  %v8312_v63 = vld [vmem:[#allocation135_spill] sm:$0xff]  ;;  %v8314_v34 = vld [vmem:[#allocation140_spill] sm:$0xff] }
 0x227   :  { %8269 = vst [vmem:[#allocation166_spill] sm:$0xff] %v5721_v32  ;;  %v8309_v32 = vld [vmem:[#allocation235_spill] sm:$0xff]  ;;  %v1763_v14 = vmul.f32 %v1746_v13, %v8295_v52  ;;  %v1764_v55 = vmul.f32 %v1746_v13, %v8296_v28  ;;  %v1765_v25 = vmul.f32 %v1746_v13, %v8297_v48  ;;  %v1775_v48 = vmul.f32 %v1746_v13, %v8314_v34 }
 0x228   :  { %8270 = vst [vmem:[#allocation169_spill] sm:$0xff] %v5723_v49  ;;  %v1750_v49 = vmul.f32 %v1746_v13, %v8285_v30  ;;  %v1751_v39 = vmul.f32 %v1746_v13, %v8309_v32  ;;  %v1760_v30 = vmul.f32 %v1746_v13, %v8293_v40  ;;  %v1761_v32 = vmul.f32 %v1746_v13, %v8311_v26  ;;  %v8313_v22 = vld [vmem:[#allocation139_spill] sm:$0xff] }
 0x229   :  { %8271 = vst [vmem:[#allocation167_spill] sm:$0xff] %v5727_v61  ;;  %v1749_v61 = vmul.f32 %v1746_v13, %v8284_v54  ;;  %v1759_v54 = vmul.f32 %v1746_v13, %v8292_v42  ;;  %v1769_v42 = vmul.f32 %v1746_v13, %v8300_v33  ;;  %v1771_v26 = vmul.f32 %v1746_v13, %v8313_v22 }
 0x22a   :  { %8272 = vst [vmem:[#allocation170_spill] sm:$0xff] %v5729_v17  ;;  %v1748_v17 = vmul.f32 %v1746_v13, %v8283_v41  ;;  %v1758_v41 = vmul.f32 %v1746_v13, %v8291_v9  ;;  %v1768_v9 = vmul.f32 %v1746_v13, %v8299_v6  ;;  %v1814_v6 = vrot.slane %v1752_v5, 4 }
 0x22b   :  { %8273 = vst [vmem:[#allocation171_spill] sm:$0xff] %v5731_v23  ;;  %v1747_v23 = vmul.f32 %v1746_v13, %v8282_v51  ;;  %v1757_v51 = vmul.f32 %v1746_v13, %v8290_v2  ;;  %v1767_v2 = vmul.f32 %v1746_v13, %v8298_v38  ;;  %v1810_v38 = vrot.slane %v1750_v49, 4 }
 0x22c   :  { %8274 = vst [vmem:[#allocation175_spill] sm:$0xff] %v5733_v60  ;;  %v1817_v33 = vrot.slane %v1754_v46, 4  ;;  %v1824_v5 = vrot.slane %v1758_v41, 4  ;;  %v1842_v41 = vrot.slane %v1768_v9, 4 }
 0x22d   :  { %8275 = vst [vmem:[#allocation78_spill] sm:$0xff] %v5735_v10  ;;  %v8307_v10 = vld [vmem:[#allocation131_spill] sm:$0xff]  ;;  %v1805_v29 = vrot.slane %v1747_v23, 4 }
 0x22e   :  { %8276 = vst [vmem:[#allocation172_spill] sm:$0xff] %v5737_v4  ;;  %v5841_v60 = vmul.f32 %v1722_v58, %v8307_v10  ;;  %v1774_v28 = vmul.f32 %v1746_v13, %v8307_v10 }
 0x22f   :  { %8277 = vst [vmem:[#allocation176_spill] sm:$0xff] %v5739_v50  ;;  %v8305_v50 = vld [vmem:[#allocation66_spill] sm:$0xff] }
 0x230   :  { %8278 = vst [vmem:[#allocation70_spill] sm:$0xff] %v5741_v43  ;;  %v5838_v4 = vmul.f32 %v1722_v58, %v8305_v50  ;;  %v1773_v52 = vmul.f32 %v1746_v13, %v8305_v50 }
 0x231   :  { %8279 = vst [vmem:[#allocation246_spill] sm:$0xff] %v5743_v12  ;;  %v8303_v12 = vld [vmem:[#allocation142_spill] sm:$0xff] }
 0x232   :  { %8280 = vst [vmem:[#allocation173_spill] sm:$0xff] %v5745_v16  ;;  %v5835_v43 = vmul.f32 %v1722_v58, %v8303_v12  ;;  %v1772_v37 = vmul.f32 %v1746_v13, %v8303_v12 }
 0x233   :  { %8281 = vst [vmem:[#allocation27_spill] sm:$0xff] %v5747_v21  ;;  %v8301_v21 = vld [vmem:[#allocation239_spill] sm:$0xff] }
 0x234   :  { %v5832_v16 = vmul.f32 %v1722_v58, %v8301_v21  ;;  %8304 = vst [vmem:[#allocation28_spill] sm:$0xff] %v5835_v43  ;;  %v8310_v58 = vld [vmem:[#allocation130_spill] sm:$0xff]  ;;  %v1770_v40 = vmul.f32 %v1746_v13, %v8301_v21  ;;  %v1815_v43 = vrot.slane %v1753_v20, 4  ;;  %v1826_v20 = vrot.slane %v1759_v54, 4 }
 0x235   :  { %8306 = vst [vmem:[#allocation177_spill] sm:$0xff] %v5838_v4  ;;  %v1756_v24 = vmul.f32 %v1746_v13, %v8310_v58  ;;  %v1766_v58 = vmul.f32 %v1746_v13, %v8312_v63  ;;  %v1806_v63 = vrot.slane %v1748_v17, 4  ;;  %v1812_v4 = vrot.slane %v1751_v39, 4 }
 0x236   :  { %8302 = vst [vmem:[#allocation174_spill] sm:$0xff] %v5832_v16  ;;  %v1819_v16 = vrot.slane %v1755_v8, 4  ;;  %v1816_v10 = vsel %vm933_vm0, %v1814_v6, %v1815_v43  ;;  %v1818_v23 = vsel %vm933_vm0, %v1815_v43, %v1817_v33  ;;  %v1823_v39 = vrot.slane %v1757_v51, 4 }
 0x237   :  { %8308 = vst [vmem:[#allocation179_spill] sm:$0xff] %v5841_v60  ;;  %v1808_v60 = vrot.slane %v1749_v61, 4  ;;  %v1807_v21 = vsel %vm933_vm0, %v1805_v29, %v1806_v63  ;;  %v1813_v50 = vsel %vm933_vm0, %v1810_v38, %v1812_v4  ;;  %v1821_v17 = vrot.slane %v1756_v24, 4 }
 0x238   :  { %v1820_v49 = vsel %vm933_vm0, %v1817_v33, %v1819_v16  ;;  %v1828_v61 = vrot.slane %v1760_v30, 4  ;;  %v1830_v13 = vrot.slane %v1761_v32, 4  ;;  %v1832_v29 = vrot.slane %v1762_v59, 4 }
 0x239   :  { %v1809_v22 = vsel %vm933_vm0, %v1806_v63, %v1808_v60  ;;  %v1811_v12 = vsel %vm933_vm0, %v1808_v60, %v1810_v38  ;;  %v1822_v46 = vsel %vm933_vm0, %v1819_v16, %v1821_v17  ;;  %v1825_v60 = vsel %vm933_vm0, %v1823_v39, %v1824_v5 }
 0x23a   :  { %v1827_v8 = vsel %vm933_vm0, %v1824_v5, %v1826_v20  ;;  %v1833_v4 = vrot.slane %v1763_v14, 4  ;;  %v1835_v38 = vrot.slane %v1764_v55, 4  ;;  %v1829_v6 = vsel %vm933_vm0, %v1826_v20, %v1828_v61 }
 0x23b   :  { %v1831_v24 = vsel %vm933_vm0, %v1828_v61, %v1830_v13  ;;  %v1837_v43 = vrot.slane %v1765_v25, 4  ;;  %v1839_v33 = vrot.slane %v1766_v58, 4  ;;  %v1841_v16 = vrot.slane %v1767_v2, 4 }
 0x23c   :  { %v1834_v63 = vsel %vm933_vm0, %v1832_v29, %v1833_v4  ;;  %v1836_v51 = vsel %vm933_vm0, %v1833_v4, %v1835_v38  ;;  %v1844_v30 = vrot.slane %v1769_v42, 4  ;;  %v1846_v32 = vrot.slane %v1770_v40, 4  ;;  %v8345_v29 = vld [vmem:[#allocation236_spill] sm:$0xff] }
 0x23d   :  { %v1838_v59 = vsel %vm933_vm0, %v1835_v38, %v1837_v43  ;;  %v1840_v54 = vsel %vm933_vm0, %v1837_v43, %v1839_v33  ;;  %v1843_v55 = vsel %vm933_vm0, %v1841_v16, %v1842_v41  ;;  %v1848_v14 = vrot.slane %v1771_v26, 4  ;;  %v8347_v38 = vld [vmem:[#allocation56_spill] sm:$0xff]  ;;  %v8349_v33 = vld [vmem:[#allocation237_spill] sm:$0xff] }
 0x23e   :  { %v1850_v17 = vrot.slane %v1772_v37, 4  ;;  %v1851_v25 = vrot.slane %v1773_v52, 4  ;;  %v1845_v58 = vsel %vm933_vm0, %v1842_v41, %v1844_v30  ;;  %v1847_v39 = vsel %vm933_vm0, %v1844_v30, %v1846_v32  ;;  %v8351_v41 = vld [vmem:[#allocation57_spill] sm:$0xff] }
 0x23f   :  { %v1853_v5 = vrot.slane %v1774_v28, 4  ;;  %v1855_v2 = vrot.slane %v1775_v48, 4  ;;  %v1849_v9 = vsel %vm933_vm0, %v1846_v32, %v1848_v14  ;;  %v5896_v42 = vadd.f32 %v1807_v21, %v5775_v7  ;;  %v8353_v32 = vld [vmem:[#allocation238_spill] sm:$0xff] }
 0x240   :  { %v1852_v20 = vsel %vm933_vm0, %v1850_v17, %v1851_v25  ;;  %v5899_v40 = vadd.f32 %v1809_v22, %v5778_v11  ;;  %v5904_v37 = vadd.f32 %v1811_v12, %v5781_v36  ;;  %v5907_v28 = vadd.f32 %v1813_v50, %v5784_v62  ;;  %v8354_v14 = vld [vmem:[#allocation138_spill] sm:$0xff] }
 0x241   :  { %8315 = vst [vmem:[#allocation75_spill] sm:$0xff] %v5896_v42  ;;  %v1854_v26 = vsel %vm933_vm0, %v1851_v25, %v1853_v5  ;;  %v1856_v52 = vsel %vm933_vm0, %v1853_v5, %v1855_v2  ;;  %v5910_v48 = vadd.f32 %v1816_v10, %v5787_v45  ;;  %v5913_v61 = vadd.f32 %v1818_v23, %v5790_v18  ;;  %v8342_v23 = vld [vmem:[#allocation129_spill] sm:$0xff]  ;;  %v8355_v25 = vld [vmem:[#allocation224_spill] sm:$0xff]  ;;  %v8357_v2 = vld [vmem:[#allocation239_spill] sm:$0xff] }
 0x242   :  { %8316 = vst [vmem:[#allocation40_spill] sm:$0xff] %v5899_v40  ;;  %v5916_v21 = vadd.f32 %v1820_v49, %v5793_v0  ;;  %v5919_v7 = vadd.f32 %v1822_v46, %v5796_v31  ;;  %v5922_v11 = vadd.f32 %v1825_v60, %v5799_v3  ;;  %v5925_v12 = vadd.f32 %v1827_v8, %v5802_v19  ;;  %v8346_v8 = vld [vmem:[#allocation136_spill] sm:$0xff]  ;;  %v8373_v40 = vld [vmem:[#allocation58_spill] sm:$0xff] }
 0x243   :  { %8317 = vst [vmem:[#allocation178_spill] sm:$0xff] %v5904_v37  ;;  %v5928_v50 = vadd.f32 %v1829_v6, %v5805_v47  ;;  %v5931_v10 = vadd.f32 %v1831_v24, %v5808_v27  ;;  %v5936_v36 = vadd.f32 %v1834_v63, %v5811_v35  ;;  %v5939_v31 = vadd.f32 %v1836_v51, %v5814_v15  ;;  %v8334_v35 = vld [vmem:[#allocation174_spill] sm:$0xff]  ;;  %v8336_v15 = vld [vmem:[#allocation28_spill] sm:$0xff]  ;;  %v8348_v24 = vld [vmem:[#allocation55_spill] sm:$0xff] }
 0x244   :  { %8318 = vst [vmem:[#allocation180_spill] sm:$0xff] %v5907_v28  ;;  %v5942_v3 = vadd.f32 %v1838_v59, %v5817_v56  ;;  %v5945_v19 = vadd.f32 %v1840_v54, %v5820_v1  ;;  %v5948_v47 = vadd.f32 %v1843_v55, %v5823_v53  ;;  %v5951_v27 = vadd.f32 %v1845_v58, %v5826_v57  ;;  %v8338_v56 = vld [vmem:[#allocation177_spill] sm:$0xff]  ;;  %v8340_v1 = vld [vmem:[#allocation179_spill] sm:$0xff]  ;;  %v8352_v54 = vld [vmem:[#allocation232_spill] sm:$0xff] }
 0x245   :  { %8319 = vst [vmem:[#allocation181_spill] sm:$0xff] %v5910_v48  ;;  %v5954_v62 = vadd.f32 %v1847_v39, %v5829_v44  ;;  %v5957_v45 = vadd.f32 %v1849_v9, %v8334_v35  ;;  %v5960_v18 = vadd.f32 %v1852_v20, %v8336_v15  ;;  %v5963_v22 = vadd.f32 %v1854_v26, %v8338_v56  ;;  %v8343_v57 = vld [vmem:[#allocation133_spill] sm:$0xff]  ;;  %v8344_v44 = vld [vmem:[#allocation126_spill] sm:$0xff]  ;;  %v8356_v39 = vld [vmem:[#allocation127_spill] sm:$0xff] }
 0x246   :  { %8320 = vst [vmem:[#allocation184_spill] sm:$0xff] %v5913_v61  ;;  %v5966_v0 = vadd.f32 %v1856_v52, %v8340_v1  ;;  %v1903_v53 = vstv %s5888_s24  ;;  %v8350_v51 = vld [vmem:[#allocation137_spill] sm:$0xff]  ;;  %v8358_v20 = vld [vmem:[#allocation142_spill] sm:$0xff]  ;;  %v8360_v15 = vld [vmem:[#allocation131_spill] sm:$0xff]  ;;  %s6549_s24 = sld [smem:[#allocation15 + $0x1]] }
 0x247   :  { %8321 = vst [vmem:[#allocation182_spill] sm:$0xff] %v5916_v21  ;;  %v5970_v49 = vmul.f32 %v1903_v53, %v8342_v23  ;;  %v5973_v46 = vmul.f32 %v1903_v53, %v8343_v57  ;;  %v5976_v13 = vmul.f32 %v1903_v53, %v8344_v44  ;;  %v5979_v60 = vmul.f32 %v1903_v53, %v8345_v29  ;;  %v8359_v52 = vld [vmem:[#allocation66_spill] sm:$0xff]  ;;  %v8370_v48 = vld [vmem:[#allocation135_spill] sm:$0xff] }
 0x248   :  { %8322 = vst [vmem:[#allocation185_spill] sm:$0xff] %v5919_v7  ;;  %v5982_v4 = vmul.f32 %v1903_v53, %v8346_v8  ;;  %v5985_v6 = vmul.f32 %v1903_v53, %v8347_v38  ;;  %v5988_v43 = vmul.f32 %v1903_v53, %v8348_v24  ;;  %v5991_v63 = vmul.f32 %v1903_v53, %v8349_v33  ;;  %v8369_v21 = vld [vmem:[#allocation134_spill] sm:$0xff]  ;;  %v8371_v28 = vld [vmem:[#allocation139_spill] sm:$0xff] }
 0x249   :  { %8323 = vst [vmem:[#allocation183_spill] sm:$0xff] %v5922_v11  ;;  %v5994_v16 = vmul.f32 %v1903_v53, %v8350_v51  ;;  %v5997_v59 = vmul.f32 %v1903_v53, %v8351_v41  ;;  %v6000_v30 = vmul.f32 %v1903_v53, %v8352_v54  ;;  %v6003_v55 = vmul.f32 %v1903_v53, %v8353_v32  ;;  %v8372_v37 = vld [vmem:[#allocation143_spill] sm:$0xff] }
 0x24a   :  { %8324 = vst [vmem:[#allocation186_spill] sm:$0xff] %v5925_v12  ;;  %v6006_v17 = vmul.f32 %v1903_v53, %v8354_v14  ;;  %v6009_v58 = vmul.f32 %v1903_v53, %v8355_v25  ;;  %v6012_v5 = vmul.f32 %v1903_v53, %v8356_v39  ;;  %v6015_v9 = vmul.f32 %v1903_v53, %v8357_v2 }
 0x24b   :  { %8325 = vst [vmem:[#allocation42_spill] sm:$0xff] %v5928_v50  ;;  %v6018_v26 = vmul.f32 %v1903_v53, %v8358_v20  ;;  %v6021_v35 = vmul.f32 %v1903_v53, %v8359_v52  ;;  %v6024_v56 = vmul.f32 %v1903_v53, %v8360_v15  ;;  %v6027_v1 = vmul.f32 %v1903_v53, %v8314_v34 }
 0x24c   :  { %8326 = vst [vmem:[#allocation189_spill] sm:$0xff] %v5931_v10  ;;  %v8368_v10 = vld [vmem:[#allocation130_spill] sm:$0xff] }
 0x24d   :  { %8327 = vst [vmem:[#allocation46_spill] sm:$0xff] %v5936_v36 }
 0x24e   :  { %8328 = vst [vmem:[#allocation190_spill] sm:$0xff] %v5939_v31 }
 0x24f   :  { %8329 = vst [vmem:[#allocation187_spill] sm:$0xff] %v5942_v3 }
 0x250   :  { %8330 = vst [vmem:[#allocation191_spill] sm:$0xff] %v5945_v19 }
 0x251   :  { %8331 = vst [vmem:[#allocation188_spill] sm:$0xff] %v5948_v47  ;;  %v1927_v47 = vstv %s5933_s26  ;;  %s6555_s26 = sld [smem:[#allocation15 + $0x2]] }
 0x252   :  { %8332 = vst [vmem:[#allocation192_spill] sm:$0xff] %v5951_v27  ;;  %v1928_v19 = vmul.f32 %v1927_v47, %v8342_v23  ;;  %v1929_v3 = vmul.f32 %v1927_v47, %v8343_v57  ;;  %v1930_v31 = vmul.f32 %v1927_v47, %v8344_v44  ;;  %v1931_v36 = vmul.f32 %v1927_v47, %v8345_v29 }
 0x253   :  { %8333 = vst [vmem:[#allocation31_spill] sm:$0xff] %v5954_v62  ;;  %v8366_v62 = vld [vmem:[#allocation219_spill] sm:$0xff]  ;;  %v1932_v50 = vmul.f32 %v1927_v47, %v8368_v10  ;;  %v1933_v12 = vmul.f32 %v1927_v47, %v8346_v8  ;;  %v1934_v11 = vmul.f32 %v1927_v47, %v8347_v38  ;;  %v1935_v7 = vmul.f32 %v1927_v47, %v8348_v24 }
 0x254   :  { %8335 = vst [vmem:[#allocation32_spill] sm:$0xff] %v5957_v45  ;;  %v6036_v27 = vmul.f32 %v1903_v53, %v8366_v62  ;;  %v1937_v61 = vmul.f32 %v1927_v47, %v8369_v21  ;;  %v1938_v23 = vmul.f32 %v1927_v47, %v8350_v51  ;;  %v1939_v57 = vmul.f32 %v1927_v47, %v8351_v41 }
 0x255   :  { %8337 = vst [vmem:[#allocation33_spill] sm:$0xff] %v5960_v18  ;;  %v8364_v18 = vld [vmem:[#allocation144_spill] sm:$0xff]  ;;  %v1940_v44 = vmul.f32 %v1927_v47, %v8352_v54  ;;  %v1941_v29 = vmul.f32 %v1927_v47, %v8353_v32  ;;  %v1942_v10 = vmul.f32 %v1927_v47, %v8370_v48  ;;  %v1943_v8 = vmul.f32 %v1927_v47, %v8354_v14 }
 0x256   :  { %8339 = vst [vmem:[#allocation38_spill] sm:$0xff] %v5963_v22  ;;  %v6033_v45 = vmul.f32 %v1903_v53, %v8364_v18  ;;  %v1944_v38 = vmul.f32 %v1927_v47, %v8355_v25  ;;  %v1945_v24 = vmul.f32 %v1927_v47, %v8356_v39  ;;  %v1947_v21 = vmul.f32 %v1927_v47, %v8371_v28 }
 0x257   :  { %8341 = vst [vmem:[#allocation60_spill] sm:$0xff] %v5966_v0  ;;  %v8362_v0 = vld [vmem:[#allocation141_spill] sm:$0xff]  ;;  %v1948_v51 = vmul.f32 %v1927_v47, %v8358_v20  ;;  %v1949_v41 = vmul.f32 %v1927_v47, %v8359_v52  ;;  %v1950_v54 = vmul.f32 %v1927_v47, %v8360_v15  ;;  %v1951_v32 = vmul.f32 %v1927_v47, %v8314_v34 }
 0x258   :  { %8361 = vst [vmem:[#allocation61_spill] sm:$0xff] %v6027_v1  ;;  %v6030_v22 = vmul.f32 %v1903_v53, %v8362_v0  ;;  %v1936_v53 = vmul.f32 %v1927_v47, %v8349_v33  ;;  %v1946_v33 = vmul.f32 %v1927_v47, %v8357_v2  ;;  %v1952_v48 = vmul.f32 %v1927_v47, %v8372_v37 }
 0x259   :  { %8365 = vst [vmem:[#allocation197_spill] sm:$0xff] %v6033_v45  ;;  %v1953_v14 = vmul.f32 %v1927_v47, %v8362_v0  ;;  %v1954_v25 = vmul.f32 %v1927_v47, %v8364_v18  ;;  %v1955_v39 = vmul.f32 %v1927_v47, %v8366_v62  ;;  %v1956_v2 = vmul.f32 %v1927_v47, %v8373_v40 }
 0x25a   :  { %8363 = vst [vmem:[#allocation200_spill] sm:$0xff] %v6030_v22  ;;  %v1986_v42 = vrot.slane %v1928_v19, 4  ;;  %v1987_v28 = vrot.slane %v1929_v3, 4  ;;  %v1991_v20 = vrot.slane %v1931_v36, 4  ;;  %v1993_v45 = vrot.slane %v1932_v50, 4 }
 0x25b   :  { %8367 = vst [vmem:[#allocation203_spill] sm:$0xff] %v6036_v27  ;;  %v1989_v27 = vrot.slane %v1930_v31, 4  ;;  %v1995_v52 = vrot.slane %v1933_v12, 4  ;;  %v1996_v22 = vrot.slane %v1934_v11, 4  ;;  %v1998_v37 = vrot.slane %v1935_v7, 4 }
 0x25c   :  { %v1988_v15 = vsel %vm933_vm0, %v1986_v42, %v1987_v28  ;;  %v2000_v1 = vrot.slane %v1936_v53, 4  ;;  %v1994_v18 = vsel %vm933_vm0, %v1991_v20, %v1993_v45  ;;  %v2002_v40 = vrot.slane %v1937_v61, 4 }
 0x25d   :  { %v1990_v34 = vsel %vm933_vm0, %v1987_v28, %v1989_v27  ;;  %v1992_v0 = vsel %vm933_vm0, %v1989_v27, %v1991_v20  ;;  %v1997_v62 = vsel %vm933_vm0, %v1995_v52, %v1996_v22  ;;  %v1999_v3 = vsel %vm933_vm0, %v1996_v22, %v1998_v37 }
 0x25e   :  { %v2001_v36 = vsel %vm933_vm0, %v1998_v37, %v2000_v1  ;;  %v2004_v50 = vrot.slane %v1938_v23, 4  ;;  %v2005_v12 = vrot.slane %v1939_v57, 4  ;;  %v2003_v11 = vsel %vm933_vm0, %v2000_v1, %v2002_v40 }
 0x25f   :  { %v2007_v42 = vrot.slane %v1940_v44, 4  ;;  %v2009_v31 = vrot.slane %v1941_v29, 4  ;;  %v2011_v19 = vrot.slane %v1942_v10, 4  ;;  %v2013_v47 = vrot.slane %v1943_v8, 4 }
 0x260   :  { %v2006_v7 = vsel %vm933_vm0, %v2004_v50, %v2005_v12  ;;  %v2014_v27 = vrot.slane %v1944_v38, 4  ;;  %v2016_v53 = vrot.slane %v1945_v24, 4  ;;  %v2018_v28 = vrot.slane %v1946_v33, 4 }
 0x261   :  { %v2008_v45 = vsel %vm933_vm0, %v2005_v12, %v2007_v42  ;;  %v2010_v61 = vsel %vm933_vm0, %v2007_v42, %v2009_v31  ;;  %v2012_v22 = vsel %vm933_vm0, %v2009_v31, %v2011_v19  ;;  %v2020_v1 = vrot.slane %v1947_v21, 4 }
 0x262   :  { %v2015_v23 = vsel %vm933_vm0, %v2013_v47, %v2014_v27  ;;  %v2017_v57 = vsel %vm933_vm0, %v2014_v27, %v2016_v53  ;;  %v2022_v44 = vrot.slane %v1948_v51, 4  ;;  %v2019_v29 = vsel %vm933_vm0, %v2016_v53, %v2018_v28  ;;  %v8381_v47 = vld [vmem:[#allocation180_spill] sm:$0xff]  ;;  %v8382_v27 = vld [vmem:[#allocation181_spill] sm:$0xff] }
 0x263   :  { %v2023_v10 = vrot.slane %v1949_v41, 4  ;;  %v2025_v20 = vrot.slane %v1950_v54, 4  ;;  %v2027_v8 = vrot.slane %v1951_v32, 4  ;;  %v2021_v38 = vsel %vm933_vm0, %v2018_v28, %v2020_v1  ;;  %v8383_v53 = vld [vmem:[#allocation184_spill] sm:$0xff]  ;;  %v8387_v1 = vld [vmem:[#allocation186_spill] sm:$0xff] }
 0x264   :  { %v2029_v24 = vrot.slane %v1952_v48, 4  ;;  %v2031_v52 = vrot.slane %v1953_v14, 4  ;;  %v2032_v37 = vrot.slane %v1954_v25, 4  ;;  %v2034_v12 = vrot.slane %v1955_v39, 4 }
 0x265   :  { %v2024_v40 = vsel %vm933_vm0, %v2022_v44, %v2023_v10  ;;  %v2026_v33 = vsel %vm933_vm0, %v2023_v10, %v2025_v20  ;;  %v2028_v50 = vsel %vm933_vm0, %v2025_v20, %v2027_v8  ;;  %v2036_v42 = vrot.slane %v1956_v2, 4  ;;  %v8389_v20 = vld [vmem:[#allocation189_spill] sm:$0xff] }
 0x266   :  { %v2030_v21 = vsel %vm933_vm0, %v2027_v8, %v2029_v24  ;;  %v2033_v51 = vsel %vm933_vm0, %v2031_v52, %v2032_v37  ;;  %v2061_v41 = vadd.f32 %v1988_v15, %v5970_v49  ;;  %v2035_v54 = vsel %vm933_vm0, %v2032_v37, %v2034_v12  ;;  %v8391_v52 = vld [vmem:[#allocation190_spill] sm:$0xff] }
 0x267   :  { %v2062_v32 = vadd.f32 %v1990_v34, %v5973_v46  ;;  %v2063_v48 = vadd.f32 %v1992_v0, %v5976_v13  ;;  %v2064_v14 = vadd.f32 %v1994_v18, %v5979_v60  ;;  %v2037_v25 = vsel %vm933_vm0, %v2034_v12, %v2036_v42  ;;  %v8374_v34 = vld [vmem:[#allocation61_spill] sm:$0xff]  ;;  %v8375_v0 = vld [vmem:[#allocation200_spill] sm:$0xff] }
 0x268   :  { %v2065_v31 = vadd.f32 %v1997_v62, %v5982_v4  ;;  %v2066_v39 = vadd.f32 %v1999_v3, %v5985_v6  ;;  %v2067_v19 = vadd.f32 %v2001_v36, %v5988_v43  ;;  %v2068_v2 = vadd.f32 %v2003_v11, %v5991_v63  ;;  %v8376_v62 = vld [vmem:[#allocation197_spill] sm:$0xff]  ;;  %v8377_v3 = vld [vmem:[#allocation203_spill] sm:$0xff]  ;;  %v8379_v11 = vld [vmem:[#allocation40_spill] sm:$0xff] }
 0x269   :  { %v2069_v49 = vadd.f32 %v2006_v7, %v5994_v16  ;;  %v2070_v15 = vadd.f32 %v2008_v45, %v5997_v59  ;;  %v2071_v46 = vadd.f32 %v2010_v61, %v6000_v30  ;;  %v2072_v13 = vadd.f32 %v2012_v22, %v6003_v55  ;;  %v8378_v36 = vld [vmem:[#allocation75_spill] sm:$0xff]  ;;  %v8380_v7 = vld [vmem:[#allocation178_spill] sm:$0xff]  ;;  %v8385_v22 = vld [vmem:[#allocation185_spill] sm:$0xff] }
 0x26a   :  { %v2073_v60 = vadd.f32 %v2015_v23, %v6006_v17  ;;  %v2074_v4 = vadd.f32 %v2017_v57, %v6009_v58  ;;  %v2075_v6 = vadd.f32 %v2019_v29, %v6012_v5  ;;  %v2076_v43 = vadd.f32 %v2021_v38, %v6015_v9  ;;  %v8384_v45 = vld [vmem:[#allocation182_spill] sm:$0xff]  ;;  %v8386_v23 = vld [vmem:[#allocation183_spill] sm:$0xff]  ;;  %v8395_v42 = vld [vmem:[#allocation192_spill] sm:$0xff] }
 0x26b   :  { %v2077_v63 = vadd.f32 %v2024_v40, %v6018_v26  ;;  %v2078_v16 = vadd.f32 %v2026_v33, %v6021_v35  ;;  %v2079_v59 = vadd.f32 %v2028_v50, %v6024_v56  ;;  %v2080_v30 = vadd.f32 %v2030_v21, %v8374_v34  ;;  %v8388_v29 = vld [vmem:[#allocation42_spill] sm:$0xff]  ;;  %v8392_v40 = vld [vmem:[#allocation187_spill] sm:$0xff]  ;;  %v8394_v21 = vld [vmem:[#allocation188_spill] sm:$0xff] }
 0x26c   :  { %v2081_v18 = vadd.f32 %v2033_v51, %v8375_v0  ;;  %v2082_v55 = vadd.f32 %v2035_v54, %v8376_v62  ;;  %v2083_v17 = vadd.f32 %v2037_v25, %v8377_v3  ;;  %v2084_v58 = vadd.f32 %v2061_v41, %v8378_v36  ;;  %v8390_v38 = vld [vmem:[#allocation46_spill] sm:$0xff]  ;;  %v8393_v50 = vld [vmem:[#allocation191_spill] sm:$0xff]  ;;  %v8398_v25 = vld [vmem:[#allocation33_spill] sm:$0xff] }
 0x26d   :  { %v2085_v5 = vadd.f32 %v2062_v32, %v8379_v11  ;;  %v2086_v9 = vadd.f32 %v2063_v48, %v8380_v7  ;;  %v2087_v26 = vadd.f32 %v2064_v14, %v8381_v47  ;;  %v2088_v35 = vadd.f32 %v2065_v31, %v8382_v27  ;;  %v8396_v54 = vld [vmem:[#allocation31_spill] sm:$0xff]  ;;  %v8397_v48 = vld [vmem:[#allocation32_spill] sm:$0xff] }
 0x26e   :  { %v2089_v56 = vadd.f32 %v2066_v39, %v8383_v53  ;;  %v2090_v61 = vadd.f32 %v2067_v19, %v8384_v45  ;;  %v2091_v28 = vadd.f32 %v2068_v2, %v8385_v22  ;;  %v2092_v57 = vadd.f32 %v2069_v49, %v8386_v23  ;;  %v8399_v39 = vld [vmem:[#allocation38_spill] sm:$0xff]  ;;  %v8400_v2 = vld [vmem:[#allocation60_spill] sm:$0xff] }
 0x26f   :  { %v2093_v44 = vadd.f32 %v2070_v15, %v8387_v1  ;;  %v2094_v10 = vadd.f32 %v2071_v46, %v8388_v29  ;;  %v2095_v8 = vadd.f32 %v2072_v13, %v8389_v20  ;;  %v2096_v24 = vadd.f32 %v2073_v60, %v8390_v38 }
 0x270   :  { %v2097_v37 = vadd.f32 %v2074_v4, %v8391_v52  ;;  %v2098_v33 = vadd.f32 %v2075_v6, %v8392_v40  ;;  %v2099_v12 = vadd.f32 %v2076_v43, %v8393_v50  ;;  %v2100_v51 = vadd.f32 %v2077_v63, %v8394_v21  ;;  %v8412_v21 = vld [vmem:[#allocation36_spill] sm:$0xff] }
 0x271   :  { %v2101_v41 = vadd.f32 %v2078_v16, %v8395_v42  ;;  %v2102_v32 = vadd.f32 %v2079_v59, %v8396_v54  ;;  %v2103_v14 = vadd.f32 %v2080_v30, %v8397_v48  ;;  %v2104_v31 = vadd.f32 %v2081_v18, %v8398_v25  ;;  %v8416_v48 = vld [vmem:[#allocation162_spill] sm:$0xff] }
 0x272   :  { %v2105_v19 = vadd.f32 %v2082_v55, %v8399_v39  ;;  %v2106_v49 = vadd.f32 %v2083_v17, %v8400_v2  ;;  %v2107_v15 = vstv %s6102_s27  ;;  %v8420_v2 = vld [vmem:[#allocation62_spill] sm:$0xff]  ;;  %s6558_s27 = sld [smem:[#allocation15 + $0x3]] }
 0x273   :  { %v6140_v46 = vadd.f32 %v2107_v15, %v2084_v58  ;;  %v6142_v13 = vadd.f32 %v2107_v15, %v2085_v5  ;;  %v6144_v60 = vadd.f32 %v2107_v15, %v2086_v9  ;;  %v6146_v4 = vadd.f32 %v2107_v15, %v2087_v26  ;;  %v8446_v26 = vld [vmem:[#allocation176_spill] sm:$0xff] }
 0x274   :  { %v6148_v6 = vadd.f32 %v2107_v15, %v2088_v35  ;;  %v6150_v43 = vadd.f32 %v2107_v15, %v2089_v56  ;;  %v6152_v63 = vadd.f32 %v2107_v15, %v2090_v61  ;;  %v6154_v16 = vadd.f32 %v2107_v15, %v2091_v28  ;;  %v8438_v61 = vld [vmem:[#allocation171_spill] sm:$0xff]  ;;  %v8444_v35 = vld [vmem:[#allocation172_spill] sm:$0xff] }
 0x275   :  { %v6156_v59 = vadd.f32 %v2107_v15, %v2092_v57  ;;  %v6158_v34 = vadd.f32 %v2107_v15, %v2093_v44  ;;  %v6160_v30 = vadd.f32 %v2107_v15, %v2094_v10  ;;  %v6162_v0 = vadd.f32 %v2107_v15, %v2095_v8  ;;  %v8426_v8 = vld [vmem:[#allocation168_spill] sm:$0xff]  ;;  %v8428_v10 = vld [vmem:[#allocation77_spill] sm:$0xff] }
 0x276   :  { %v6164_v18 = vadd.f32 %v2107_v15, %v2096_v24  ;;  %v6166_v62 = vadd.f32 %v2107_v15, %v2097_v37  ;;  %v6168_v55 = vadd.f32 %v2107_v15, %v2098_v33  ;;  %v6170_v3 = vadd.f32 %v2107_v15, %v2099_v12  ;;  %v8410_v33 = vld [vmem:[#allocation163_spill] sm:$0xff]  ;;  %v8422_v37 = vld [vmem:[#allocation76_spill] sm:$0xff]  ;;  %v8424_v24 = vld [vmem:[#allocation165_spill] sm:$0xff] }
 0x277   :  { %v6172_v17 = vadd.f32 %v2107_v15, %v2100_v51  ;;  %v6174_v36 = vadd.f32 %v2107_v15, %v2101_v41  ;;  %v6176_v58 = vadd.f32 %v2107_v15, %v2102_v32  ;;  %v6178_v11 = vadd.f32 %v2107_v15, %v2103_v14  ;;  %v8414_v41 = vld [vmem:[#allocation204_spill] sm:$0xff] }
 0x278   :  { %8401 = vst [vmem:[#allocation201_spill] sm:$0xff] %v6168_v55  ;;  %v6180_v5 = vadd.f32 %v2107_v15, %v2104_v31  ;;  %v6182_v7 = vadd.f32 %v2107_v15, %v2105_v19  ;;  %v6184_v9 = vadd.f32 %v2107_v15, %v2106_v49  ;;  %v8411_v50 = vmax.f32 %v8410_v33, 0.0  ;;  %v8418_v31 = vld [vmem:[#allocation164_spill] sm:$0xff] }
 0x279   :  { %8402 = vst [vmem:[#allocation213_spill] sm:$0xff] %v6170_v3  ;;  %v8413_v51 = vmax.f32 %v8412_v21, 0.0  ;;  %v8415_v54 = vmax.f32 %v8414_v41, 0.0  ;;  %v8417_v14 = vmax.f32 %v8416_v48, 0.0  ;;  %v8419_v39 = vmax.f32 %v8418_v31, 0.0 }
 0x27a   :  { %8403 = vst [vmem:[#allocation209_spill] sm:$0xff] %v6172_v17  ;;  %v2177_v12 = vrot.slane %v8411_v50, 4  ;;  %v8421_v49 = vmax.f32 %v8420_v2, 0.0  ;;  %v8423_v52 = vmax.f32 %v8422_v37, 0.0  ;;  %v8425_v38 = vmax.f32 %v8424_v24, 0.0 }
 0x27b   :  { %8404 = vst [vmem:[#allocation225_spill] sm:$0xff] %v6174_v36  ;;  %v2178_v42 = vrot.slane %v8413_v51, 4  ;;  %v2180_v32 = vrot.slane %v8415_v54, 4  ;;  %v2182_v25 = vrot.slane %v8417_v14, 4  ;;  %v2184_v19 = vrot.slane %v8419_v39, 4 }
 0x27c   :  { %8405 = vst [vmem:[#allocation220_spill] sm:$0xff] %v6176_v58  ;;  %v2185_v15 = vrot.slane %v8421_v49, 4  ;;  %v2187_v50 = vrot.slane %v8423_v52, 4  ;;  %v2189_v51 = vrot.slane %v8425_v38, 4  ;;  %v8427_v20 = vmax.f32 %v8426_v8, 0.0  ;;  %v8430_v52 = vld [vmem:[#allocation166_spill] sm:$0xff] }
 0x27d   :  { %8406 = vst [vmem:[#allocation240_spill] sm:$0xff] %v6178_v11  ;;  %v2179_v40 = vsel %vm933_vm0, %v2177_v12, %v2178_v42  ;;  %v2181_v48 = vsel %vm933_vm0, %v2178_v42, %v2180_v32  ;;  %v2183_v14 = vsel %vm933_vm0, %v2180_v32, %v2182_v25  ;;  %v8429_v29 = vmax.f32 %v8428_v10, 0.0  ;;  %v8432_v38 = vld [vmem:[#allocation169_spill] sm:$0xff]  ;;  %v8434_v42 = vld [vmem:[#allocation167_spill] sm:$0xff]  ;;  %v8436_v25 = vld [vmem:[#allocation170_spill] sm:$0xff] }
 0x27e   :  { %8407 = vst [vmem:[#allocation234_spill] sm:$0xff] %v6180_v5  ;;  %v2191_v54 = vrot.slane %v8427_v20, 4  ;;  %v2186_v39 = vsel %vm933_vm0, %v2184_v19, %v2185_v15  ;;  %v2188_v12 = vsel %vm933_vm0, %v2185_v15, %v2187_v50  ;;  %v2190_v44 = vsel %vm933_vm0, %v2187_v50, %v2189_v51  ;;  %v8440_v51 = vld [vmem:[#allocation175_spill] sm:$0xff]  ;;  %v8452_v5 = vld [vmem:[#allocation173_spill] sm:$0xff] }
 0x27f   :  { %8408 = vst [vmem:[#allocation72_spill] sm:$0xff] %v6182_v7  ;;  %v2192_v49 = vrot.slane %v8429_v29, 4  ;;  %v8431_v1 = vmax.f32 %v8430_v52, 0.0  ;;  %v8433_v57 = vmax.f32 %v8432_v38, 0.0  ;;  %v8435_v28 = vmax.f32 %v8434_v42, 0.0  ;;  %v8442_v38 = vld [vmem:[#allocation78_spill] sm:$0xff] }
 0x280   :  { %8409 = vst [vmem:[#allocation194_spill] sm:$0xff] %v6184_v9  ;;  %v8437_v19 = vmax.f32 %v8436_v25, 0.0  ;;  %v8439_v29 = vmax.f32 %v8438_v61, 0.0  ;;  %v8445_v27 = vmax.f32 %v8444_v35, 0.0  ;;  %v8447_v47 = vmax.f32 %v8446_v26, 0.0  ;;  %v8448_v9 = vld [vmem:[#allocation70_spill] sm:$0xff] }
 0x281   :  { %v2194_v24 = vrot.slane %v8431_v1, 4  ;;  %v2196_v23 = vrot.slane %v8433_v57, 4  ;;  %v2193_v20 = vsel %vm933_vm0, %v2191_v54, %v2192_v49  ;;  %v2198_v32 = vrot.slane %v8435_v28, 4  ;;  %v8454_v58 = vld [vmem:[#allocation27_spill] sm:$0xff] }
 0x282   :  { %v2199_v22 = vrot.slane %v8437_v19, 4  ;;  %v2201_v45 = vrot.slane %v8439_v29, 4  ;;  %v8441_v1 = vmax.f32 %v8440_v51, 0.0  ;;  %v8443_v57 = vmax.f32 %v8442_v38, 0.0  ;;  %v8450_v51 = vld [vmem:[#allocation246_spill] sm:$0xff] }
 0x283   :  { %v2195_v15 = vsel %vm933_vm0, %v2192_v49, %v2194_v24  ;;  %v2197_v50 = vsel %vm933_vm0, %v2194_v24, %v2196_v23  ;;  %v2206_v19 = vrot.slane %v8445_v27, 4  ;;  %v2208_v29 = vrot.slane %v8447_v47, 4 }
 0x284   :  { %v2203_v56 = vrot.slane %v8441_v1, 4  ;;  %v2205_v53 = vrot.slane %v8443_v57, 4  ;;  %v2200_v54 = vsel %vm933_vm0, %v2198_v32, %v2199_v22  ;;  %v2202_v28 = vsel %vm933_vm0, %v2199_v22, %v2201_v45 }
 0x285   :  { %v8449_v23 = vmax.f32 %v8448_v9, 0.0  ;;  %v8451_v1 = vmax.f32 %v8450_v51, 0.0  ;;  %v8453_v57 = vmax.f32 %v8452_v5, 0.0  ;;  %v2209_v22 = vsel %vm933_vm0, %v2206_v19, %v2208_v29 }
 0x286   :  { %v2204_v49 = vsel %vm933_vm0, %v2201_v45, %v2203_v56  ;;  %v2207_v32 = vsel %vm933_vm0, %v2205_v53, %v2206_v19  ;;  %v8455_v27 = vmax.f32 %v8454_v58, 0.0  ;;  %v8456_v47 = vmax.f32 %v8410_v33, 0.0 }
 0x287   :  { %v2210_v24 = vrot.slane %v8449_v23, 4  ;;  %v2212_v7 = vrot.slane %v8451_v1, 4  ;;  %v2213_v11 = vrot.slane %v8453_v57, 4  ;;  %v8457_v45 = vmax.f32 %v8412_v21, 0.0 }
 0x288   :  { %v2215_v36 = vrot.slane %v8455_v27, 4  ;;  %v2235_v17 = vmax.f32 %v8456_v47, %v2179_v40  ;;  %v8458_v1 = vmax.f32 %v8414_v41, 0.0  ;;  %v8459_v19 = vmax.f32 %v8418_v31, 0.0 }
 0x289   :  { %v2211_v56 = vsel %vm933_vm0, %v2208_v29, %v2210_v24  ;;  %v2214_v9 = vsel %vm933_vm0, %v2212_v7, %v2213_v11  ;;  %v2236_v23 = vmax.f32 %v8457_v45, %v2181_v48  ;;  %v8460_v27 = vmax.f32 %v8420_v2, 0.0 }
 0x28a   :  { %v2237_v57 = vmax.f32 %v8458_v1, %v2183_v14  ;;  %v2216_v53 = vsel %vm933_vm0, %v2213_v11, %v2215_v36  ;;  %v2238_v3 = vmax.f32 %v8459_v19, %v2186_v39  ;;  %v8461_v40 = vmax.f32 %v8422_v37, 0.0 }
 0x28b   :  { %v2239_v55 = vmax.f32 %v8460_v27, %v2188_v12  ;;  %v8462_v29 = vmax.f32 %v8426_v8, 0.0  ;;  %v8463_v21 = vmax.f32 %v8428_v10, 0.0  ;;  %v8464_v41 = vmax.f32 %v8430_v52, 0.0 }
 0x28c   :  { %v2240_v33 = vmax.f32 %v8461_v40, %v2190_v44  ;;  %v8465_v11 = vmax.f32 %v8434_v42, 0.0  ;;  %v8466_v31 = vmax.f32 %v8436_v25, 0.0  ;;  %v8467_v2 = vmax.f32 %v8438_v61, 0.0 }
 0x28d   :  { %v2241_v7 = vmax.f32 %v8462_v29, %v2193_v20  ;;  %v2242_v48 = vmax.f32 %v8463_v21, %v2195_v15  ;;  %v2243_v14 = vmax.f32 %v8464_v41, %v2197_v50  ;;  %v8468_v44 = vmax.f32 %v8442_v38, 0.0 }
 0x28e   :  { %v2244_v24 = vmax.f32 %v8465_v11, %v2200_v54  ;;  %v2245_v39 = vmax.f32 %v8466_v31, %v2202_v28  ;;  %v2246_v12 = vmax.f32 %v8467_v2, %v2204_v49  ;;  %v8469_v8 = vmax.f32 %v8444_v35, 0.0 }
 0x28f   :  { %v2247_v37 = vmax.f32 %v8468_v44, %v2207_v32  ;;  %v8470_v10 = vmax.f32 %v8446_v26, 0.0  ;;  %v8471_v52 = vmax.f32 %v8450_v51, 0.0  ;;  %v8472_v42 = vmax.f32 %v8452_v5, 0.0 }
 0x290   :  { %v2248_v20 = vmax.f32 %v8469_v8, %v2209_v22  ;;  %v8473_v25 = vmax.f32 %v8454_v58, 0.0  ;;  %v6308_v61 = vmax.f32 %v2235_v17, %v2238_v3  ;;  %v6310_v49 = vmax.f32 %v2236_v23, %v2239_v55 }
 0x291   :  { %v2249_v15 = vmax.f32 %v8470_v10, %v2211_v56  ;;  %v2250_v50 = vmax.f32 %v8471_v52, %v2214_v9  ;;  %v2251_v54 = vmax.f32 %v8472_v42, %v2216_v53  ;;  %v6312_v38 = vmax.f32 %v2237_v57, %v2240_v33  ;;  %v8488_v10 = vld [vmem:[#allocation201_spill] sm:$0xff] }
 0x292   :  { %v2252_v28 = vmax.f32 %v8473_v25, %v2215_v36  ;;  %v6314_v35 = vmax.f32 %v2241_v7, %v2244_v24  ;;  %v6316_v32 = vmax.f32 %v2242_v48, %v2245_v39  ;;  %v6318_v26 = vmax.f32 %v2243_v14, %v2246_v12 }
 0x293   :  { %v6320_v51 = vmax.f32 %v2247_v37, %v2250_v50  ;;  %v6322_v22 = vmax.f32 %v2248_v20, %v2251_v54  ;;  %v8474_v36 = vmax.f32 %v6140_v46, 0.0  ;;  %v8475_v55 = vmax.f32 %v6142_v13, 0.0  ;;  %v8490_v50 = vld [vmem:[#allocation213_spill] sm:$0xff] }
 0x294   :  { %v6324_v5 = vmax.f32 %v2249_v15, %v2252_v28  ;;  %v8476_v58 = vmax.f32 %v6144_v60, 0.0  ;;  %v8477_v56 = vmax.f32 %v6146_v4, 0.0  ;;  %v8478_v45 = vmax.f32 %v6148_v6, 0.0  ;;  %v8492_v28 = vld [vmem:[#allocation209_spill] sm:$0xff] }
 0x295   :  { %v2285_v3 = vrot.slane %v8474_v36, 4  ;;  %v2286_v17 = vrot.slane %v8475_v55, 4  ;;  %v8479_v1 = vmax.f32 %v6150_v43, 0.0  ;;  %v8480_v53 = vmax.f32 %v6152_v63, 0.0  ;;  %v8494_v55 = vld [vmem:[#allocation225_spill] sm:$0xff] }
 0x296   :  { %v2288_v47 = vrot.slane %v8476_v58, 4  ;;  %v2290_v9 = vrot.slane %v8477_v56, 4  ;;  %v2292_v23 = vrot.slane %v8478_v45, 4  ;;  %v8481_v33 = vmax.f32 %v6154_v16, 0.0  ;;  %v8496_v45 = vld [vmem:[#allocation220_spill] sm:$0xff] }
 0x297   :  { %v2293_v57 = vrot.slane %v8479_v1, 4  ;;  %v2295_v19 = vrot.slane %v8480_v53, 4  ;;  %v2287_v27 = vsel %vm933_vm0, %v2285_v3, %v2286_v17  ;;  %v8482_v7 = vmax.f32 %v6156_v59, 0.0  ;;  %v8498_v53 = vld [vmem:[#allocation240_spill] sm:$0xff] }
 0x298   :  { %v2289_v40 = vsel %vm933_vm0, %v2286_v17, %v2288_v47  ;;  %v2297_v29 = vrot.slane %v8481_v33, 4  ;;  %v2291_v21 = vsel %vm933_vm0, %v2288_v47, %v2290_v9  ;;  %v8483_v14 = vmax.f32 %v6158_v34, 0.0 }
 0x299   :  { %v2299_v4 = vrot.slane %v8482_v7, 4  ;;  %v2294_v48 = vsel %vm933_vm0, %v2292_v23, %v2293_v57  ;;  %v2296_v41 = vsel %vm933_vm0, %v2293_v57, %v2295_v19  ;;  %v8484_v31 = vmax.f32 %v6160_v30, 0.0 }
 0x29a   :  { %v2300_v11 = vrot.slane %v8483_v14, 4  ;;  %v2298_v24 = vsel %vm933_vm0, %v2295_v19, %v2297_v29  ;;  %v8485_v16 = vmax.f32 %v6162_v0, 0.0  ;;  %v8486_v12 = vmax.f32 %v6164_v18, 0.0  ;;  %v8500_v29 = vld [vmem:[#allocation234_spill] sm:$0xff]  ;;  %v8502_v14 = vld [vmem:[#allocation72_spill] sm:$0xff] }
 0x29b   :  { %v2302_v39 = vrot.slane %v8484_v31, 4  ;;  %v8487_v8 = vmax.f32 %v6166_v62, 0.0  ;;  %v8489_v15 = vmax.f32 %v8488_v10, 0.0  ;;  %v8491_v42 = vmax.f32 %v8490_v50, 0.0 }
 0x29c   :  { %v2304_v2 = vrot.slane %v8485_v16, 4  ;;  %v2306_v44 = vrot.slane %v8486_v12, 4  ;;  %v2301_v37 = vsel %vm933_vm0, %v2299_v4, %v2300_v11  ;;  %v8493_v36 = vmax.f32 %v8492_v28, 0.0  ;;  %v8504_v16 = vld [vmem:[#allocation194_spill] sm:$0xff] }
 0x29d   :  { %v2307_v20 = vrot.slane %v8487_v8, 4  ;;  %v2309_v52 = vrot.slane %v8489_v15, 4  ;;  %v2311_v54 = vrot.slane %v8491_v42, 4  ;;  %v2303_v25 = vsel %vm933_vm0, %v2300_v11, %v2302_v39 }
 0x29e   :  { %v2305_v0 = vsel %vm933_vm0, %v2302_v39, %v2304_v2  ;;  %v2313_v3 = vrot.slane %v8493_v36, 4  ;;  %v8495_v17 = vmax.f32 %v8494_v55, 0.0  ;;  %v8497_v23 = vmax.f32 %v8496_v45, 0.0 }
 0x29f   :  { %v2308_v47 = vsel %vm933_vm0, %v2306_v44, %v2307_v20  ;;  %v2310_v56 = vsel %vm933_vm0, %v2307_v20, %v2309_v52  ;;  %v2312_v9 = vsel %vm933_vm0, %v2309_v52, %v2311_v54  ;;  %v8499_v19 = vmax.f32 %v8498_v53, 0.0 }
 0x2a0   :  { %v2314_v58 = vrot.slane %v8495_v17, 4  ;;  %v2316_v1 = vrot.slane %v8497_v23, 4  ;;  %v8501_v7 = vmax.f32 %v8500_v29, 0.0  ;;  %v8503_v11 = vmax.f32 %v8502_v14, 0.0 }
 0x2a1   :  { %v2318_v33 = vrot.slane %v8499_v19, 4  ;;  %v8505_v2 = vmax.f32 %v8504_v16, 0.0  ;;  %v8506_v44 = vmax.f32 %v6140_v46, 0.0  ;;  %v8507_v20 = vmax.f32 %v6142_v13, 0.0 }
 0x2a2   :  { %v2315_v57 = vsel %vm933_vm0, %v2313_v3, %v2314_v58  ;;  %v2320_v4 = vrot.slane %v8501_v7, 4  ;;  %v2321_v31 = vrot.slane %v8503_v11, 4  ;;  %v2317_v39 = vsel %vm933_vm0, %v2314_v58, %v2316_v1 }
 0x2a3   :  { %v2323_v12 = vrot.slane %v8505_v2, 4  ;;  %v2343_v8 = vmax.f32 %v8506_v44, %v2287_v27  ;;  %v2344_v15 = vmax.f32 %v8507_v20, %v2289_v40  ;;  %v2319_v52 = vsel %vm933_vm0, %v2316_v1, %v2318_v33 }
 0x2a4   :  { %v2322_v50 = vsel %vm933_vm0, %v2320_v4, %v2321_v31  ;;  %v8508_v42 = vmax.f32 %v6144_v60, 0.0  ;;  %v8509_v36 = vmax.f32 %v6148_v6, 0.0  ;;  %v8510_v58 = vmax.f32 %v6150_v43, 0.0 }
 0x2a5   :  { %v2324_v17 = vsel %vm933_vm0, %v2321_v31, %v2323_v12  ;;  %v8511_v46 = vmax.f32 %v6152_v63, 0.0  ;;  %v8512_v13 = vmax.f32 %v6156_v59, 0.0  ;;  %v8513_v1 = vmax.f32 %v6158_v34, 0.0 }
 0x2a6   :  { %v2345_v54 = vmax.f32 %v8508_v42, %v2291_v21  ;;  %v2346_v3 = vmax.f32 %v8509_v36, %v2294_v48  ;;  %v2347_v23 = vmax.f32 %v8510_v58, %v2296_v41  ;;  %v8514_v21 = vmax.f32 %v6160_v30, 0.0 }
 0x2a7   :  { %v2348_v27 = vmax.f32 %v8511_v46, %v2298_v24  ;;  %v2349_v40 = vmax.f32 %v8512_v13, %v2301_v37  ;;  %v2350_v60 = vmax.f32 %v8513_v1, %v2303_v25  ;;  %v8515_v48 = vmax.f32 %v6164_v18, 0.0 }
 0x2a8   :  { %v2351_v6 = vmax.f32 %v8514_v21, %v2305_v0  ;;  %v8516_v43 = vmax.f32 %v6166_v62, 0.0  ;;  %v8517_v63 = vmax.f32 %v8488_v10, 0.0  ;;  %v8518_v24 = vmax.f32 %v8492_v28, 0.0 }
 0x2a9   :  { %v2352_v53 = vmax.f32 %v8515_v48, %v2308_v47  ;;  %v8519_v34 = vmax.f32 %v8494_v55, 0.0  ;;  %v8520_v30 = vmax.f32 %v8496_v45, 0.0  ;;  %v8521_v18 = vmov %v8501_v7 }
 0x2aa   :  { %v2353_v41 = vmax.f32 %v8516_v43, %v2310_v56  ;;  %v2354_v59 = vmax.f32 %v8517_v63, %v2312_v9  ;;  %v2355_v37 = vmax.f32 %v8518_v24, %v2315_v57  ;;  %v2358_v62 = vmax.f32 %v8521_v18, %v2322_v50 }
 0x2ab   :  { %v2356_v25 = vmax.f32 %v8519_v34, %v2317_v39  ;;  %v2357_v0 = vmax.f32 %v8520_v30, %v2319_v52  ;;  %v8522_v10 = vmov %v8503_v11  ;;  %v8523_v28 = vmov %v8505_v2 }
 0x2ac   :  { %v2359_v47 = vmax.f32 %v8522_v10, %v2324_v17  ;;  %v2360_v56 = vmax.f32 %v8523_v28, %v2323_v12  ;;  %v6439_v55 = vmax.f32 %v2343_v8, %v2346_v3  ;;  %v6443_v9 = vmax.f32 %v2344_v15, %v2347_v23 }
 0x2ad   :  { %v6445_v45 = vmax.f32 %v2345_v54, %v2348_v27  ;;  %v6447_v57 = vmax.f32 %v2349_v40, %v2352_v53  ;;  %v6449_v19 = vmax.f32 %v2350_v60, %v2353_v41  ;;  %v6451_v33 = vmax.f32 %v2351_v6, %v2354_v59 }
 0x2ae   :  { %v6453_v29 = vmax.f32 %v2355_v37, %v2358_v62  ;;  %v6455_v7 = vmax.f32 %v2356_v25, %v2359_v47  ;;  %v6457_v4 = vmax.f32 %v2357_v0, %v2360_v56  ;;  %v2370_v14 = vstv %s6365_s7  ;;  %s6564_s7 = sld [smem:[#allocation15 + $0x4]] }
 0x2af   :  { %v2375_v11 = vstv %s6373_s28  ;;  %v2384_v31 = vstv %s6380_s29  ;;  %v2389_v39 = vstv %s6389_s0  ;;  %v2371_v16 = vmul.f32 %v2370_v14, %v6308_v61  ;;  %s6570_s28 = sld [smem:[#allocation15 + $0x5]] }
 0x2b0   :  { %v2372_v2 = vmul.f32 %v2370_v14, %v6310_v49  ;;  %v2373_v12 = vmul.f32 %v2370_v14, %v6314_v35  ;;  %v2374_v44 = vmul.f32 %v2370_v14, %v6316_v32  ;;  %v2376_v8 = vmul.f32 %v2375_v11, %v6310_v49  ;;  %s6576_s29 = sld [smem:[#allocation15 + $0x6]] }
 0x2b1   :  { %v2377_v20 = vmul.f32 %v2375_v11, %v6312_v38  ;;  %v2378_v15 = vmul.f32 %v2375_v11, %v6316_v32  ;;  %v2379_v52 = vmul.f32 %v2375_v11, %v6318_v26  ;;  %v2385_v50 = vmul.f32 %v2384_v31, %v6314_v35  ;;  %s6582_s0 = sld [smem:[#allocation15 + $0x7]] }
 0x2b2   :  { %v2386_v42 = vmul.f32 %v2384_v31, %v6316_v32  ;;  %v2387_v54 = vmul.f32 %v2384_v31, %v6320_v51  ;;  %v2388_v36 = vmul.f32 %v2384_v31, %v6322_v22  ;;  %v2380_v3 = vadd.f32 %v2376_v8, %v2371_v16 }
 0x2b3   :  { %v2381_v17 = vadd.f32 %v2377_v20, %v2372_v2  ;;  %v2382_v58 = vadd.f32 %v2378_v15, %v2373_v12  ;;  %v2383_v23 = vadd.f32 %v2379_v52, %v2374_v44  ;;  %v2390_v46 = vmul.f32 %v2389_v39, %v6316_v32 }
 0x2b4   :  { %v2391_v27 = vmul.f32 %v2389_v39, %v6318_v26  ;;  %v2392_v13 = vmul.f32 %v2389_v39, %v6322_v22  ;;  %v2393_v40 = vmul.f32 %v2389_v39, %v6324_v5  ;;  %v2398_v1 = vstv %s6411_s30  ;;  %s6587_s30 = sld [smem:[#allocation15 + $0x8]] }
 0x2b5   :  { %v2403_v60 = vstv %s6421_s10  ;;  %v2412_v21 = vstv %s6431_s11  ;;  %v2417_v6 = vstv %s6441_s12  ;;  %v2394_v48 = vadd.f32 %v2390_v46, %v2385_v50  ;;  %s6593_s10 = sld [smem:[#allocation15 + $0x9]] }
 0x2b6   :  { %v2395_v53 = vadd.f32 %v2391_v27, %v2386_v42  ;;  %v2396_v43 = vadd.f32 %v2392_v13, %v2387_v54  ;;  %v2397_v41 = vadd.f32 %v2393_v40, %v2388_v36  ;;  %v2399_v63 = vmul.f32 %v2398_v1, %v6439_v55  ;;  %s6596_s11 = sld [smem:[#allocation15 + $0xa]] }
 0x2b7   :  { %v2400_v59 = vmul.f32 %v2398_v1, %v6443_v9  ;;  %v2401_v24 = vmul.f32 %v2398_v1, %v6447_v57  ;;  %v2402_v37 = vmul.f32 %v2398_v1, %v6449_v19  ;;  %v2404_v34 = vmul.f32 %v2403_v60, %v6443_v9  ;;  %s6601_s12 = sld [smem:[#allocation15 + $0xb]] }
 0x2b8   :  { %v2405_v25 = vmul.f32 %v2403_v60, %v6445_v45  ;;  %v2406_v30 = vmul.f32 %v2403_v60, %v6449_v19  ;;  %v2407_v0 = vmul.f32 %v2403_v60, %v6451_v33  ;;  %v2413_v18 = vmul.f32 %v2412_v21, %v6447_v57 }
 0x2b9   :  { %v2414_v62 = vmul.f32 %v2412_v21, %v6449_v19  ;;  %v2415_v10 = vmul.f32 %v2412_v21, %v6453_v29  ;;  %v2416_v47 = vmul.f32 %v2412_v21, %v6455_v7  ;;  %v2408_v28 = vadd.f32 %v2404_v34, %v2399_v63 }
 0x2ba   :  { %v2409_v56 = vadd.f32 %v2405_v25, %v2400_v59  ;;  %v2410_v14 = vadd.f32 %v2406_v30, %v2401_v24  ;;  %v2411_v11 = vadd.f32 %v2407_v0, %v2402_v37  ;;  %v2418_v31 = vmul.f32 %v2417_v6, %v6449_v19 }
 0x2bb   :  { %v2419_v39 = vmul.f32 %v2417_v6, %v6451_v33  ;;  %v2420_v16 = vmul.f32 %v2417_v6, %v6455_v7  ;;  %v2421_v2 = vmul.f32 %v2417_v6, %v6457_v4  ;;  %v2426_v12 = vadd.f32 %v2394_v48, %v2380_v3 }
 0x2bc   :  { %v2427_v44 = vadd.f32 %v2395_v53, %v2381_v17  ;;  %v2428_v8 = vadd.f32 %v2396_v43, %v2382_v58  ;;  %v2429_v20 = vadd.f32 %v2397_v41, %v2383_v23  ;;  %v2422_v15 = vadd.f32 %v2418_v31, %v2413_v18 }
 0x2bd   :  { %v2423_v52 = vadd.f32 %v2419_v39, %v2414_v62  ;;  %v2424_v50 = vadd.f32 %v2420_v16, %v2415_v10  ;;  %v2425_v42 = vadd.f32 %v2421_v2, %v2416_v47  ;;  %v2438_v54 = vstv %s6489_s16  ;;  %s6614_s16 = sld [smem:[#allocation15 + $0xf]] }
 0x2be   :  { %v2447_v36 = vstv %s6475_s13  ;;  %v2452_v46 = vstv %s6477_s14  ;;  %v2430_v27 = vadd.f32 %v2422_v15, %v2408_v28  ;;  %v2461_v24 = vstv %s6483_s15  ;;  %s6604_s13 = sld [smem:[#allocation15 + $0xc]] }
 0x2bf   :  { %v2431_v13 = vadd.f32 %v2423_v52, %v2409_v56  ;;  %v2432_v40 = vadd.f32 %v2424_v50, %v2410_v14  ;;  %v2433_v3 = vadd.f32 %v2425_v42, %v2411_v11  ;;  %v2448_v17 = vmul.f32 %v2447_v36, %v6308_v61  ;;  %s6610_s14 = sld [smem:[#allocation15 + $0xd]] }
 0x2c0   :  { %v2449_v58 = vmul.f32 %v2447_v36, %v6310_v49  ;;  %v2450_v23 = vmul.f32 %v2447_v36, %v6314_v35  ;;  %v2451_v1 = vmul.f32 %v2447_v36, %v6316_v32  ;;  %v2434_v60 = vadd.f32 %v2430_v27, %v2426_v12  ;;  %s6612_s15 = sld [smem:[#allocation15 + $0xe]] }
 0x2c1   :  { %v2435_v21 = vadd.f32 %v2431_v13, %v2427_v44  ;;  %v2436_v6 = vadd.f32 %v2432_v40, %v2428_v8  ;;  %v2437_v48 = vadd.f32 %v2433_v3, %v2429_v20  ;;  %v2453_v53 = vmul.f32 %v2452_v46, %v6310_v49 }
 0x2c2   :  { %v2454_v43 = vmul.f32 %v2452_v46, %v6312_v38  ;;  %v2455_v61 = vmul.f32 %v2452_v46, %v6316_v32  ;;  %v2456_v41 = vmul.f32 %v2452_v46, %v6318_v26  ;;  %v6544_v63 = vadd.f32 %v2438_v54, %v2434_v60 }
 0x2c3   :  { %v6546_v59 = vadd.f32 %v2438_v54, %v2435_v21  ;;  %v6551_v37 = vadd.f32 %v2438_v54, %v2436_v6  ;;  %v6553_v49 = vadd.f32 %v2438_v54, %v2437_v48  ;;  %v2457_v38 = vadd.f32 %v2453_v53, %v2448_v17 }
 0x2c4   :  { %v2443_v34 = vmax.f32 %v6544_v63, 0.0  ;;  %v2458_v25 = vadd.f32 %v2454_v43, %v2449_v58  ;;  %v2459_v30 = vadd.f32 %v2455_v61, %v2450_v23  ;;  %v2460_v0 = vadd.f32 %v2456_v41, %v2451_v1 }
 0x2c5   :  { %v2444_v18 = vmax.f32 %v6546_v59, 0.0  ;;  %v2462_v62 = vmul.f32 %v2461_v24, %v6314_v35  ;;  %v2463_v10 = vmul.f32 %v2461_v24, %v6316_v32  ;;  %v2464_v47 = vmul.f32 %v2461_v24, %v6320_v51 }
 0x2c6   :  { %v2465_v28 = vmul.f32 %v2461_v24, %v6322_v22  ;;  %v2466_v56 = vstv %s6491_s1  ;;  %v2475_v14 = vstv %s6497_s17  ;;  %v2480_v11 = vstv %s6503_s2  ;;  %s6616_s1 = sld [smem:[#allocation15 + $0x10]] }
 0x2c7   :  { %v2467_v31 = vmul.f32 %v2466_v56, %v6316_v32  ;;  %v2468_v39 = vmul.f32 %v2466_v56, %v6318_v26  ;;  %v2469_v35 = vmul.f32 %v2466_v56, %v6322_v22  ;;  %v2470_v16 = vmul.f32 %v2466_v56, %v6324_v5  ;;  %s6618_s17 = sld [smem:[#allocation15 + $0x11]] }
 0x2c8   :  { %v2445_v51 = vmax.f32 %v6551_v37, 0.0  ;;  %v2446_v2 = vmax.f32 %v6553_v49, 0.0  ;;  %v2476_v12 = vmul.f32 %v2475_v14, %v6439_v55  ;;  %v2489_v44 = vstv %s6509_s18  ;;  %s6625_s2 = sld [smem:[#allocation15 + $0x12]] }
 0x2c9   :  { %v2471_v8 = vadd.f32 %v2467_v31, %v2462_v62  ;;  %v2477_v32 = vmul.f32 %v2475_v14, %v6443_v9  ;;  %v2478_v26 = vmul.f32 %v2475_v14, %v6447_v57  ;;  %v2479_v22 = vmul.f32 %v2475_v14, %v6449_v19  ;;  %s6627_s18 = sld [smem:[#allocation17]] }
 0x2ca   :  { %v2481_v5 = vmul.f32 %v2480_v11, %v6443_v9  ;;  %v2482_v20 = vmul.f32 %v2480_v11, %v6445_v45  ;;  %v2483_v15 = vmul.f32 %v2480_v11, %v6449_v19  ;;  %v2484_v55 = vmul.f32 %v2480_v11, %v6451_v33 }
 0x2cb   :  { %v2472_v52 = vadd.f32 %v2468_v39, %v2463_v10  ;;  %v2473_v50 = vadd.f32 %v2469_v35, %v2464_v47  ;;  %v2474_v42 = vadd.f32 %v2470_v16, %v2465_v28  ;;  %v2490_v54 = vmul.f32 %v2489_v44, %v6447_v57 }
 0x2cc   :  { %v2485_v36 = vadd.f32 %v2481_v5, %v2476_v12  ;;  %v2491_v46 = vmul.f32 %v2489_v44, %v6449_v19  ;;  %v2492_v9 = vmul.f32 %v2489_v44, %v6453_v29  ;;  %v2493_v45 = vmul.f32 %v2489_v44, %v6455_v7 }
 0x2cd   :  { %v2486_v27 = vadd.f32 %v2482_v20, %v2477_v32  ;;  %v2487_v13 = vadd.f32 %v2483_v15, %v2478_v26  ;;  %v2488_v40 = vadd.f32 %v2484_v55, %v2479_v22  ;;  %v2494_v3 = vstv %s6511_s19  ;;  %8524 = sst [smem:[#allocation247_spill]] %s6618_s17 }
 0x2ce   :  { %v2495_v17 = vmul.f32 %v2494_v3, %v6449_v19  ;;  %v2496_v57 = vmul.f32 %v2494_v3, %v6451_v33  ;;  %v2497_v58 = vmul.f32 %v2494_v3, %v6455_v7  ;;  %v2498_v23 = vmul.f32 %v2494_v3, %v6457_v4  ;;  %8525 = sst [smem:[#allocation248_spill]] %s6625_s2 }
 0x2cf   :  { %v2503_v29 = vadd.f32 %v2471_v8, %v2457_v38  ;;  %v2504_v1 = vadd.f32 %v2472_v52, %v2458_v25  ;;  %v2505_v60 = vadd.f32 %v2473_v50, %v2459_v30  ;;  %v2506_v21 = vadd.f32 %v2474_v42, %v2460_v0  ;;  %s6629_s19 = sld [smem:[#allocation17 + $0x1]] }
 0x2d0   :  { %v2499_v6 = vadd.f32 %v2495_v17, %v2490_v54  ;;  %v2500_v48 = vadd.f32 %v2496_v57, %v2491_v46  ;;  %v2501_v53 = vadd.f32 %v2497_v58, %v2492_v9  ;;  %v2502_v43 = vadd.f32 %v2498_v23, %v2493_v45  ;;  %s6641_s2 = sld [smem:[#allocation17 + $0x6]] }
 0x2d1   :  { %v2515_v61 = vstv %s6517_s20  ;;  %v2524_v41 = vmax.f32 %v2443_v34, %v2444_v18  ;;  %v2525_v24 = vmax.f32 %v2445_v51, %v2446_v2  ;;  %s6631_s20 = sld [smem:[#allocation17 + $0x2]]  ;;  %v2530_v28 = vstv %s6519_s4 }
 0x2d2   :  { %v2507_v19 = vadd.f32 %v2499_v6, %v2485_v36  ;;  %v2508_v33 = vadd.f32 %v2500_v48, %v2486_v27  ;;  %v2509_v7 = vadd.f32 %v2501_v53, %v2487_v13  ;;  %v2510_v4 = vadd.f32 %v2502_v43, %v2488_v40  ;;  %s6646_s17 = sld [smem:[#allocation17 + $0x7]] }
 0x2d3   :  { %v2526_v63 = vmax.f32 %v2524_v41, %v2525_v24  ;;  %v2538_v56 = vstv %s6526_s8  ;;  %v2532_v31 = vstv %s6521_s6  ;;  %v2535_v39 = vstv %s6534_s3  ;;  %s6649_s4 = sld [smem:[#allocation15 + $0x13]] }
 0x2d4   :  { %v2511_v37 = vadd.f32 %v2507_v19, %v2503_v29  ;;  %v2512_v49 = vadd.f32 %v2508_v33, %v2504_v1  ;;  %v2513_v38 = vadd.f32 %v2509_v7, %v2505_v60  ;;  %v2514_v25 = vadd.f32 %v2510_v4, %v2506_v21  ;;  %s8526_s6 = sld [smem:[#allocation247_spill]] }
 0x2d5   :  { %v2540_v35 = vstv %s6528_s21  ;;  %v2531_v51 = vmul.f32 %v2530_v28, %v2526_v63  ;;  %v2539_v2 = vmul.f32 %v2538_v56, %v2526_v63  ;;  %v2543_v12 = vstv %s6536_s22  ;;  %s8527_s8 = sld [smem:[#allocation248_spill]] }
 0x2d6   :  { %v2516_v30 = vadd.f32 %v2515_v61, %v2511_v37  ;;  %v2517_v0 = vadd.f32 %v2515_v61, %v2512_v49  ;;  %v2518_v62 = vadd.f32 %v2515_v61, %v2513_v38  ;;  %v2519_v59 = vadd.f32 %v2515_v61, %v2514_v25 }
 0x2d7   :  { %v2546_v44 = vstv %s6542_s23  ;;  %v2548_v8 = vstv %s6549_s24  ;;  %v2551_v32 = vstv %s6627_s18  ;;  %v2554_v26 = vstv %s6555_s26  ;;  %s8528_s23 = sld [smem:[#allocation249_spill]]  ;;  %s8529_s26 = smov 8  }
 0x2d8   :  { %v2520_v34 = vmax.f32 %v2516_v30, 0.0  ;;  %v2521_v18 = vmax.f32 %v2517_v0, 0.0  ;;  %v2522_v10 = vmax.f32 %v2518_v62, 0.0  ;;  %v2523_v47 = vmax.f32 %v2519_v59, 0.0 }
 0x2d9   :  { %v2556_v20 = vstv %s6558_s27  ;;  %v2559_v15 = vstv %s6629_s19  ;;  %v2562_v55 = vstv %s6564_s7  ;;  %v2564_v52 = vstv %s6570_s28  ;;  %s8530_s27 = smov 128  }
 0x2da   :  { %v2527_v14 = vmax.f32 %v2520_v34, %v2521_v18  ;;  %v2528_v11 = vmax.f32 %v2522_v10, %v2523_v47  ;;  %v2567_v50 = vstv %s6631_s20  ;;  %v2570_v42 = vstv %s6576_s29 }
 0x2db   :  { %v2572_v46 = vstv %s6582_s0  ;;  %v2575_v9 = vstv %s6633_s5  ;;  %v2578_v45 = vstv %s6587_s30  ;;  %v2580_v27 = vstv %s6593_s10  ;;  %s6679_s5 = sld [smem:[#allocation17 + $0x8]] }
 0x2dc   :  { %v2529_v16 = vmax.f32 %v2527_v14, %v2528_v11  ;;  %v2583_v13 = vstv %s6635_s25  ;;  %v2586_v40 = vstv %s6596_s11  ;;  %v2588_v57 = vstv %s6601_s12  ;;  %s6681_s25 = sld [smem:[#allocation17 + $0x9]] }
 0x2dd   :  { %v2591_v58 = vstv %s6639_s9  ;;  %v2594_v23 = vstv %s6604_s13  ;;  %v2596_v29 = vstv %s6610_s14  ;;  %v2599_v1 = vstv %s6641_s2  ;;  %s2887_s9 = smov [#allocation18]   ;;  %s2632_s24 = sshll.u32 %s8528_s23, 4  ;;  %s2633_s24 = int_to_ptr.hbm [resolvable:$true] %s2632_s24 }
 0x2de   :  { %v2533_v22 = vmul.f32 %v2532_v31, %v2529_v16  ;;  %v2541_v5 = vmul.f32 %v2540_v35, %v2529_v16  ;;  %v2602_v60 = vstv %s6612_s15  ;;  %v2604_v48 = vstv %s6614_s16  ;;  %s2630_s21 = sshll.u32 %s2887_s9, 4  ;;  %s2631_s21 = int_to_ptr.vmem [resolvable:$true] %s2630_s21 }
 0x2df   :  { %v2607_v53 = vstv %s6646_s17  ;;  %v2610_v43 = vstv %s6616_s1  ;;  %v2612_v19 = vstv %s8526_s6  ;;  %v2618_v33 = vstv %s8527_s8 }
 0x2e0   :  { %v2534_v54 = vadd.f32 %v2533_v22, %v2531_v51  ;;  %v2542_v36 = vadd.f32 %v2541_v5, %v2539_v2  ;;  %v2620_v7 = vstv %s6649_s4 }
 0x2e1   :  { %v2615_v5 = vstv %s6679_s5 }
 0x2e2   :  { %v2536_v3 = vadd.f32 %v2535_v39, %v2534_v54  ;;  %v2544_v17 = vadd.f32 %v2543_v12, %v2542_v36 }
 0x2e4   :  { %v2537_v21 = vmax.f32 %v2536_v3, 0.0  ;;  %v2545_v6 = vmax.f32 %v2544_v17, 0.0 }
 0x2e6   :  { %v2547_v4 = vmul.f32 %v2546_v44, %v2537_v21  ;;  %v2549_v61 = vmul.f32 %v2548_v8, %v2545_v6  ;;  %v2555_v41 = vmul.f32 %v2554_v26, %v2537_v21  ;;  %v2557_v24 = vmul.f32 %v2556_v20, %v2545_v6 }
 0x2e7   :  { %v2563_v37 = vmul.f32 %v2562_v55, %v2537_v21  ;;  %v2565_v49 = vmul.f32 %v2564_v52, %v2545_v6  ;;  %v2571_v38 = vmul.f32 %v2570_v42, %v2537_v21  ;;  %v2573_v25 = vmul.f32 %v2572_v46, %v2545_v6 }
 0x2e8   :  { %v2550_v30 = vadd.f32 %v2549_v61, %v2547_v4  ;;  %v2558_v0 = vadd.f32 %v2557_v24, %v2555_v41  ;;  %v2579_v62 = vmul.f32 %v2578_v45, %v2537_v21  ;;  %v2581_v59 = vmul.f32 %v2580_v27, %v2545_v6 }
 0x2e9   :  { %v2566_v63 = vadd.f32 %v2565_v49, %v2563_v37  ;;  %v2574_v34 = vadd.f32 %v2573_v25, %v2571_v38  ;;  %v2587_v18 = vmul.f32 %v2586_v40, %v2537_v21  ;;  %v2589_v10 = vmul.f32 %v2588_v57, %v2545_v6 }
 0x2ea   :  { %v2552_v47 = vadd.f32 %v2551_v32, %v2550_v30  ;;  %v2560_v28 = vadd.f32 %v2559_v15, %v2558_v0  ;;  %v2582_v56 = vadd.f32 %v2581_v59, %v2579_v62  ;;  %v2595_v14 = vmul.f32 %v2594_v23, %v2537_v21 }
 0x2eb   :  { %v2568_v11 = vadd.f32 %v2567_v50, %v2566_v63  ;;  %v2576_v31 = vadd.f32 %v2575_v9, %v2574_v34  ;;  %v2590_v39 = vadd.f32 %v2589_v10, %v2587_v18  ;;  %v2597_v35 = vmul.f32 %v2596_v29, %v2545_v6 }
 0x2ec   :  { %2553 = vst [vmem:[#allocation18] sm:$0x1] %v2552_v47  ;;  %v2584_v16 = vadd.f32 %v2583_v13, %v2582_v56  ;;  %v2603_v51 = vmul.f32 %v2602_v60, %v2537_v21  ;;  %v2605_v2 = vmul.f32 %v2604_v48, %v2545_v6  ;;  %v2611_v12 = vmul.f32 %v2610_v43, %v2537_v21 }
 0x2ed   :  { %2561 = vst [vmem:[#allocation18 + $0x1] sm:$0x1] %v2560_v28  ;;  %v2592_v44 = vadd.f32 %v2591_v58, %v2590_v39  ;;  %v2598_v8 = vadd.f32 %v2597_v35, %v2595_v14  ;;  %v2613_v26 = vmul.f32 %v2612_v19, %v2545_v6  ;;  %v2619_v22 = vmul.f32 %v2618_v33, %v2537_v21 }
 0x2ee   :  { %2569 = vst [vmem:[#allocation18 + $0x2] sm:$0x1] %v2568_v11  ;;  %v2606_v32 = vadd.f32 %v2605_v2, %v2603_v51  ;;  %v2621_v20 = vmul.f32 %v2620_v7, %v2545_v6  ;;  %v2623_v52 = vstv %s6681_s25 }
 0x2ef   :  { %2577 = vst [vmem:[#allocation18 + $0x3] sm:$0x1] %v2576_v31  ;;  %v2600_v15 = vadd.f32 %v2599_v1, %v2598_v8  ;;  %v2614_v55 = vadd.f32 %v2613_v26, %v2611_v12 }
 0x2f0   :  { %2585 = vst [vmem:[#allocation18 + $0x4] sm:$0x1] %v2584_v16  ;;  %v2608_v50 = vadd.f32 %v2607_v53, %v2606_v32  ;;  %v2622_v42 = vadd.f32 %v2621_v20, %v2619_v22 }
 0x2f1   :  { %2593 = vst [vmem:[#allocation18 + $0x5] sm:$0x1] %v2592_v44  ;;  %v2616_v54 = vadd.f32 %v2615_v5, %v2614_v55 }
 0x2f2   :  { %2601 = vst [vmem:[#allocation18 + $0x6] sm:$0x1] %v2600_v15  ;;  %v2624_v36 = vadd.f32 %v2623_v52, %v2622_v42 }
 0x2f3   :  { %2609 = vst [vmem:[#allocation18 + $0x7] sm:$0x1] %v2608_v50 }
 0x2f4   :  { %2617 = vst [vmem:[#allocation18 + $0x8] sm:$0x1] %v2616_v54 }
 0x2f5   :  { %2625 = vst [vmem:[#allocation18 + $0x9] sm:$0x1] %v2624_v36 }
 0x2f6   :  { %2638 = dma.vmem_to_hbm [thread:$0]  %s2631_s21, 256, %s2633_s24, [#allocation4], %s8530_s27, %s8530_s27, %s8529_s26  }
 0x2f7   :  { %2874 = dma.done.wait [#allocation4], 256  }
 0x2f8   :  { %2875 = vsyncadd [#allocation4], 4294967040 }
 0x2f9   :  { %2643 = vsyncpa [#allocation3], 1 }
 0x2fa   :  { %2644 = vsyncpa [#allocation4], 1 }
 0x2fb   :  { %2645 = vsyncpa [#allocation5], 1 }
 0x2fc   :  { %2646 = vsyncpa [#allocation6], 1 }
 0x2fd   :  { %2647 = vsyncpa [#allocation10], 1 }
 0x2fe   :  { %2648 = vsyncpa [#allocation13], 1 }
 0x2ff   :  { %2649 = vsyncpa [#allocation16], 1 }

</bundles_post_ra>
